<compile_context>
chip_gen: v7x
topology: tpu7x:2x2x1
jax: 0.10.0
libtpu: 0.0.40
codegen_flags: <defaults>
</compile_context>

<pallas_src>
import functools
import math

import jax
import jax.numpy as jnp
from jax import lax
from jax.experimental import pallas as pl
from jax.experimental.pallas import tpu as pltpu

NEG_INF = -1e9


# ----------------------------- in-kernel helpers ---------------------------

def _masked_softmax(s, mask):
    # mask: bool, broadcastable against s; matches masked_fill(mask==0, -1e9).
    s = jnp.where(mask, s, NEG_INF)
    s = s - jnp.max(s, axis=-1, keepdims=True)
    p = jnp.exp(s)
    return p / jnp.sum(p, axis=-1, keepdims=True)


def _mha(x_q, x_kv, wqkv_ref, bqkv_ref, wo_ref, bo_ref, mask, n_heads):
    """Multi-head attention, fully in-register.

    x_q: [Sq, D], x_kv: [Sk, D]
    wqkv_ref: [3, H, D, Dh], bqkv_ref: [3, H, 1, Dh]
    wo_ref:   [H, Dh, D],    bo_ref:   [1, D]
    mask: bool, broadcastable to [Sq, Sk]
    """
    dh = wqkv_ref.shape[-1]
    scale = 1.0 / math.sqrt(dh)
    out = None
    for h in range(n_heads):          # static loop; heads stay in vregs
        q = jnp.dot(x_q, wqkv_ref[0, h], preferred_element_type=jnp.float32) + bqkv_ref[0, h]
        k = jnp.dot(x_kv, wqkv_ref[1, h], preferred_element_type=jnp.float32) + bqkv_ref[1, h]
        v = jnp.dot(x_kv, wqkv_ref[2, h], preferred_element_type=jnp.float32) + bqkv_ref[2, h]
        # q @ k^T without materializing a transpose: contract last dims.
        s = lax.dot_general(q, k, (((1,), (1,)), ((), ())),
                            preferred_element_type=jnp.float32) * scale
        p = _masked_softmax(s, mask)
        o = jnp.dot(p, v, preferred_element_type=jnp.float32)          # [Sq, Dh]
        # Fold the head-concat into the output projection: concat(o_h) @ Wo
        # == sum_h o_h @ Wo[h].
        contrib = jnp.dot(o, wo_ref[h], preferred_element_type=jnp.float32)  # [Sq, D]
        out = contrib if out is None else out + contrib
    return out + bo_ref[...]


def _layernorm(x, g, b):
    mean = jnp.mean(x, axis=-1, keepdims=True)
    var = jnp.mean(jnp.square(x - mean), axis=-1, keepdims=True)
    return (x - mean) * lax.rsqrt(var + 1e-5) * g + b


# ----------------------------- fused layer kernels -------------------------

def _encoder_layer_kernel(x_ref, valid_ref,
                          wqkv_ref, bqkv_ref, wo_ref, bo_ref,
                          w1_ref, b1_ref, w2_ref, b2_ref,
                          lng_ref, lnb_ref,
                          o_ref, *, n_heads):
    x = x_ref[0]                       # [S, D]
    # Key-padding mask (PyTorch: (input != 0)[:,None,None,:]) — broadcast over q.
    key_valid = valid_ref[0] > 0.0     # [1, S] bool

    attn = _mha(x, x, wqkv_ref, bqkv_ref, wo_ref, bo_ref, key_valid, n_heads)
    x1 = _layernorm(x + attn, lng_ref[0], lnb_ref[0])

    h = jnp.maximum(
        jnp.dot(x1, w1_ref[...], preferred_element_type=jnp.float32) + b1_ref[...], 0.0)
    f = jnp.dot(h, w2_ref[...], preferred_element_type=jnp.float32) + b2_ref[...]
    x2 = _layernorm(x1 + f, lng_ref[1], lnb_ref[1])

    o_ref[...] = x2[None]


def _decoder_layer_kernel(y_ref, mem_ref, tvalid_ref, svalid_ref,
                          s_wqkv_ref, s_bqkv_ref, s_wo_ref, s_bo_ref,
                          c_wqkv_ref, c_bqkv_ref, c_wo_ref, c_bo_ref,
                          w1_ref, b1_ref, w2_ref, b2_ref,
                          lng_ref, lnb_ref,
                          wgen_ref, bgen_ref,
                          o_ref, *, n_heads):
    y = y_ref[0]                       # [St, D]
    mem = mem_ref[0]                   # [Ss, D]
    st = y.shape[0]

    tgt_valid = tvalid_ref[0] > 0.0    # [1, St] bool (key-padding on target)
    src_valid = svalid_ref[0] > 0.0    # [1, Ss] bool (key-padding on source)

    # Causal tril mask regenerated in-kernel (no dense mask DMA).
    row = lax.broadcasted_iota(jnp.int32, (st, st), 0)
    col = lax.broadcasted_iota(jnp.int32, (st, st), 1)
    self_mask = jnp.logical_and(row >= col, tgt_valid)   # [St, St]

    a = _mha(y, y, s_wqkv_ref, s_bqkv_ref, s_wo_ref, s_bo_ref, self_mask, n_heads)
    y1 = _layernorm(y + a, lng_ref[0], lnb_ref[0])

    c = _mha(y1, mem, c_wqkv_ref, c_bqkv_ref, c_wo_ref, c_bo_ref, src_valid, n_heads)
    y2 = _layernorm(y1 + c, lng_ref[1], lnb_ref[1])

    h = jnp.maximum(
        jnp.dot(y2, w1_ref[...], preferred_element_type=jnp.float32) + b1_ref[...], 0.0)
    f = jnp.dot(h, w2_ref[...], preferred_element_type=jnp.float32) + b2_ref[...]
    y3 = _layernorm(y2 + f, lng_ref[2], lnb_ref[2])

    logits = jnp.dot(y3, wgen_ref[...], preferred_element_type=jnp.float32) + bgen_ref[...]
    o_ref[...] = logits[None]


# ----------------------------- pallas_call wrappers ------------------------

def _const_spec(arr):
    """Full-array block, same block for every grid step (DMAed once)."""
    nd = arr.ndim
    return pl.BlockSpec(arr.shape, lambda b, _nd=nd: (0,) * _nd)


def _batch_spec(arr):
    """Block over the leading batch axis; full extent elsewhere."""
    nd = arr.ndim
    return pl.BlockSpec((1,) + arr.shape[1:],
                        lambda b, _nd=nd: (b,) + (0,) * (_nd - 1))


_COMPILER_PARAMS = pltpu.CompilerParams(
    dimension_semantics=("parallel",),          # batch axis → megacore / 2 TCs
    vmem_limit_bytes=32 * 1024 * 1024,          # explicit, safe on v7x 64 MiB VMEM
)


def encoder_layer(x, valid, p, n_heads):
    b, s, d = x.shape
    weights = (p["wqkv"], p["bqkv"], p["wo"], p["bo"],
               p["w1"], p["b1"], p["w2"], p["b2"], p["ln_g"], p["ln_b"])
    in_specs = [_batch_spec(x), _batch_spec(valid)] + [_const_spec(w) for w in weights]
    return pl.pallas_call(
        functools.partial(_encoder_layer_kernel, n_heads=n_heads),
        out_shape=jax.ShapeDtypeStruct((b, s, d), jnp.float32),
        grid=(b,),
        in_specs=in_specs,
        out_specs=pl.BlockSpec((1, s, d), lambda i: (i, 0, 0)),
        compiler_params=_COMPILER_PARAMS,
    )(x, valid, *weights)


def decoder_layer(y, memory, tgt_valid, src_valid, p, n_heads, vocab):
    b, st, d = y.shape
    weights = (p["self"]["wqkv"], p["self"]["bqkv"], p["self"]["wo"], p["self"]["bo"],
               p["cross"]["wqkv"], p["cross"]["bqkv"], p["cross"]["wo"], p["cross"]["bo"],
               p["w1"], p["b1"], p["w2"], p["b2"], p["ln_g"], p["ln_b"],
               p["w_gen"], p["b_gen"])
    in_specs = ([_batch_spec(y), _batch_spec(memory),
                 _batch_spec(tgt_valid), _batch_spec(src_valid)]
                + [_const_spec(w) for w in weights])
    return pl.pallas_call(
        functools.partial(_decoder_layer_kernel, n_heads=n_heads),
        out_shape=jax.ShapeDtypeStruct((b, st, vocab), jnp.float32),
        grid=(b,),
        in_specs=in_specs,
        out_specs=pl.BlockSpec((1, st, vocab), lambda i: (i, 0, 0)),
        compiler_params=_COMPILER_PARAMS,
    )(y, memory, tgt_valid, src_valid, *weights)


# ----------------------------- JAX glue ------------------------------------

def positional_encoding(s, d):
    pos = jnp.arange(s, dtype=jnp.float32)[:, None]
    i = jnp.arange(0, d, 2, dtype=jnp.float32)
    div = jnp.exp(-math.log(10000.0) * i / d)
    pe = jnp.zeros((s, d), jnp.float32)
    pe = pe.at[:, 0::2].set(jnp.sin(pos * div))
    pe = pe.at[:, 1::2].set(jnp.cos(pos * div))
    return pe


def encoder_decoder_forward(params, src, tgt, n_heads):
    b, ss = src.shape
    _, st = tgt.shape
    d = params["src_emb"].shape[1]
    vocab = params["dec"]["w_gen"].shape[1]

    # PyTorch padding_mask / target_mask are rebuilt *inside* the kernels from
    # these tiny per-batch validity vectors (+ in-kernel causal iota).
    src_valid = (src != 0).astype(jnp.float32)[:, None, :]   # (B, 1, Ss)
    tgt_valid = (tgt != 0).astype(jnp.float32)[:, None, :]   # (B, 1, St)

    # ---- encoder ----
    x = jnp.take(params["src_emb"], src, axis=0) * math.sqrt(d)
    x = x + positional_encoding(ss, d)[None]
    memory = encoder_layer(x, src_valid, params["enc"], n_heads)

    # ---- decoder + generator ----
    y = jnp.take(params["tgt_emb"], tgt, axis=0) * math.sqrt(d)
    y = y + positional_encoding(st, d)[None]
    logits = decoder_layer(y, memory, tgt_valid, src_valid,
                           params["dec"], n_heads, vocab)
    return logits


# ----------------------------- parameter init ------------------------------

def _attn_params(key, d, n_heads):
    dh = d // n_heads
    k1, k2 = jax.random.split(key)
    return {
        "wqkv": 0.05 * jax.random.normal(k1, (3, n_heads, d, dh), jnp.float32),
        "bqkv": jnp.zeros((3, n_heads, 1, dh), jnp.float32),
        "wo":   0.05 * jax.random.normal(k2, (n_heads, dh, d), jnp.float32),
        "bo":   jnp.zeros((1, d), jnp.float32),
    }


def init_params(key, vocab, d, dff, n_heads):
    ks = jax.random.split(key, 10)
    lin = lambda k, a, b_: 0.05 * jax.random.normal(k, (a, b_), jnp.float32)
    enc = {
        **_attn_params(ks[2], d, n_heads),
        "w1": lin(ks[3], d, dff), "b1": jnp.zeros((1, dff), jnp.float32),
        "w2": lin(ks[4], dff, d), "b2": jnp.zeros((1, d), jnp.float32),
        "ln_g": jnp.ones((2, 1, d), jnp.float32),
        "ln_b": jnp.zeros((2, 1, d), jnp.float32),
    }
    dec = {
        "self": _attn_params(ks[5], d, n_heads),
        "cross": _attn_params(ks[6], d, n_heads),
        "w1": lin(ks[7], d, dff), "b1": jnp.zeros((1, dff), jnp.float32),
        "w2": lin(ks[8], dff, d), "b2": jnp.zeros((1, d), jnp.float32),
        "ln_g": jnp.ones((3, 1, d), jnp.float32),
        "ln_b": jnp.zeros((3, 1, d), jnp.float32),
        "w_gen": lin(ks[9], d, vocab), "b_gen": jnp.zeros((1, vocab), jnp.float32),
    }
    return {
        "src_emb": 0.05 * jax.random.normal(ks[0], (vocab, d), jnp.float32),
        "tgt_emb": 0.05 * jax.random.normal(ks[1], (vocab, d), jnp.float32),
        "enc": enc,
        "dec": dec,
    }


# ----------------------------- main ----------------------------------------

if __name__ == "__main__":
    key = jax.random.PRNGKey(0)
    B, S_SRC, S_TGT = 2, 8, 8
    VOCAB, D_MODEL, D_FF, N_HEADS = 16, 32, 64, 4

    pkey, skey, tkey = jax.random.split(key, 3)
    params = init_params(pkey, VOCAB, D_MODEL, D_FF, N_HEADS)

    src = jax.random.randint(skey, (B, S_SRC), 1, VOCAB, dtype=jnp.int32)
    tgt = jax.random.randint(tkey, (B, S_TGT), 1, VOCAB, dtype=jnp.int32)
    # introduce pad tokens (id 0) so padding / target masks are exercised
    src = src.at[0, 6:].set(0)
    tgt = tgt.at[1, 5:].set(0)

    fwd = jax.jit(functools.partial(encoder_decoder_forward, n_heads=N_HEADS))
    out = fwd(params, src, tgt)
    out = jax.block_until_ready(out)
    assert out.shape == (B, S_TGT, VOCAB)
    assert bool(jnp.all(jnp.isfinite(out)))
    print("KERNEL_OK")
</pallas_src>

<mosaic_0001>
module attributes {stable_mosaic.version = 11 : i64} {
  func.func @_encoder_layer_kernel(%arg0: i32, %arg1: memref<1x8x32xf32, #tpu.memory_space<vmem>>, %arg2: memref<1x1x8xf32, #tpu.memory_space<vmem>>, %arg3: memref<3x4x32x8xf32, #tpu.memory_space<vmem>>, %arg4: memref<3x4x1x8xf32, #tpu.memory_space<vmem>>, %arg5: memref<4x8x32xf32, #tpu.memory_space<vmem>>, %arg6: memref<1x32xf32, #tpu.memory_space<vmem>>, %arg7: memref<32x64xf32, #tpu.memory_space<vmem>>, %arg8: memref<1x64xf32, #tpu.memory_space<vmem>>, %arg9: memref<64x32xf32, #tpu.memory_space<vmem>>, %arg10: memref<1x32xf32, #tpu.memory_space<vmem>>, %arg11: memref<2x1x32xf32, #tpu.memory_space<vmem>>, %arg12: memref<2x1x32xf32, #tpu.memory_space<vmem>>, %arg13: memref<1x8x32xf32, #tpu.memory_space<vmem>>) attributes {dimension_semantics = [#tpu.dimension_semantics<parallel>], iteration_bounds = array<i64: 2>, scalar_prefetch = 0 : i64, scratch_operands = 0 : i64, tpu.core_type = #tpu.core_type<tc>, window_params = [{transform_indices = @transform_0, window_bounds = array<i64: 1, 8, 32>}, {transform_indices = @transform_1, window_bounds = array<i64: 1, 1, 8>}, {pipeline_mode = #tpu.pipeline_mode<synchronous>, transform_indices = @transform_2, window_bounds = array<i64: 3, 4, 32, 8>}, {pipeline_mode = #tpu.pipeline_mode<synchronous>, transform_indices = @transform_3, window_bounds = array<i64: 3, 4, 1, 8>}, {pipeline_mode = #tpu.pipeline_mode<synchronous>, transform_indices = @transform_4, window_bounds = array<i64: 4, 8, 32>}, {pipeline_mode = #tpu.pipeline_mode<synchronous>, transform_indices = @transform_5, window_bounds = array<i64: 1, 32>}, {pipeline_mode = #tpu.pipeline_mode<synchronous>, transform_indices = @transform_6, window_bounds = array<i64: 32, 64>}, {pipeline_mode = #tpu.pipeline_mode<synchronous>, transform_indices = @transform_7, window_bounds = array<i64: 1, 64>}, {pipeline_mode = #tpu.pipeline_mode<synchronous>, transform_indices = @transform_8, window_bounds = array<i64: 64, 32>}, {pipeline_mode = #tpu.pipeline_mode<synchronous>, transform_indices = @transform_9, window_bounds = array<i64: 1, 32>}, {pipeline_mode = #tpu.pipeline_mode<synchronous>, transform_indices = @transform_10, window_bounds = array<i64: 2, 1, 32>}, {pipeline_mode = #tpu.pipeline_mode<synchronous>, transform_indices = @transform_11, window_bounds = array<i64: 2, 1, 32>}, {transform_indices = @transform_12, window_bounds = array<i64: 1, 8, 32>}]} {
    %c0 = arith.constant 0 : index
    %c0_0 = arith.constant 0 : index
    %c0_1 = arith.constant 0 : index
    %0 = vector.load %arg1[%c0, %c0_0, %c0_1] : memref<1x8x32xf32, #tpu.memory_space<vmem>>, vector<1x8x32xf32>
    %1 = vector.shape_cast %0 : vector<1x8x32xf32> to vector<8x32xf32>
    %c0_2 = arith.constant 0 : index
    %c0_3 = arith.constant 0 : index
    %c0_4 = arith.constant 0 : index
    %2 = vector.load %arg2[%c0_2, %c0_3, %c0_4] : memref<1x1x8xf32, #tpu.memory_space<vmem>>, vector<1x1x8xf32>
    %3 = vector.shape_cast %2 : vector<1x1x8xf32> to vector<1x8xf32>
    %cst = arith.constant 0.000000e+00 : f32
    %4 = vector.broadcast %cst : f32 to vector<1x8xf32>
    %5 = arith.cmpf ogt, %3, %4 : vector<1x8xf32>
    %c0_5 = arith.constant 0 : index
    %c0_6 = arith.constant 0 : index
    %c0_7 = arith.constant 0 : index
    %c0_8 = arith.constant 0 : index
    %6 = vector.load %arg3[%c0_5, %c0_6, %c0_7, %c0_8] : memref<3x4x32x8xf32, #tpu.memory_space<vmem>>, vector<1x1x32x8xf32>
    %7 = vector.shape_cast %6 : vector<1x1x32x8xf32> to vector<32x8xf32>
    %cst_9 = arith.constant dense<0.000000e+00> : vector<8x8xf32>
    %8 = tpu.matmul %1, %7, %cst_9 {dimension_numbers = #tpu.dot_dimension_numbers<[1], [0], [0], [1], [0, 0, 1, 1], [], []>} : vector<8x32xf32>, vector<32x8xf32>, vector<8x8xf32> -> vector<8x8xf32>
    %c0_10 = arith.constant 0 : index
    %c0_11 = arith.constant 0 : index
    %c0_12 = arith.constant 0 : index
    %c0_13 = arith.constant 0 : index
    %9 = vector.load %arg4[%c0_10, %c0_11, %c0_12, %c0_13] : memref<3x4x1x8xf32, #tpu.memory_space<vmem>>, vector<1x1x1x8xf32>
    %10 = vector.shape_cast %9 : vector<1x1x1x8xf32> to vector<1x8xf32>
    %11 = vector.broadcast %10 : vector<1x8xf32> to vector<8x8xf32>
    %12 = arith.addf %8, %11 : vector<8x8xf32>
    %c1 = arith.constant 1 : index
    %c0_14 = arith.constant 0 : index
    %c0_15 = arith.constant 0 : index
    %c0_16 = arith.constant 0 : index
    %13 = vector.load %arg3[%c1, %c0_14, %c0_15, %c0_16] : memref<3x4x32x8xf32, #tpu.memory_space<vmem>>, vector<1x1x32x8xf32>
    %14 = vector.shape_cast %13 : vector<1x1x32x8xf32> to vector<32x8xf32>
    %cst_17 = arith.constant dense<0.000000e+00> : vector<8x8xf32>
    %15 = tpu.matmul %1, %14, %cst_17 {dimension_numbers = #tpu.dot_dimension_numbers<[1], [0], [0], [1], [0, 0, 1, 1], [], []>} : vector<8x32xf32>, vector<32x8xf32>, vector<8x8xf32> -> vector<8x8xf32>
    %c1_18 = arith.constant 1 : index
    %c0_19 = arith.constant 0 : index
    %c0_20 = arith.constant 0 : index
    %c0_21 = arith.constant 0 : index
    %16 = vector.load %arg4[%c1_18, %c0_19, %c0_20, %c0_21] : memref<3x4x1x8xf32, #tpu.memory_space<vmem>>, vector<1x1x1x8xf32>
    %17 = vector.shape_cast %16 : vector<1x1x1x8xf32> to vector<1x8xf32>
    %18 = vector.broadcast %17 : vector<1x8xf32> to vector<8x8xf32>
    %19 = arith.addf %15, %18 : vector<8x8xf32>
    %c2 = arith.constant 2 : index
    %c0_22 = arith.constant 0 : index
    %c0_23 = arith.constant 0 : index
    %c0_24 = arith.constant 0 : index
    %20 = vector.load %arg3[%c2, %c0_22, %c0_23, %c0_24] : memref<3x4x32x8xf32, #tpu.memory_space<vmem>>, vector<1x1x32x8xf32>
    %21 = vector.shape_cast %20 : vector<1x1x32x8xf32> to vector<32x8xf32>
    %cst_25 = arith.constant dense<0.000000e+00> : vector<8x8xf32>
    %22 = tpu.matmul %1, %21, %cst_25 {dimension_numbers = #tpu.dot_dimension_numbers<[1], [0], [0], [1], [0, 0, 1, 1], [], []>} : vector<8x32xf32>, vector<32x8xf32>, vector<8x8xf32> -> vector<8x8xf32>
    %c2_26 = arith.constant 2 : index
    %c0_27 = arith.constant 0 : index
    %c0_28 = arith.constant 0 : index
    %c0_29 = arith.constant 0 : index
    %23 = vector.load %arg4[%c2_26, %c0_27, %c0_28, %c0_29] : memref<3x4x1x8xf32, #tpu.memory_space<vmem>>, vector<1x1x1x8xf32>
    %24 = vector.shape_cast %23 : vector<1x1x1x8xf32> to vector<1x8xf32>
    %25 = vector.broadcast %24 : vector<1x8xf32> to vector<8x8xf32>
    %26 = arith.addf %22, %25 : vector<8x8xf32>
    %cst_30 = arith.constant dense<0.000000e+00> : vector<8x8xf32>
    %27 = tpu.matmul %12, %19, %cst_30 {dimension_numbers = #tpu.dot_dimension_numbers<[1], [1], [0], [0], [0, 0, 1, 0], [], []>} : vector<8x8xf32>, vector<8x8xf32>, vector<8x8xf32> -> vector<8x8xf32>
    %cst_31 = arith.constant 0.353553385 : f32
    %28 = vector.broadcast %cst_31 : f32 to vector<8x8xf32>
    %29 = arith.mulf %27, %28 : vector<8x8xf32>
    %cst_32 = arith.constant -1.000000e+09 : f32
    %30 = vector.shape_cast %5 : vector<1x8xi1> to vector<1x8xi1>
    %31 = vector.broadcast %30 : vector<1x8xi1> to vector<8x8xi1>
    %32 = vector.broadcast %cst_32 : f32 to vector<8x8xf32>
    %33 = arith.select %31, %29, %32 : vector<8x8xi1>, vector<8x8xf32>
    %cst_33 = arith.constant dense<0xFF800000> : vector<8xf32>
    %34 = vector.multi_reduction <maximumf>, %33, %cst_33 [1] : vector<8x8xf32> to vector<8xf32>
    %35 = vector.shape_cast %34 : vector<8xf32> to vector<8x1xf32>
    %36 = vector.broadcast %35 : vector<8x1xf32> to vector<8x8xf32>
    %37 = arith.subf %33, %36 : vector<8x8xf32>
    %38 = math.exp %37 : vector<8x8xf32>
    %cst_34 = arith.constant dense<0.000000e+00> : vector<8xf32>
    %39 = vector.multi_reduction <add>, %38, %cst_34 [1] : vector<8x8xf32> to vector<8xf32>
    %40 = vector.shape_cast %39 : vector<8xf32> to vector<8x1xf32>
    %41 = vector.broadcast %40 : vector<8x1xf32> to vector<8x8xf32>
    %42 = arith.divf %38, %41 : vector<8x8xf32>
    %cst_35 = arith.constant dense<0.000000e+00> : vector<8x8xf32>
    %43 = tpu.matmul %42, %26, %cst_35 {dimension_numbers = #tpu.dot_dimension_numbers<[1], [0], [0], [1], [0, 0, 1, 1], [], []>} : vector<8x8xf32>, vector<8x8xf32>, vector<8x8xf32> -> vector<8x8xf32>
    %c0_36 = arith.constant 0 : index
    %c0_37 = arith.constant 0 : index
    %c0_38 = arith.constant 0 : index
    %44 = vector.load %arg5[%c0_36, %c0_37, %c0_38] : memref<4x8x32xf32, #tpu.memory_space<vmem>>, vector<1x8x32xf32>
    %45 = vector.shape_cast %44 : vector<1x8x32xf32> to vector<8x32xf32>
    %cst_39 = arith.constant dense<0.000000e+00> : vector<8x32xf32>
    %46 = tpu.matmul %43, %45, %cst_39 {dimension_numbers = #tpu.dot_dimension_numbers<[1], [0], [0], [1], [0, 0, 1, 1], [], []>} : vector<8x8xf32>, vector<8x32xf32>, vector<8x32xf32> -> vector<8x32xf32>
    %c0_40 = arith.constant 0 : index
    %c1_41 = arith.constant 1 : index
    %c0_42 = arith.constant 0 : index
    %c0_43 = arith.constant 0 : index
    %47 = vector.load %arg3[%c0_40, %c1_41, %c0_42, %c0_43] : memref<3x4x32x8xf32, #tpu.memory_space<vmem>>, vector<1x1x32x8xf32>
    %48 = vector.shape_cast %47 : vector<1x1x32x8xf32> to vector<32x8xf32>
    %cst_44 = arith.constant dense<0.000000e+00> : vector<8x8xf32>
    %49 = tpu.matmul %1, %48, %cst_44 {dimension_numbers = #tpu.dot_dimension_numbers<[1], [0], [0], [1], [0, 0, 1, 1], [], []>} : vector<8x32xf32>, vector<32x8xf32>, vector<8x8xf32> -> vector<8x8xf32>
    %c0_45 = arith.constant 0 : index
    %c1_46 = arith.constant 1 : index
    %c0_47 = arith.constant 0 : index
    %c0_48 = arith.constant 0 : index
    %50 = vector.load %arg4[%c0_45, %c1_46, %c0_47, %c0_48] : memref<3x4x1x8xf32, #tpu.memory_space<vmem>>, vector<1x1x1x8xf32>
    %51 = vector.shape_cast %50 : vector<1x1x1x8xf32> to vector<1x8xf32>
    %52 = vector.broadcast %51 : vector<1x8xf32> to vector<8x8xf32>
    %53 = arith.addf %49, %52 : vector<8x8xf32>
    %c1_49 = arith.constant 1 : index
    %c1_50 = arith.constant 1 : index
    %c0_51 = arith.constant 0 : index
    %c0_52 = arith.constant 0 : index
    %54 = vector.load %arg3[%c1_49, %c1_50, %c0_51, %c0_52] : memref<3x4x32x8xf32, #tpu.memory_space<vmem>>, vector<1x1x32x8xf32>
    %55 = vector.shape_cast %54 : vector<1x1x32x8xf32> to vector<32x8xf32>
    %cst_53 = arith.constant dense<0.000000e+00> : vector<8x8xf32>
    %56 = tpu.matmul %1, %55, %cst_53 {dimension_numbers = #tpu.dot_dimension_numbers<[1], [0], [0], [1], [0, 0, 1, 1], [], []>} : vector<8x32xf32>, vector<32x8xf32>, vector<8x8xf32> -> vector<8x8xf32>
    %c1_54 = arith.constant 1 : index
    %c1_55 = arith.constant 1 : index
    %c0_56 = arith.constant 0 : index
    %c0_57 = arith.constant 0 : index
    %57 = vector.load %arg4[%c1_54, %c1_55, %c0_56, %c0_57] : memref<3x4x1x8xf32, #tpu.memory_space<vmem>>, vector<1x1x1x8xf32>
    %58 = vector.shape_cast %57 : vector<1x1x1x8xf32> to vector<1x8xf32>
    %59 = vector.broadcast %58 : vector<1x8xf32> to vector<8x8xf32>
    %60 = arith.addf %56, %59 : vector<8x8xf32>
    %c2_58 = arith.constant 2 : index
    %c1_59 = arith.constant 1 : index
    %c0_60 = arith.constant 0 : index
    %c0_61 = arith.constant 0 : index
    %61 = vector.load %arg3[%c2_58, %c1_59, %c0_60, %c0_61] : memref<3x4x32x8xf32, #tpu.memory_space<vmem>>, vector<1x1x32x8xf32>
    %62 = vector.shape_cast %61 : vector<1x1x32x8xf32> to vector<32x8xf32>
    %cst_62 = arith.constant dense<0.000000e+00> : vector<8x8xf32>
    %63 = tpu.matmul %1, %62, %cst_62 {dimension_numbers = #tpu.dot_dimension_numbers<[1], [0], [0], [1], [0, 0, 1, 1], [], []>} : vector<8x32xf32>, vector<32x8xf32>, vector<8x8xf32> -> vector<8x8xf32>
    %c2_63 = arith.constant 2 : index
    %c1_64 = arith.constant 1 : index
    %c0_65 = arith.constant 0 : index
    %c0_66 = arith.constant 0 : index
    %64 = vector.load %arg4[%c2_63, %c1_64, %c0_65, %c0_66] : memref<3x4x1x8xf32, #tpu.memory_space<vmem>>, vector<1x1x1x8xf32>
    %65 = vector.shape_cast %64 : vector<1x1x1x8xf32> to vector<1x8xf32>
    %66 = vector.broadcast %65 : vector<1x8xf32> to vector<8x8xf32>
    %67 = arith.addf %63, %66 : vector<8x8xf32>
    %cst_67 = arith.constant dense<0.000000e+00> : vector<8x8xf32>
    %68 = tpu.matmul %53, %60, %cst_67 {dimension_numbers = #tpu.dot_dimension_numbers<[1], [1], [0], [0], [0, 0, 1, 0], [], []>} : vector<8x8xf32>, vector<8x8xf32>, vector<8x8xf32> -> vector<8x8xf32>
    %cst_68 = arith.constant 0.353553385 : f32
    %69 = vector.broadcast %cst_68 : f32 to vector<8x8xf32>
    %70 = arith.mulf %68, %69 : vector<8x8xf32>
    %cst_69 = arith.constant -1.000000e+09 : f32
    %71 = vector.shape_cast %5 : vector<1x8xi1> to vector<1x8xi1>
    %72 = vector.broadcast %71 : vector<1x8xi1> to vector<8x8xi1>
    %73 = vector.broadcast %cst_69 : f32 to vector<8x8xf32>
    %74 = arith.select %72, %70, %73 : vector<8x8xi1>, vector<8x8xf32>
    %cst_70 = arith.constant dense<0xFF800000> : vector<8xf32>
    %75 = vector.multi_reduction <maximumf>, %74, %cst_70 [1] : vector<8x8xf32> to vector<8xf32>
    %76 = vector.shape_cast %75 : vector<8xf32> to vector<8x1xf32>
    %77 = vector.broadcast %76 : vector<8x1xf32> to vector<8x8xf32>
    %78 = arith.subf %74, %77 : vector<8x8xf32>
    %79 = math.exp %78 : vector<8x8xf32>
    %cst_71 = arith.constant dense<0.000000e+00> : vector<8xf32>
    %80 = vector.multi_reduction <add>, %79, %cst_71 [1] : vector<8x8xf32> to vector<8xf32>
    %81 = vector.shape_cast %80 : vector<8xf32> to vector<8x1xf32>
    %82 = vector.broadcast %81 : vector<8x1xf32> to vector<8x8xf32>
    %83 = arith.divf %79, %82 : vector<8x8xf32>
    %cst_72 = arith.constant dense<0.000000e+00> : vector<8x8xf32>
    %84 = tpu.matmul %83, %67, %cst_72 {dimension_numbers = #tpu.dot_dimension_numbers<[1], [0], [0], [1], [0, 0, 1, 1], [], []>} : vector<8x8xf32>, vector<8x8xf32>, vector<8x8xf32> -> vector<8x8xf32>
    %c1_73 = arith.constant 1 : index
    %c0_74 = arith.constant 0 : index
    %c0_75 = arith.constant 0 : index
    %85 = vector.load %arg5[%c1_73, %c0_74, %c0_75] : memref<4x8x32xf32, #tpu.memory_space<vmem>>, vector<1x8x32xf32>
    %86 = vector.shape_cast %85 : vector<1x8x32xf32> to vector<8x32xf32>
    %cst_76 = arith.constant dense<0.000000e+00> : vector<8x32xf32>
    %87 = tpu.matmul %84, %86, %cst_76 {dimension_numbers = #tpu.dot_dimension_numbers<[1], [0], [0], [1], [0, 0, 1, 1], [], []>} : vector<8x8xf32>, vector<8x32xf32>, vector<8x32xf32> -> vector<8x32xf32>
    %88 = arith.addf %46, %87 : vector<8x32xf32>
    %c0_77 = arith.constant 0 : index
    %c2_78 = arith.constant 2 : index
    %c0_79 = arith.constant 0 : index
    %c0_80 = arith.constant 0 : index
    %89 = vector.load %arg3[%c0_77, %c2_78, %c0_79, %c0_80] : memref<3x4x32x8xf32, #tpu.memory_space<vmem>>, vector<1x1x32x8xf32>
    %90 = vector.shape_cast %89 : vector<1x1x32x8xf32> to vector<32x8xf32>
    %cst_81 = arith.constant dense<0.000000e+00> : vector<8x8xf32>
    %91 = tpu.matmul %1, %90, %cst_81 {dimension_numbers = #tpu.dot_dimension_numbers<[1], [0], [0], [1], [0, 0, 1, 1], [], []>} : vector<8x32xf32>, vector<32x8xf32>, vector<8x8xf32> -> vector<8x8xf32>
    %c0_82 = arith.constant 0 : index
    %c2_83 = arith.constant 2 : index
    %c0_84 = arith.constant 0 : index
    %c0_85 = arith.constant 0 : index
    %92 = vector.load %arg4[%c0_82, %c2_83, %c0_84, %c0_85] : memref<3x4x1x8xf32, #tpu.memory_space<vmem>>, vector<1x1x1x8xf32>
    %93 = vector.shape_cast %92 : vector<1x1x1x8xf32> to vector<1x8xf32>
    %94 = vector.broadcast %93 : vector<1x8xf32> to vector<8x8xf32>
    %95 = arith.addf %91, %94 : vector<8x8xf32>
    %c1_86 = arith.constant 1 : index
    %c2_87 = arith.constant 2 : index
    %c0_88 = arith.constant 0 : index
    %c0_89 = arith.constant 0 : index
    %96 = vector.load %arg3[%c1_86, %c2_87, %c0_88, %c0_89] : memref<3x4x32x8xf32, #tpu.memory_space<vmem>>, vector<1x1x32x8xf32>
    %97 = vector.shape_cast %96 : vector<1x1x32x8xf32> to vector<32x8xf32>
    %cst_90 = arith.constant dense<0.000000e+00> : vector<8x8xf32>
    %98 = tpu.matmul %1, %97, %cst_90 {dimension_numbers = #tpu.dot_dimension_numbers<[1], [0], [0], [1], [0, 0, 1, 1], [], []>} : vector<8x32xf32>, vector<32x8xf32>, vector<8x8xf32> -> vector<8x8xf32>
    %c1_91 = arith.constant 1 : index
    %c2_92 = arith.constant 2 : index
    %c0_93 = arith.constant 0 : index
    %c0_94 = arith.constant 0 : index
    %99 = vector.load %arg4[%c1_91, %c2_92, %c0_93, %c0_94] : memref<3x4x1x8xf32, #tpu.memory_space<vmem>>, vector<1x1x1x8xf32>
    %100 = vector.shape_cast %99 : vector<1x1x1x8xf32> to vector<1x8xf32>
    %101 = vector.broadcast %100 : vector<1x8xf32> to vector<8x8xf32>
    %102 = arith.addf %98, %101 : vector<8x8xf32>
    %c2_95 = arith.constant 2 : index
    %c2_96 = arith.constant 2 : index
    %c0_97 = arith.constant 0 : index
    %c0_98 = arith.constant 0 : index
    %103 = vector.load %arg3[%c2_95, %c2_96, %c0_97, %c0_98] : memref<3x4x32x8xf32, #tpu.memory_space<vmem>>, vector<1x1x32x8xf32>
    %104 = vector.shape_cast %103 : vector<1x1x32x8xf32> to vector<32x8xf32>
    %cst_99 = arith.constant dense<0.000000e+00> : vector<8x8xf32>
    %105 = tpu.matmul %1, %104, %cst_99 {dimension_numbers = #tpu.dot_dimension_numbers<[1], [0], [0], [1], [0, 0, 1, 1], [], []>} : vector<8x32xf32>, vector<32x8xf32>, vector<8x8xf32> -> vector<8x8xf32>
    %c2_100 = arith.constant 2 : index
    %c2_101 = arith.constant 2 : index
    %c0_102 = arith.constant 0 : index
    %c0_103 = arith.constant 0 : index
    %106 = vector.load %arg4[%c2_100, %c2_101, %c0_102, %c0_103] : memref<3x4x1x8xf32, #tpu.memory_space<vmem>>, vector<1x1x1x8xf32>
    %107 = vector.shape_cast %106 : vector<1x1x1x8xf32> to vector<1x8xf32>
    %108 = vector.broadcast %107 : vector<1x8xf32> to vector<8x8xf32>
    %109 = arith.addf %105, %108 : vector<8x8xf32>
    %cst_104 = arith.constant dense<0.000000e+00> : vector<8x8xf32>
    %110 = tpu.matmul %95, %102, %cst_104 {dimension_numbers = #tpu.dot_dimension_numbers<[1], [1], [0], [0], [0, 0, 1, 0], [], []>} : vector<8x8xf32>, vector<8x8xf32>, vector<8x8xf32> -> vector<8x8xf32>
    %cst_105 = arith.constant 0.353553385 : f32
    %111 = vector.broadcast %cst_105 : f32 to vector<8x8xf32>
    %112 = arith.mulf %110, %111 : vector<8x8xf32>
    %cst_106 = arith.constant -1.000000e+09 : f32
    %113 = vector.shape_cast %5 : vector<1x8xi1> to vector<1x8xi1>
    %114 = vector.broadcast %113 : vector<1x8xi1> to vector<8x8xi1>
    %115 = vector.broadcast %cst_106 : f32 to vector<8x8xf32>
    %116 = arith.select %114, %112, %115 : vector<8x8xi1>, vector<8x8xf32>
    %cst_107 = arith.constant dense<0xFF800000> : vector<8xf32>
    %117 = vector.multi_reduction <maximumf>, %116, %cst_107 [1] : vector<8x8xf32> to vector<8xf32>
    %118 = vector.shape_cast %117 : vector<8xf32> to vector<8x1xf32>
    %119 = vector.broadcast %118 : vector<8x1xf32> to vector<8x8xf32>
    %120 = arith.subf %116, %119 : vector<8x8xf32>
    %121 = math.exp %120 : vector<8x8xf32>
    %cst_108 = arith.constant dense<0.000000e+00> : vector<8xf32>
    %122 = vector.multi_reduction <add>, %121, %cst_108 [1] : vector<8x8xf32> to vector<8xf32>
    %123 = vector.shape_cast %122 : vector<8xf32> to vector<8x1xf32>
    %124 = vector.broadcast %123 : vector<8x1xf32> to vector<8x8xf32>
    %125 = arith.divf %121, %124 : vector<8x8xf32>
    %cst_109 = arith.constant dense<0.000000e+00> : vector<8x8xf32>
    %126 = tpu.matmul %125, %109, %cst_109 {dimension_numbers = #tpu.dot_dimension_numbers<[1], [0], [0], [1], [0, 0, 1, 1], [], []>} : vector<8x8xf32>, vector<8x8xf32>, vector<8x8xf32> -> vector<8x8xf32>
    %c2_110 = arith.constant 2 : index
    %c0_111 = arith.constant 0 : index
    %c0_112 = arith.constant 0 : index
    %127 = vector.load %arg5[%c2_110, %c0_111, %c0_112] : memref<4x8x32xf32, #tpu.memory_space<vmem>>, vector<1x8x32xf32>
    %128 = vector.shape_cast %127 : vector<1x8x32xf32> to vector<8x32xf32>
    %cst_113 = arith.constant dense<0.000000e+00> : vector<8x32xf32>
    %129 = tpu.matmul %126, %128, %cst_113 {dimension_numbers = #tpu.dot_dimension_numbers<[1], [0], [0], [1], [0, 0, 1, 1], [], []>} : vector<8x8xf32>, vector<8x32xf32>, vector<8x32xf32> -> vector<8x32xf32>
    %130 = arith.addf %88, %129 : vector<8x32xf32>
    %c0_114 = arith.constant 0 : index
    %c3 = arith.constant 3 : index
    %c0_115 = arith.constant 0 : index
    %c0_116 = arith.constant 0 : index
    %131 = vector.load %arg3[%c0_114, %c3, %c0_115, %c0_116] : memref<3x4x32x8xf32, #tpu.memory_space<vmem>>, vector<1x1x32x8xf32>
    %132 = vector.shape_cast %131 : vector<1x1x32x8xf32> to vector<32x8xf32>
    %cst_117 = arith.constant dense<0.000000e+00> : vector<8x8xf32>
    %133 = tpu.matmul %1, %132, %cst_117 {dimension_numbers = #tpu.dot_dimension_numbers<[1], [0], [0], [1], [0, 0, 1, 1], [], []>} : vector<8x32xf32>, vector<32x8xf32>, vector<8x8xf32> -> vector<8x8xf32>
    %c0_118 = arith.constant 0 : index
    %c3_119 = arith.constant 3 : index
    %c0_120 = arith.constant 0 : index
    %c0_121 = arith.constant 0 : index
    %134 = vector.load %arg4[%c0_118, %c3_119, %c0_120, %c0_121] : memref<3x4x1x8xf32, #tpu.memory_space<vmem>>, vector<1x1x1x8xf32>
    %135 = vector.shape_cast %134 : vector<1x1x1x8xf32> to vector<1x8xf32>
    %136 = vector.broadcast %135 : vector<1x8xf32> to vector<8x8xf32>
    %137 = arith.addf %133, %136 : vector<8x8xf32>
    %c1_122 = arith.constant 1 : index
    %c3_123 = arith.constant 3 : index
    %c0_124 = arith.constant 0 : index
    %c0_125 = arith.constant 0 : index
    %138 = vector.load %arg3[%c1_122, %c3_123, %c0_124, %c0_125] : memref<3x4x32x8xf32, #tpu.memory_space<vmem>>, vector<1x1x32x8xf32>
    %139 = vector.shape_cast %138 : vector<1x1x32x8xf32> to vector<32x8xf32>
    %cst_126 = arith.constant dense<0.000000e+00> : vector<8x8xf32>
    %140 = tpu.matmul %1, %139, %cst_126 {dimension_numbers = #tpu.dot_dimension_numbers<[1], [0], [0], [1], [0, 0, 1, 1], [], []>} : vector<8x32xf32>, vector<32x8xf32>, vector<8x8xf32> -> vector<8x8xf32>
    %c1_127 = arith.constant 1 : index
    %c3_128 = arith.constant 3 : index
    %c0_129 = arith.constant 0 : index
    %c0_130 = arith.constant 0 : index
    %141 = vector.load %arg4[%c1_127, %c3_128, %c0_129, %c0_130] : memref<3x4x1x8xf32, #tpu.memory_space<vmem>>, vector<1x1x1x8xf32>
    %142 = vector.shape_cast %141 : vector<1x1x1x8xf32> to vector<1x8xf32>
    %143 = vector.broadcast %142 : vector<1x8xf32> to vector<8x8xf32>
    %144 = arith.addf %140, %143 : vector<8x8xf32>
    %c2_131 = arith.constant 2 : index
    %c3_132 = arith.constant 3 : index
    %c0_133 = arith.constant 0 : index
    %c0_134 = arith.constant 0 : index
    %145 = vector.load %arg3[%c2_131, %c3_132, %c0_133, %c0_134] : memref<3x4x32x8xf32, #tpu.memory_space<vmem>>, vector<1x1x32x8xf32>
    %146 = vector.shape_cast %145 : vector<1x1x32x8xf32> to vector<32x8xf32>
    %cst_135 = arith.constant dense<0.000000e+00> : vector<8x8xf32>
    %147 = tpu.matmul %1, %146, %cst_135 {dimension_numbers = #tpu.dot_dimension_numbers<[1], [0], [0], [1], [0, 0, 1, 1], [], []>} : vector<8x32xf32>, vector<32x8xf32>, vector<8x8xf32> -> vector<8x8xf32>
    %c2_136 = arith.constant 2 : index
    %c3_137 = arith.constant 3 : index
    %c0_138 = arith.constant 0 : index
    %c0_139 = arith.constant 0 : index
    %148 = vector.load %arg4[%c2_136, %c3_137, %c0_138, %c0_139] : memref<3x4x1x8xf32, #tpu.memory_space<vmem>>, vector<1x1x1x8xf32>
    %149 = vector.shape_cast %148 : vector<1x1x1x8xf32> to vector<1x8xf32>
    %150 = vector.broadcast %149 : vector<1x8xf32> to vector<8x8xf32>
    %151 = arith.addf %147, %150 : vector<8x8xf32>
    %cst_140 = arith.constant dense<0.000000e+00> : vector<8x8xf32>
    %152 = tpu.matmul %137, %144, %cst_140 {dimension_numbers = #tpu.dot_dimension_numbers<[1], [1], [0], [0], [0, 0, 1, 0], [], []>} : vector<8x8xf32>, vector<8x8xf32>, vector<8x8xf32> -> vector<8x8xf32>
    %cst_141 = arith.constant 0.353553385 : f32
    %153 = vector.broadcast %cst_141 : f32 to vector<8x8xf32>
    %154 = arith.mulf %152, %153 : vector<8x8xf32>
    %cst_142 = arith.constant -1.000000e+09 : f32
    %155 = vector.shape_cast %5 : vector<1x8xi1> to vector<1x8xi1>
    %156 = vector.broadcast %155 : vector<1x8xi1> to vector<8x8xi1>
    %157 = vector.broadcast %cst_142 : f32 to vector<8x8xf32>
    %158 = arith.select %156, %154, %157 : vector<8x8xi1>, vector<8x8xf32>
    %cst_143 = arith.constant dense<0xFF800000> : vector<8xf32>
    %159 = vector.multi_reduction <maximumf>, %158, %cst_143 [1] : vector<8x8xf32> to vector<8xf32>
    %160 = vector.shape_cast %159 : vector<8xf32> to vector<8x1xf32>
    %161 = vector.broadcast %160 : vector<8x1xf32> to vector<8x8xf32>
    %162 = arith.subf %158, %161 : vector<8x8xf32>
    %163 = math.exp %162 : vector<8x8xf32>
    %cst_144 = arith.constant dense<0.000000e+00> : vector<8xf32>
    %164 = vector.multi_reduction <add>, %163, %cst_144 [1] : vector<8x8xf32> to vector<8xf32>
    %165 = vector.shape_cast %164 : vector<8xf32> to vector<8x1xf32>
    %166 = vector.broadcast %165 : vector<8x1xf32> to vector<8x8xf32>
    %167 = arith.divf %163, %166 : vector<8x8xf32>
    %cst_145 = arith.constant dense<0.000000e+00> : vector<8x8xf32>
    %168 = tpu.matmul %167, %151, %cst_145 {dimension_numbers = #tpu.dot_dimension_numbers<[1], [0], [0], [1], [0, 0, 1, 1], [], []>} : vector<8x8xf32>, vector<8x8xf32>, vector<8x8xf32> -> vector<8x8xf32>
    %c3_146 = arith.constant 3 : index
    %c0_147 = arith.constant 0 : index
    %c0_148 = arith.constant 0 : index
    %169 = vector.load %arg5[%c3_146, %c0_147, %c0_148] : memref<4x8x32xf32, #tpu.memory_space<vmem>>, vector<1x8x32xf32>
    %170 = vector.shape_cast %169 : vector<1x8x32xf32> to vector<8x32xf32>
    %cst_149 = arith.constant dense<0.000000e+00> : vector<8x32xf32>
    %171 = tpu.matmul %168, %170, %cst_149 {dimension_numbers = #tpu.dot_dimension_numbers<[1], [0], [0], [1], [0, 0, 1, 1], [], []>} : vector<8x8xf32>, vector<8x32xf32>, vector<8x32xf32> -> vector<8x32xf32>
    %172 = arith.addf %130, %171 : vector<8x32xf32>
    %c0_150 = arith.constant 0 : index
    %c0_151 = arith.constant 0 : index
    %173 = vector.load %arg6[%c0_150, %c0_151] : memref<1x32xf32, #tpu.memory_space<vmem>>, vector<1x32xf32>
    %174 = vector.broadcast %173 : vector<1x32xf32> to vector<8x32xf32>
    %175 = arith.addf %172, %174 : vector<8x32xf32>
    %176 = arith.addf %1, %175 : vector<8x32xf32>
    %c0_152 = arith.constant 0 : index
    %c0_153 = arith.constant 0 : index
    %c0_154 = arith.constant 0 : index
    %177 = vector.load %arg11[%c0_152, %c0_153, %c0_154] : memref<2x1x32xf32, #tpu.memory_space<vmem>>, vector<1x1x32xf32>
    %178 = vector.shape_cast %177 : vector<1x1x32xf32> to vector<1x32xf32>
    %c0_155 = arith.constant 0 : index
    %c0_156 = arith.constant 0 : index
    %c0_157 = arith.constant 0 : index
    %179 = vector.load %arg12[%c0_155, %c0_156, %c0_157] : memref<2x1x32xf32, #tpu.memory_space<vmem>>, vector<1x1x32xf32>
    %180 = vector.shape_cast %179 : vector<1x1x32xf32> to vector<1x32xf32>
    %cst_158 = arith.constant dense<0.000000e+00> : vector<8xf32>
    %181 = vector.multi_reduction <add>, %176, %cst_158 [1] : vector<8x32xf32> to vector<8xf32>
    %182 = vector.shape_cast %181 : vector<8xf32> to vector<8x1xf32>
    %cst_159 = arith.constant 3.200000e+01 : f32
    %183 = vector.broadcast %cst_159 : f32 to vector<8x1xf32>
    %184 = arith.divf %182, %183 : vector<8x1xf32>
    %185 = vector.broadcast %184 : vector<8x1xf32> to vector<8x32xf32>
    %186 = arith.subf %176, %185 : vector<8x32xf32>
    %187 = arith.mulf %186, %186 : vector<8x32xf32>
    %cst_160 = arith.constant dense<0.000000e+00> : vector<8xf32>
    %188 = vector.multi_reduction <add>, %187, %cst_160 [1] : vector<8x32xf32> to vector<8xf32>
    %189 = vector.shape_cast %188 : vector<8xf32> to vector<8x1xf32>
    %cst_161 = arith.constant 3.200000e+01 : f32
    %190 = vector.broadcast %cst_161 : f32 to vector<8x1xf32>
    %191 = arith.divf %189, %190 : vector<8x1xf32>
    %192 = vector.broadcast %184 : vector<8x1xf32> to vector<8x32xf32>
    %193 = arith.subf %176, %192 : vector<8x32xf32>
    %cst_162 = arith.constant 9.99999974E-6 : f32
    %194 = vector.broadcast %cst_162 : f32 to vector<8x1xf32>
    %195 = arith.addf %191, %194 : vector<8x1xf32>
    %196 = math.rsqrt %195 : vector<8x1xf32>
    %197 = vector.broadcast %196 : vector<8x1xf32> to vector<8x32xf32>
    %198 = arith.mulf %193, %197 : vector<8x32xf32>
    %199 = vector.broadcast %178 : vector<1x32xf32> to vector<8x32xf32>
    %200 = arith.mulf %198, %199 : vector<8x32xf32>
    %201 = vector.broadcast %180 : vector<1x32xf32> to vector<8x32xf32>
    %202 = arith.addf %200, %201 : vector<8x32xf32>
    %c0_163 = arith.constant 0 : index
    %c0_164 = arith.constant 0 : index
    %203 = vector.load %arg7[%c0_163, %c0_164] : memref<32x64xf32, #tpu.memory_space<vmem>>, vector<32x64xf32>
    %cst_165 = arith.constant dense<0.000000e+00> : vector<8x64xf32>
    %204 = tpu.matmul %202, %203, %cst_165 {dimension_numbers = #tpu.dot_dimension_numbers<[1], [0], [0], [1], [0, 0, 1, 1], [], []>} : vector<8x32xf32>, vector<32x64xf32>, vector<8x64xf32> -> vector<8x64xf32>
    %c0_166 = arith.constant 0 : index
    %c0_167 = arith.constant 0 : index
    %205 = vector.load %arg8[%c0_166, %c0_167] : memref<1x64xf32, #tpu.memory_space<vmem>>, vector<1x64xf32>
    %206 = vector.broadcast %205 : vector<1x64xf32> to vector<8x64xf32>
    %207 = arith.addf %204, %206 : vector<8x64xf32>
    %cst_168 = arith.constant 0.000000e+00 : f32
    %208 = vector.broadcast %cst_168 : f32 to vector<8x64xf32>
    %209 = arith.maximumf %207, %208 : vector<8x64xf32>
    %c0_169 = arith.constant 0 : index
    %c0_170 = arith.constant 0 : index
    %210 = vector.load %arg9[%c0_169, %c0_170] : memref<64x32xf32, #tpu.memory_space<vmem>>, vector<64x32xf32>
    %cst_171 = arith.constant dense<0.000000e+00> : vector<8x32xf32>
    %211 = tpu.matmul %209, %210, %cst_171 {dimension_numbers = #tpu.dot_dimension_numbers<[1], [0], [0], [1], [0, 0, 1, 1], [], []>} : vector<8x64xf32>, vector<64x32xf32>, vector<8x32xf32> -> vector<8x32xf32>
    %c0_172 = arith.constant 0 : index
    %c0_173 = arith.constant 0 : index
    %212 = vector.load %arg10[%c0_172, %c0_173] : memref<1x32xf32, #tpu.memory_space<vmem>>, vector<1x32xf32>
    %213 = vector.broadcast %212 : vector<1x32xf32> to vector<8x32xf32>
    %214 = arith.addf %211, %213 : vector<8x32xf32>
    %215 = arith.addf %202, %214 : vector<8x32xf32>
    %c1_174 = arith.constant 1 : index
    %c0_175 = arith.constant 0 : index
    %c0_176 = arith.constant 0 : index
    %216 = vector.load %arg11[%c1_174, %c0_175, %c0_176] : memref<2x1x32xf32, #tpu.memory_space<vmem>>, vector<1x1x32xf32>
    %217 = vector.shape_cast %216 : vector<1x1x32xf32> to vector<1x32xf32>
    %c1_177 = arith.constant 1 : index
    %c0_178 = arith.constant 0 : index
    %c0_179 = arith.constant 0 : index
    %218 = vector.load %arg12[%c1_177, %c0_178, %c0_179] : memref<2x1x32xf32, #tpu.memory_space<vmem>>, vector<1x1x32xf32>
    %219 = vector.shape_cast %218 : vector<1x1x32xf32> to vector<1x32xf32>
    %cst_180 = arith.constant dense<0.000000e+00> : vector<8xf32>
    %220 = vector.multi_reduction <add>, %215, %cst_180 [1] : vector<8x32xf32> to vector<8xf32>
    %221 = vector.shape_cast %220 : vector<8xf32> to vector<8x1xf32>
    %cst_181 = arith.constant 3.200000e+01 : f32
    %222 = vector.broadcast %cst_181 : f32 to vector<8x1xf32>
    %223 = arith.divf %221, %222 : vector<8x1xf32>
    %224 = vector.broadcast %223 : vector<8x1xf32> to vector<8x32xf32>
    %225 = arith.subf %215, %224 : vector<8x32xf32>
    %226 = arith.mulf %225, %225 : vector<8x32xf32>
    %cst_182 = arith.constant dense<0.000000e+00> : vector<8xf32>
    %227 = vector.multi_reduction <add>, %226, %cst_182 [1] : vector<8x32xf32> to vector<8xf32>
    %228 = vector.shape_cast %227 : vector<8xf32> to vector<8x1xf32>
    %cst_183 = arith.constant 3.200000e+01 : f32
    %229 = vector.broadcast %cst_183 : f32 to vector<8x1xf32>
    %230 = arith.divf %228, %229 : vector<8x1xf32>
    %231 = vector.broadcast %223 : vector<8x1xf32> to vector<8x32xf32>
    %232 = arith.subf %215, %231 : vector<8x32xf32>
    %cst_184 = arith.constant 9.99999974E-6 : f32
    %233 = vector.broadcast %cst_184 : f32 to vector<8x1xf32>
    %234 = arith.addf %230, %233 : vector<8x1xf32>
    %235 = math.rsqrt %234 : vector<8x1xf32>
    %236 = vector.broadcast %235 : vector<8x1xf32> to vector<8x32xf32>
    %237 = arith.mulf %232, %236 : vector<8x32xf32>
    %238 = vector.broadcast %217 : vector<1x32xf32> to vector<8x32xf32>
    %239 = arith.mulf %237, %238 : vector<8x32xf32>
    %240 = vector.broadcast %219 : vector<1x32xf32> to vector<8x32xf32>
    %241 = arith.addf %239, %240 : vector<8x32xf32>
    %242 = vector.shape_cast %241 : vector<8x32xf32> to vector<1x8x32xf32>
    %c0_185 = arith.constant 0 : index
    %c0_186 = arith.constant 0 : index
    %c0_187 = arith.constant 0 : index
    %243 = vector.load %arg13[%c0_185, %c0_186, %c0_187] : memref<1x8x32xf32, #tpu.memory_space<vmem>>, vector<1x8x32xf32>
    tpu.vector_store %arg13[%c0_185, %c0_186, %c0_187], %242 {strides = array<i32>} : memref<1x8x32xf32, #tpu.memory_space<vmem>>, vector<1x8x32xf32>,
    return
  }
  func.func @transform_0(%arg0: i32) -> (i32, i32, i32) {
    %c0_i32 = arith.constant 0 : i32
    %c0_i32_0 = arith.constant 0 : i32
    %c0_i32_1 = arith.constant 0 : i32
    return %arg0, %c0_i32, %c0_i32_0 : i32, i32, i32
  }
  func.func @transform_1(%arg0: i32) -> (i32, i32, i32) {
    %c0_i32 = arith.constant 0 : i32
    %c0_i32_0 = arith.constant 0 : i32
    %c0_i32_1 = arith.constant 0 : i32
    return %arg0, %c0_i32, %c0_i32_0 : i32, i32, i32
  }
  func.func @transform_2(%arg0: i32) -> (i32, i32, i32, i32) {
    %c0_i32 = arith.constant 0 : i32
    %c0_i32_0 = arith.constant 0 : i32
    %c0_i32_1 = arith.constant 0 : i32
    %c0_i32_2 = arith.constant 0 : i32
    %c0_i32_3 = arith.constant 0 : i32
    return %c0_i32, %c0_i32_0, %c0_i32_1, %c0_i32_2 : i32, i32, i32, i32
  }
  func.func @transform_3(%arg0: i32) -> (i32, i32, i32, i32) {
    %c0_i32 = arith.constant 0 : i32
    %c0_i32_0 = arith.constant 0 : i32
    %c0_i32_1 = arith.constant 0 : i32
    %c0_i32_2 = arith.constant 0 : i32
    %c0_i32_3 = arith.constant 0 : i32
    return %c0_i32, %c0_i32_0, %c0_i32_1, %c0_i32_2 : i32, i32, i32, i32
  }
  func.func @transform_4(%arg0: i32) -> (i32, i32, i32) {
    %c0_i32 = arith.constant 0 : i32
    %c0_i32_0 = arith.constant 0 : i32
    %c0_i32_1 = arith.constant 0 : i32
    %c0_i32_2 = arith.constant 0 : i32
    return %c0_i32, %c0_i32_0, %c0_i32_1 : i32, i32, i32
  }
  func.func @transform_5(%arg0: i32) -> (i32, i32) {
    %c0_i32 = arith.constant 0 : i32
    %c0_i32_0 = arith.constant 0 : i32
    %c0_i32_1 = arith.constant 0 : i32
    return %c0_i32, %c0_i32_0 : i32, i32
  }
  func.func @transform_6(%arg0: i32) -> (i32, i32) {
    %c0_i32 = arith.constant 0 : i32
    %c0_i32_0 = arith.constant 0 : i32
    %c0_i32_1 = arith.constant 0 : i32
    return %c0_i32, %c0_i32_0 : i32, i32
  }
  func.func @transform_7(%arg0: i32) -> (i32, i32) {
    %c0_i32 = arith.constant 0 : i32
    %c0_i32_0 = arith.constant 0 : i32
    %c0_i32_1 = arith.constant 0 : i32
    return %c0_i32, %c0_i32_0 : i32, i32
  }
  func.func @transform_8(%arg0: i32) -> (i32, i32) {
    %c0_i32 = arith.constant 0 : i32
    %c0_i32_0 = arith.constant 0 : i32
    %c0_i32_1 = arith.constant 0 : i32
    return %c0_i32, %c0_i32_0 : i32, i32
  }
  func.func @transform_9(%arg0: i32) -> (i32, i32) {
    %c0_i32 = arith.constant 0 : i32
    %c0_i32_0 = arith.constant 0 : i32
    %c0_i32_1 = arith.constant 0 : i32
    return %c0_i32, %c0_i32_0 : i32, i32
  }
  func.func @transform_10(%arg0: i32) -> (i32, i32, i32) {
    %c0_i32 = arith.constant 0 : i32
    %c0_i32_0 = arith.constant 0 : i32
    %c0_i32_1 = arith.constant 0 : i32
    %c0_i32_2 = arith.constant 0 : i32
    return %c0_i32, %c0_i32_0, %c0_i32_1 : i32, i32, i32
  }
  func.func @transform_11(%arg0: i32) -> (i32, i32, i32) {
    %c0_i32 = arith.constant 0 : i32
    %c0_i32_0 = arith.constant 0 : i32
    %c0_i32_1 = arith.constant 0 : i32
    %c0_i32_2 = arith.constant 0 : i32
    return %c0_i32, %c0_i32_0, %c0_i32_1 : i32, i32, i32
  }
  func.func @transform_12(%arg0: i32) -> (i32, i32, i32) {
    %c0_i32 = arith.constant 0 : i32
    %c0_i32_0 = arith.constant 0 : i32
    %c0_i32_1 = arith.constant 0 : i32
    return %arg0, %c0_i32, %c0_i32_0 : i32, i32, i32
  }
}

module attributes {stable_mosaic.version = 11 : i64} {
  func.func @_decoder_layer_kernel(%arg0: i32, %arg1: memref<1x8x32xf32, #tpu.memory_space<vmem>>, %arg2: memref<1x8x32xf32, #tpu.memory_space<vmem>>, %arg3: memref<1x1x8xf32, #tpu.memory_space<vmem>>, %arg4: memref<1x1x8xf32, #tpu.memory_space<vmem>>, %arg5: memref<3x4x32x8xf32, #tpu.memory_space<vmem>>, %arg6: memref<3x4x1x8xf32, #tpu.memory_space<vmem>>, %arg7: memref<4x8x32xf32, #tpu.memory_space<vmem>>, %arg8: memref<1x32xf32, #tpu.memory_space<vmem>>, %arg9: memref<3x4x32x8xf32, #tpu.memory_space<vmem>>, %arg10: memref<3x4x1x8xf32, #tpu.memory_space<vmem>>, %arg11: memref<4x8x32xf32, #tpu.memory_space<vmem>>, %arg12: memref<1x32xf32, #tpu.memory_space<vmem>>, %arg13: memref<32x64xf32, #tpu.memory_space<vmem>>, %arg14: memref<1x64xf32, #tpu.memory_space<vmem>>, %arg15: memref<64x32xf32, #tpu.memory_space<vmem>>, %arg16: memref<1x32xf32, #tpu.memory_space<vmem>>, %arg17: memref<3x1x32xf32, #tpu.memory_space<vmem>>, %arg18: memref<3x1x32xf32, #tpu.memory_space<vmem>>, %arg19: memref<32x16xf32, #tpu.memory_space<vmem>>, %arg20: memref<1x16xf32, #tpu.memory_space<vmem>>, %arg21: memref<1x8x16xf32, #tpu.memory_space<vmem>>) attributes {dimension_semantics = [#tpu.dimension_semantics<parallel>], iteration_bounds = array<i64: 2>, scalar_prefetch = 0 : i64, scratch_operands = 0 : i64, tpu.core_type = #tpu.core_type<tc>, window_params = [{transform_indices = @transform_0, window_bounds = array<i64: 1, 8, 32>}, {transform_indices = @transform_1, window_bounds = array<i64: 1, 8, 32>}, {transform_indices = @transform_2, window_bounds = array<i64: 1, 1, 8>}, {transform_indices = @transform_3, window_bounds = array<i64: 1, 1, 8>}, {pipeline_mode = #tpu.pipeline_mode<synchronous>, transform_indices = @transform_4, window_bounds = array<i64: 3, 4, 32, 8>}, {pipeline_mode = #tpu.pipeline_mode<synchronous>, transform_indices = @transform_5, window_bounds = array<i64: 3, 4, 1, 8>}, {pipeline_mode = #tpu.pipeline_mode<synchronous>, transform_indices = @transform_6, window_bounds = array<i64: 4, 8, 32>}, {pipeline_mode = #tpu.pipeline_mode<synchronous>, transform_indices = @transform_7, window_bounds = array<i64: 1, 32>}, {pipeline_mode = #tpu.pipeline_mode<synchronous>, transform_indices = @transform_8, window_bounds = array<i64: 3, 4, 32, 8>}, {pipeline_mode = #tpu.pipeline_mode<synchronous>, transform_indices = @transform_9, window_bounds = array<i64: 3, 4, 1, 8>}, {pipeline_mode = #tpu.pipeline_mode<synchronous>, transform_indices = @transform_10, window_bounds = array<i64: 4, 8, 32>}, {pipeline_mode = #tpu.pipeline_mode<synchronous>, transform_indices = @transform_11, window_bounds = array<i64: 1, 32>}, {pipeline_mode = #tpu.pipeline_mode<synchronous>, transform_indices = @transform_12, window_bounds = array<i64: 32, 64>}, {pipeline_mode = #tpu.pipeline_mode<synchronous>, transform_indices = @transform_13, window_bounds = array<i64: 1, 64>}, {pipeline_mode = #tpu.pipeline_mode<synchronous>, transform_indices = @transform_14, window_bounds = array<i64: 64, 32>}, {pipeline_mode = #tpu.pipeline_mode<synchronous>, transform_indices = @transform_15, window_bounds = array<i64: 1, 32>}, {pipeline_mode = #tpu.pipeline_mode<synchronous>, transform_indices = @transform_16, window_bounds = array<i64: 3, 1, 32>}, {pipeline_mode = #tpu.pipeline_mode<synchronous>, transform_indices = @transform_17, window_bounds = array<i64: 3, 1, 32>}, {pipeline_mode = #tpu.pipeline_mode<synchronous>, transform_indices = @transform_18, window_bounds = array<i64: 32, 16>}, {pipeline_mode = #tpu.pipeline_mode<synchronous>, transform_indices = @transform_19, window_bounds = array<i64: 1, 16>}, {transform_indices = @transform_20, window_bounds = array<i64: 1, 8, 16>}]} {
    %c0 = arith.constant 0 : index
    %c0_0 = arith.constant 0 : index
    %c0_1 = arith.constant 0 : index
    %0 = vector.load %arg1[%c0, %c0_0, %c0_1] : memref<1x8x32xf32, #tpu.memory_space<vmem>>, vector<1x8x32xf32>
    %1 = vector.shape_cast %0 : vector<1x8x32xf32> to vector<8x32xf32>
    %c0_2 = arith.constant 0 : index
    %c0_3 = arith.constant 0 : index
    %c0_4 = arith.constant 0 : index
    %2 = vector.load %arg2[%c0_2, %c0_3, %c0_4] : memref<1x8x32xf32, #tpu.memory_space<vmem>>, vector<1x8x32xf32>
    %3 = vector.shape_cast %2 : vector<1x8x32xf32> to vector<8x32xf32>
    %c0_5 = arith.constant 0 : index
    %c0_6 = arith.constant 0 : index
    %c0_7 = arith.constant 0 : index
    %4 = vector.load %arg3[%c0_5, %c0_6, %c0_7] : memref<1x1x8xf32, #tpu.memory_space<vmem>>, vector<1x1x8xf32>
    %5 = vector.shape_cast %4 : vector<1x1x8xf32> to vector<1x8xf32>
    %cst = arith.constant 0.000000e+00 : f32
    %6 = vector.broadcast %cst : f32 to vector<1x8xf32>
    %7 = arith.cmpf ogt, %5, %6 : vector<1x8xf32>
    %c0_8 = arith.constant 0 : index
    %c0_9 = arith.constant 0 : index
    %c0_10 = arith.constant 0 : index
    %8 = vector.load %arg4[%c0_8, %c0_9, %c0_10] : memref<1x1x8xf32, #tpu.memory_space<vmem>>, vector<1x1x8xf32>
    %9 = vector.shape_cast %8 : vector<1x1x8xf32> to vector<1x8xf32>
    %cst_11 = arith.constant 0.000000e+00 : f32
    %10 = vector.broadcast %cst_11 : f32 to vector<1x8xf32>
    %11 = arith.cmpf ogt, %9, %10 : vector<1x8xf32>
    %12 = tpu.iota {dimensions = array<i32: 0>} : vector<8x8xi32>
    %13 = tpu.iota {dimensions = array<i32: 1>} : vector<8x8xi32>
    %14 = arith.cmpi sge, %12, %13 : vector<8x8xi32>
    %15 = vector.broadcast %7 : vector<1x8xi1> to vector<8x8xi1>
    %16 = arith.andi %14, %15 : vector<8x8xi1>
    %c0_12 = arith.constant 0 : index
    %c0_13 = arith.constant 0 : index
    %c0_14 = arith.constant 0 : index
    %c0_15 = arith.constant 0 : index
    %17 = vector.load %arg5[%c0_12, %c0_13, %c0_14, %c0_15] : memref<3x4x32x8xf32, #tpu.memory_space<vmem>>, vector<1x1x32x8xf32>
    %18 = vector.shape_cast %17 : vector<1x1x32x8xf32> to vector<32x8xf32>
    %cst_16 = arith.constant dense<0.000000e+00> : vector<8x8xf32>
    %19 = tpu.matmul %1, %18, %cst_16 {dimension_numbers = #tpu.dot_dimension_numbers<[1], [0], [0], [1], [0, 0, 1, 1], [], []>} : vector<8x32xf32>, vector<32x8xf32>, vector<8x8xf32> -> vector<8x8xf32>
    %c0_17 = arith.constant 0 : index
    %c0_18 = arith.constant 0 : index
    %c0_19 = arith.constant 0 : index
    %c0_20 = arith.constant 0 : index
    %20 = vector.load %arg6[%c0_17, %c0_18, %c0_19, %c0_20] : memref<3x4x1x8xf32, #tpu.memory_space<vmem>>, vector<1x1x1x8xf32>
    %21 = vector.shape_cast %20 : vector<1x1x1x8xf32> to vector<1x8xf32>
    %22 = vector.broadcast %21 : vector<1x8xf32> to vector<8x8xf32>
    %23 = arith.addf %19, %22 : vector<8x8xf32>
    %c1 = arith.constant 1 : index
    %c0_21 = arith.constant 0 : index
    %c0_22 = arith.constant 0 : index
    %c0_23 = arith.constant 0 : index
    %24 = vector.load %arg5[%c1, %c0_21, %c0_22, %c0_23] : memref<3x4x32x8xf32, #tpu.memory_space<vmem>>, vector<1x1x32x8xf32>
    %25 = vector.shape_cast %24 : vector<1x1x32x8xf32> to vector<32x8xf32>
    %cst_24 = arith.constant dense<0.000000e+00> : vector<8x8xf32>
    %26 = tpu.matmul %1, %25, %cst_24 {dimension_numbers = #tpu.dot_dimension_numbers<[1], [0], [0], [1], [0, 0, 1, 1], [], []>} : vector<8x32xf32>, vector<32x8xf32>, vector<8x8xf32> -> vector<8x8xf32>
    %c1_25 = arith.constant 1 : index
    %c0_26 = arith.constant 0 : index
    %c0_27 = arith.constant 0 : index
    %c0_28 = arith.constant 0 : index
    %27 = vector.load %arg6[%c1_25, %c0_26, %c0_27, %c0_28] : memref<3x4x1x8xf32, #tpu.memory_space<vmem>>, vector<1x1x1x8xf32>
    %28 = vector.shape_cast %27 : vector<1x1x1x8xf32> to vector<1x8xf32>
    %29 = vector.broadcast %28 : vector<1x8xf32> to vector<8x8xf32>
    %30 = arith.addf %26, %29 : vector<8x8xf32>
    %c2 = arith.constant 2 : index
    %c0_29 = arith.constant 0 : index
    %c0_30 = arith.constant 0 : index
    %c0_31 = arith.constant 0 : index
    %31 = vector.load %arg5[%c2, %c0_29, %c0_30, %c0_31] : memref<3x4x32x8xf32, #tpu.memory_space<vmem>>, vector<1x1x32x8xf32>
    %32 = vector.shape_cast %31 : vector<1x1x32x8xf32> to vector<32x8xf32>
    %cst_32 = arith.constant dense<0.000000e+00> : vector<8x8xf32>
    %33 = tpu.matmul %1, %32, %cst_32 {dimension_numbers = #tpu.dot_dimension_numbers<[1], [0], [0], [1], [0, 0, 1, 1], [], []>} : vector<8x32xf32>, vector<32x8xf32>, vector<8x8xf32> -> vector<8x8xf32>
    %c2_33 = arith.constant 2 : index
    %c0_34 = arith.constant 0 : index
    %c0_35 = arith.constant 0 : index
    %c0_36 = arith.constant 0 : index
    %34 = vector.load %arg6[%c2_33, %c0_34, %c0_35, %c0_36] : memref<3x4x1x8xf32, #tpu.memory_space<vmem>>, vector<1x1x1x8xf32>
    %35 = vector.shape_cast %34 : vector<1x1x1x8xf32> to vector<1x8xf32>
    %36 = vector.broadcast %35 : vector<1x8xf32> to vector<8x8xf32>
    %37 = arith.addf %33, %36 : vector<8x8xf32>
    %cst_37 = arith.constant dense<0.000000e+00> : vector<8x8xf32>
    %38 = tpu.matmul %23, %30, %cst_37 {dimension_numbers = #tpu.dot_dimension_numbers<[1], [1], [0], [0], [0, 0, 1, 0], [], []>} : vector<8x8xf32>, vector<8x8xf32>, vector<8x8xf32> -> vector<8x8xf32>
    %cst_38 = arith.constant 0.353553385 : f32
    %39 = vector.broadcast %cst_38 : f32 to vector<8x8xf32>
    %40 = arith.mulf %38, %39 : vector<8x8xf32>
    %cst_39 = arith.constant -1.000000e+09 : f32
    %41 = vector.broadcast %cst_39 : f32 to vector<8x8xf32>
    %42 = arith.select %16, %40, %41 : vector<8x8xi1>, vector<8x8xf32>
    %cst_40 = arith.constant dense<0xFF800000> : vector<8xf32>
    %43 = vector.multi_reduction <maximumf>, %42, %cst_40 [1] : vector<8x8xf32> to vector<8xf32>
    %44 = vector.shape_cast %43 : vector<8xf32> to vector<8x1xf32>
    %45 = vector.broadcast %44 : vector<8x1xf32> to vector<8x8xf32>
    %46 = arith.subf %42, %45 : vector<8x8xf32>
    %47 = math.exp %46 : vector<8x8xf32>
    %cst_41 = arith.constant dense<0.000000e+00> : vector<8xf32>
    %48 = vector.multi_reduction <add>, %47, %cst_41 [1] : vector<8x8xf32> to vector<8xf32>
    %49 = vector.shape_cast %48 : vector<8xf32> to vector<8x1xf32>
    %50 = vector.broadcast %49 : vector<8x1xf32> to vector<8x8xf32>
    %51 = arith.divf %47, %50 : vector<8x8xf32>
    %cst_42 = arith.constant dense<0.000000e+00> : vector<8x8xf32>
    %52 = tpu.matmul %51, %37, %cst_42 {dimension_numbers = #tpu.dot_dimension_numbers<[1], [0], [0], [1], [0, 0, 1, 1], [], []>} : vector<8x8xf32>, vector<8x8xf32>, vector<8x8xf32> -> vector<8x8xf32>
    %c0_43 = arith.constant 0 : index
    %c0_44 = arith.constant 0 : index
    %c0_45 = arith.constant 0 : index
    %53 = vector.load %arg7[%c0_43, %c0_44, %c0_45] : memref<4x8x32xf32, #tpu.memory_space<vmem>>, vector<1x8x32xf32>
    %54 = vector.shape_cast %53 : vector<1x8x32xf32> to vector<8x32xf32>
    %cst_46 = arith.constant dense<0.000000e+00> : vector<8x32xf32>
    %55 = tpu.matmul %52, %54, %cst_46 {dimension_numbers = #tpu.dot_dimension_numbers<[1], [0], [0], [1], [0, 0, 1, 1], [], []>} : vector<8x8xf32>, vector<8x32xf32>, vector<8x32xf32> -> vector<8x32xf32>
    %c0_47 = arith.constant 0 : index
    %c1_48 = arith.constant 1 : index
    %c0_49 = arith.constant 0 : index
    %c0_50 = arith.constant 0 : index
    %56 = vector.load %arg5[%c0_47, %c1_48, %c0_49, %c0_50] : memref<3x4x32x8xf32, #tpu.memory_space<vmem>>, vector<1x1x32x8xf32>
    %57 = vector.shape_cast %56 : vector<1x1x32x8xf32> to vector<32x8xf32>
    %cst_51 = arith.constant dense<0.000000e+00> : vector<8x8xf32>
    %58 = tpu.matmul %1, %57, %cst_51 {dimension_numbers = #tpu.dot_dimension_numbers<[1], [0], [0], [1], [0, 0, 1, 1], [], []>} : vector<8x32xf32>, vector<32x8xf32>, vector<8x8xf32> -> vector<8x8xf32>
    %c0_52 = arith.constant 0 : index
    %c1_53 = arith.constant 1 : index
    %c0_54 = arith.constant 0 : index
    %c0_55 = arith.constant 0 : index
    %59 = vector.load %arg6[%c0_52, %c1_53, %c0_54, %c0_55] : memref<3x4x1x8xf32, #tpu.memory_space<vmem>>, vector<1x1x1x8xf32>
    %60 = vector.shape_cast %59 : vector<1x1x1x8xf32> to vector<1x8xf32>
    %61 = vector.broadcast %60 : vector<1x8xf32> to vector<8x8xf32>
    %62 = arith.addf %58, %61 : vector<8x8xf32>
    %c1_56 = arith.constant 1 : index
    %c1_57 = arith.constant 1 : index
    %c0_58 = arith.constant 0 : index
    %c0_59 = arith.constant 0 : index
    %63 = vector.load %arg5[%c1_56, %c1_57, %c0_58, %c0_59] : memref<3x4x32x8xf32, #tpu.memory_space<vmem>>, vector<1x1x32x8xf32>
    %64 = vector.shape_cast %63 : vector<1x1x32x8xf32> to vector<32x8xf32>
    %cst_60 = arith.constant dense<0.000000e+00> : vector<8x8xf32>
    %65 = tpu.matmul %1, %64, %cst_60 {dimension_numbers = #tpu.dot_dimension_numbers<[1], [0], [0], [1], [0, 0, 1, 1], [], []>} : vector<8x32xf32>, vector<32x8xf32>, vector<8x8xf32> -> vector<8x8xf32>
    %c1_61 = arith.constant 1 : index
    %c1_62 = arith.constant 1 : index
    %c0_63 = arith.constant 0 : index
    %c0_64 = arith.constant 0 : index
    %66 = vector.load %arg6[%c1_61, %c1_62, %c0_63, %c0_64] : memref<3x4x1x8xf32, #tpu.memory_space<vmem>>, vector<1x1x1x8xf32>
    %67 = vector.shape_cast %66 : vector<1x1x1x8xf32> to vector<1x8xf32>
    %68 = vector.broadcast %67 : vector<1x8xf32> to vector<8x8xf32>
    %69 = arith.addf %65, %68 : vector<8x8xf32>
    %c2_65 = arith.constant 2 : index
    %c1_66 = arith.constant 1 : index
    %c0_67 = arith.constant 0 : index
    %c0_68 = arith.constant 0 : index
    %70 = vector.load %arg5[%c2_65, %c1_66, %c0_67, %c0_68] : memref<3x4x32x8xf32, #tpu.memory_space<vmem>>, vector<1x1x32x8xf32>
    %71 = vector.shape_cast %70 : vector<1x1x32x8xf32> to vector<32x8xf32>
    %cst_69 = arith.constant dense<0.000000e+00> : vector<8x8xf32>
    %72 = tpu.matmul %1, %71, %cst_69 {dimension_numbers = #tpu.dot_dimension_numbers<[1], [0], [0], [1], [0, 0, 1, 1], [], []>} : vector<8x32xf32>, vector<32x8xf32>, vector<8x8xf32> -> vector<8x8xf32>
    %c2_70 = arith.constant 2 : index
    %c1_71 = arith.constant 1 : index
    %c0_72 = arith.constant 0 : index
    %c0_73 = arith.constant 0 : index
    %73 = vector.load %arg6[%c2_70, %c1_71, %c0_72, %c0_73] : memref<3x4x1x8xf32, #tpu.memory_space<vmem>>, vector<1x1x1x8xf32>
    %74 = vector.shape_cast %73 : vector<1x1x1x8xf32> to vector<1x8xf32>
    %75 = vector.broadcast %74 : vector<1x8xf32> to vector<8x8xf32>
    %76 = arith.addf %72, %75 : vector<8x8xf32>
    %cst_74 = arith.constant dense<0.000000e+00> : vector<8x8xf32>
    %77 = tpu.matmul %62, %69, %cst_74 {dimension_numbers = #tpu.dot_dimension_numbers<[1], [1], [0], [0], [0, 0, 1, 0], [], []>} : vector<8x8xf32>, vector<8x8xf32>, vector<8x8xf32> -> vector<8x8xf32>
    %cst_75 = arith.constant 0.353553385 : f32
    %78 = vector.broadcast %cst_75 : f32 to vector<8x8xf32>
    %79 = arith.mulf %77, %78 : vector<8x8xf32>
    %cst_76 = arith.constant -1.000000e+09 : f32
    %80 = vector.broadcast %cst_76 : f32 to vector<8x8xf32>
    %81 = arith.select %16, %79, %80 : vector<8x8xi1>, vector<8x8xf32>
    %cst_77 = arith.constant dense<0xFF800000> : vector<8xf32>
    %82 = vector.multi_reduction <maximumf>, %81, %cst_77 [1] : vector<8x8xf32> to vector<8xf32>
    %83 = vector.shape_cast %82 : vector<8xf32> to vector<8x1xf32>
    %84 = vector.broadcast %83 : vector<8x1xf32> to vector<8x8xf32>
    %85 = arith.subf %81, %84 : vector<8x8xf32>
    %86 = math.exp %85 : vector<8x8xf32>
    %cst_78 = arith.constant dense<0.000000e+00> : vector<8xf32>
    %87 = vector.multi_reduction <add>, %86, %cst_78 [1] : vector<8x8xf32> to vector<8xf32>
    %88 = vector.shape_cast %87 : vector<8xf32> to vector<8x1xf32>
    %89 = vector.broadcast %88 : vector<8x1xf32> to vector<8x8xf32>
    %90 = arith.divf %86, %89 : vector<8x8xf32>
    %cst_79 = arith.constant dense<0.000000e+00> : vector<8x8xf32>
    %91 = tpu.matmul %90, %76, %cst_79 {dimension_numbers = #tpu.dot_dimension_numbers<[1], [0], [0], [1], [0, 0, 1, 1], [], []>} : vector<8x8xf32>, vector<8x8xf32>, vector<8x8xf32> -> vector<8x8xf32>
    %c1_80 = arith.constant 1 : index
    %c0_81 = arith.constant 0 : index
    %c0_82 = arith.constant 0 : index
    %92 = vector.load %arg7[%c1_80, %c0_81, %c0_82] : memref<4x8x32xf32, #tpu.memory_space<vmem>>, vector<1x8x32xf32>
    %93 = vector.shape_cast %92 : vector<1x8x32xf32> to vector<8x32xf32>
    %cst_83 = arith.constant dense<0.000000e+00> : vector<8x32xf32>
    %94 = tpu.matmul %91, %93, %cst_83 {dimension_numbers = #tpu.dot_dimension_numbers<[1], [0], [0], [1], [0, 0, 1, 1], [], []>} : vector<8x8xf32>, vector<8x32xf32>, vector<8x32xf32> -> vector<8x32xf32>
    %95 = arith.addf %55, %94 : vector<8x32xf32>
    %c0_84 = arith.constant 0 : index
    %c2_85 = arith.constant 2 : index
    %c0_86 = arith.constant 0 : index
    %c0_87 = arith.constant 0 : index
    %96 = vector.load %arg5[%c0_84, %c2_85, %c0_86, %c0_87] : memref<3x4x32x8xf32, #tpu.memory_space<vmem>>, vector<1x1x32x8xf32>
    %97 = vector.shape_cast %96 : vector<1x1x32x8xf32> to vector<32x8xf32>
    %cst_88 = arith.constant dense<0.000000e+00> : vector<8x8xf32>
    %98 = tpu.matmul %1, %97, %cst_88 {dimension_numbers = #tpu.dot_dimension_numbers<[1], [0], [0], [1], [0, 0, 1, 1], [], []>} : vector<8x32xf32>, vector<32x8xf32>, vector<8x8xf32> -> vector<8x8xf32>
    %c0_89 = arith.constant 0 : index
    %c2_90 = arith.constant 2 : index
    %c0_91 = arith.constant 0 : index
    %c0_92 = arith.constant 0 : index
    %99 = vector.load %arg6[%c0_89, %c2_90, %c0_91, %c0_92] : memref<3x4x1x8xf32, #tpu.memory_space<vmem>>, vector<1x1x1x8xf32>
    %100 = vector.shape_cast %99 : vector<1x1x1x8xf32> to vector<1x8xf32>
    %101 = vector.broadcast %100 : vector<1x8xf32> to vector<8x8xf32>
    %102 = arith.addf %98, %101 : vector<8x8xf32>
    %c1_93 = arith.constant 1 : index
    %c2_94 = arith.constant 2 : index
    %c0_95 = arith.constant 0 : index
    %c0_96 = arith.constant 0 : index
    %103 = vector.load %arg5[%c1_93, %c2_94, %c0_95, %c0_96] : memref<3x4x32x8xf32, #tpu.memory_space<vmem>>, vector<1x1x32x8xf32>
    %104 = vector.shape_cast %103 : vector<1x1x32x8xf32> to vector<32x8xf32>
    %cst_97 = arith.constant dense<0.000000e+00> : vector<8x8xf32>
    %105 = tpu.matmul %1, %104, %cst_97 {dimension_numbers = #tpu.dot_dimension_numbers<[1], [0], [0], [1], [0, 0, 1, 1], [], []>} : vector<8x32xf32>, vector<32x8xf32>, vector<8x8xf32> -> vector<8x8xf32>
    %c1_98 = arith.constant 1 : index
    %c2_99 = arith.constant 2 : index
    %c0_100 = arith.constant 0 : index
    %c0_101 = arith.constant 0 : index
    %106 = vector.load %arg6[%c1_98, %c2_99, %c0_100, %c0_101] : memref<3x4x1x8xf32, #tpu.memory_space<vmem>>, vector<1x1x1x8xf32>
    %107 = vector.shape_cast %106 : vector<1x1x1x8xf32> to vector<1x8xf32>
    %108 = vector.broadcast %107 : vector<1x8xf32> to vector<8x8xf32>
    %109 = arith.addf %105, %108 : vector<8x8xf32>
    %c2_102 = arith.constant 2 : index
    %c2_103 = arith.constant 2 : index
    %c0_104 = arith.constant 0 : index
    %c0_105 = arith.constant 0 : index
    %110 = vector.load %arg5[%c2_102, %c2_103, %c0_104, %c0_105] : memref<3x4x32x8xf32, #tpu.memory_space<vmem>>, vector<1x1x32x8xf32>
    %111 = vector.shape_cast %110 : vector<1x1x32x8xf32> to vector<32x8xf32>
    %cst_106 = arith.constant dense<0.000000e+00> : vector<8x8xf32>
    %112 = tpu.matmul %1, %111, %cst_106 {dimension_numbers = #tpu.dot_dimension_numbers<[1], [0], [0], [1], [0, 0, 1, 1], [], []>} : vector<8x32xf32>, vector<32x8xf32>, vector<8x8xf32> -> vector<8x8xf32>
    %c2_107 = arith.constant 2 : index
    %c2_108 = arith.constant 2 : index
    %c0_109 = arith.constant 0 : index
    %c0_110 = arith.constant 0 : index
    %113 = vector.load %arg6[%c2_107, %c2_108, %c0_109, %c0_110] : memref<3x4x1x8xf32, #tpu.memory_space<vmem>>, vector<1x1x1x8xf32>
    %114 = vector.shape_cast %113 : vector<1x1x1x8xf32> to vector<1x8xf32>
    %115 = vector.broadcast %114 : vector<1x8xf32> to vector<8x8xf32>
    %116 = arith.addf %112, %115 : vector<8x8xf32>
    %cst_111 = arith.constant dense<0.000000e+00> : vector<8x8xf32>
    %117 = tpu.matmul %102, %109, %cst_111 {dimension_numbers = #tpu.dot_dimension_numbers<[1], [1], [0], [0], [0, 0, 1, 0], [], []>} : vector<8x8xf32>, vector<8x8xf32>, vector<8x8xf32> -> vector<8x8xf32>
    %cst_112 = arith.constant 0.353553385 : f32
    %118 = vector.broadcast %cst_112 : f32 to vector<8x8xf32>
    %119 = arith.mulf %117, %118 : vector<8x8xf32>
    %cst_113 = arith.constant -1.000000e+09 : f32
    %120 = vector.broadcast %cst_113 : f32 to vector<8x8xf32>
    %121 = arith.select %16, %119, %120 : vector<8x8xi1>, vector<8x8xf32>
    %cst_114 = arith.constant dense<0xFF800000> : vector<8xf32>
    %122 = vector.multi_reduction <maximumf>, %121, %cst_114 [1] : vector<8x8xf32> to vector<8xf32>
    %123 = vector.shape_cast %122 : vector<8xf32> to vector<8x1xf32>
    %124 = vector.broadcast %123 : vector<8x1xf32> to vector<8x8xf32>
    %125 = arith.subf %121, %124 : vector<8x8xf32>
    %126 = math.exp %125 : vector<8x8xf32>
    %cst_115 = arith.constant dense<0.000000e+00> : vector<8xf32>
    %127 = vector.multi_reduction <add>, %126, %cst_115 [1] : vector<8x8xf32> to vector<8xf32>
    %128 = vector.shape_cast %127 : vector<8xf32> to vector<8x1xf32>
    %129 = vector.broadcast %128 : vector<8x1xf32> to vector<8x8xf32>
    %130 = arith.divf %126, %129 : vector<8x8xf32>
    %cst_116 = arith.constant dense<0.000000e+00> : vector<8x8xf32>
    %131 = tpu.matmul %130, %116, %cst_116 {dimension_numbers = #tpu.dot_dimension_numbers<[1], [0], [0], [1], [0, 0, 1, 1], [], []>} : vector<8x8xf32>, vector<8x8xf32>, vector<8x8xf32> -> vector<8x8xf32>
    %c2_117 = arith.constant 2 : index
    %c0_118 = arith.constant 0 : index
    %c0_119 = arith.constant 0 : index
    %132 = vector.load %arg7[%c2_117, %c0_118, %c0_119] : memref<4x8x32xf32, #tpu.memory_space<vmem>>, vector<1x8x32xf32>
    %133 = vector.shape_cast %132 : vector<1x8x32xf32> to vector<8x32xf32>
    %cst_120 = arith.constant dense<0.000000e+00> : vector<8x32xf32>
    %134 = tpu.matmul %131, %133, %cst_120 {dimension_numbers = #tpu.dot_dimension_numbers<[1], [0], [0], [1], [0, 0, 1, 1], [], []>} : vector<8x8xf32>, vector<8x32xf32>, vector<8x32xf32> -> vector<8x32xf32>
    %135 = arith.addf %95, %134 : vector<8x32xf32>
    %c0_121 = arith.constant 0 : index
    %c3 = arith.constant 3 : index
    %c0_122 = arith.constant 0 : index
    %c0_123 = arith.constant 0 : index
    %136 = vector.load %arg5[%c0_121, %c3, %c0_122, %c0_123] : memref<3x4x32x8xf32, #tpu.memory_space<vmem>>, vector<1x1x32x8xf32>
    %137 = vector.shape_cast %136 : vector<1x1x32x8xf32> to vector<32x8xf32>
    %cst_124 = arith.constant dense<0.000000e+00> : vector<8x8xf32>
    %138 = tpu.matmul %1, %137, %cst_124 {dimension_numbers = #tpu.dot_dimension_numbers<[1], [0], [0], [1], [0, 0, 1, 1], [], []>} : vector<8x32xf32>, vector<32x8xf32>, vector<8x8xf32> -> vector<8x8xf32>
    %c0_125 = arith.constant 0 : index
    %c3_126 = arith.constant 3 : index
    %c0_127 = arith.constant 0 : index
    %c0_128 = arith.constant 0 : index
    %139 = vector.load %arg6[%c0_125, %c3_126, %c0_127, %c0_128] : memref<3x4x1x8xf32, #tpu.memory_space<vmem>>, vector<1x1x1x8xf32>
    %140 = vector.shape_cast %139 : vector<1x1x1x8xf32> to vector<1x8xf32>
    %141 = vector.broadcast %140 : vector<1x8xf32> to vector<8x8xf32>
    %142 = arith.addf %138, %141 : vector<8x8xf32>
    %c1_129 = arith.constant 1 : index
    %c3_130 = arith.constant 3 : index
    %c0_131 = arith.constant 0 : index
    %c0_132 = arith.constant 0 : index
    %143 = vector.load %arg5[%c1_129, %c3_130, %c0_131, %c0_132] : memref<3x4x32x8xf32, #tpu.memory_space<vmem>>, vector<1x1x32x8xf32>
    %144 = vector.shape_cast %143 : vector<1x1x32x8xf32> to vector<32x8xf32>
    %cst_133 = arith.constant dense<0.000000e+00> : vector<8x8xf32>
    %145 = tpu.matmul %1, %144, %cst_133 {dimension_numbers = #tpu.dot_dimension_numbers<[1], [0], [0], [1], [0, 0, 1, 1], [], []>} : vector<8x32xf32>, vector<32x8xf32>, vector<8x8xf32> -> vector<8x8xf32>
    %c1_134 = arith.constant 1 : index
    %c3_135 = arith.constant 3 : index
    %c0_136 = arith.constant 0 : index
    %c0_137 = arith.constant 0 : index
    %146 = vector.load %arg6[%c1_134, %c3_135, %c0_136, %c0_137] : memref<3x4x1x8xf32, #tpu.memory_space<vmem>>, vector<1x1x1x8xf32>
    %147 = vector.shape_cast %146 : vector<1x1x1x8xf32> to vector<1x8xf32>
    %148 = vector.broadcast %147 : vector<1x8xf32> to vector<8x8xf32>
    %149 = arith.addf %145, %148 : vector<8x8xf32>
    %c2_138 = arith.constant 2 : index
    %c3_139 = arith.constant 3 : index
    %c0_140 = arith.constant 0 : index
    %c0_141 = arith.constant 0 : index
    %150 = vector.load %arg5[%c2_138, %c3_139, %c0_140, %c0_141] : memref<3x4x32x8xf32, #tpu.memory_space<vmem>>, vector<1x1x32x8xf32>
    %151 = vector.shape_cast %150 : vector<1x1x32x8xf32> to vector<32x8xf32>
    %cst_142 = arith.constant dense<0.000000e+00> : vector<8x8xf32>
    %152 = tpu.matmul %1, %151, %cst_142 {dimension_numbers = #tpu.dot_dimension_numbers<[1], [0], [0], [1], [0, 0, 1, 1], [], []>} : vector<8x32xf32>, vector<32x8xf32>, vector<8x8xf32> -> vector<8x8xf32>
    %c2_143 = arith.constant 2 : index
    %c3_144 = arith.constant 3 : index
    %c0_145 = arith.constant 0 : index
    %c0_146 = arith.constant 0 : index
    %153 = vector.load %arg6[%c2_143, %c3_144, %c0_145, %c0_146] : memref<3x4x1x8xf32, #tpu.memory_space<vmem>>, vector<1x1x1x8xf32>
    %154 = vector.shape_cast %153 : vector<1x1x1x8xf32> to vector<1x8xf32>
    %155 = vector.broadcast %154 : vector<1x8xf32> to vector<8x8xf32>
    %156 = arith.addf %152, %155 : vector<8x8xf32>
    %cst_147 = arith.constant dense<0.000000e+00> : vector<8x8xf32>
    %157 = tpu.matmul %142, %149, %cst_147 {dimension_numbers = #tpu.dot_dimension_numbers<[1], [1], [0], [0], [0, 0, 1, 0], [], []>} : vector<8x8xf32>, vector<8x8xf32>, vector<8x8xf32> -> vector<8x8xf32>
    %cst_148 = arith.constant 0.353553385 : f32
    %158 = vector.broadcast %cst_148 : f32 to vector<8x8xf32>
    %159 = arith.mulf %157, %158 : vector<8x8xf32>
    %cst_149 = arith.constant -1.000000e+09 : f32
    %160 = vector.broadcast %cst_149 : f32 to vector<8x8xf32>
    %161 = arith.select %16, %159, %160 : vector<8x8xi1>, vector<8x8xf32>
    %cst_150 = arith.constant dense<0xFF800000> : vector<8xf32>
    %162 = vector.multi_reduction <maximumf>, %161, %cst_150 [1] : vector<8x8xf32> to vector<8xf32>
    %163 = vector.shape_cast %162 : vector<8xf32> to vector<8x1xf32>
    %164 = vector.broadcast %163 : vector<8x1xf32> to vector<8x8xf32>
    %165 = arith.subf %161, %164 : vector<8x8xf32>
    %166 = math.exp %165 : vector<8x8xf32>
    %cst_151 = arith.constant dense<0.000000e+00> : vector<8xf32>
    %167 = vector.multi_reduction <add>, %166, %cst_151 [1] : vector<8x8xf32> to vector<8xf32>
    %168 = vector.shape_cast %167 : vector<8xf32> to vector<8x1xf32>
    %169 = vector.broadcast %168 : vector<8x1xf32> to vector<8x8xf32>
    %170 = arith.divf %166, %169 : vector<8x8xf32>
    %cst_152 = arith.constant dense<0.000000e+00> : vector<8x8xf32>
    %171 = tpu.matmul %170, %156, %cst_152 {dimension_numbers = #tpu.dot_dimension_numbers<[1], [0], [0], [1], [0, 0, 1, 1], [], []>} : vector<8x8xf32>, vector<8x8xf32>, vector<8x8xf32> -> vector<8x8xf32>
    %c3_153 = arith.constant 3 : index
    %c0_154 = arith.constant 0 : index
    %c0_155 = arith.constant 0 : index
    %172 = vector.load %arg7[%c3_153, %c0_154, %c0_155] : memref<4x8x32xf32, #tpu.memory_space<vmem>>, vector<1x8x32xf32>
    %173 = vector.shape_cast %172 : vector<1x8x32xf32> to vector<8x32xf32>
    %cst_156 = arith.constant dense<0.000000e+00> : vector<8x32xf32>
    %174 = tpu.matmul %171, %173, %cst_156 {dimension_numbers = #tpu.dot_dimension_numbers<[1], [0], [0], [1], [0, 0, 1, 1], [], []>} : vector<8x8xf32>, vector<8x32xf32>, vector<8x32xf32> -> vector<8x32xf32>
    %175 = arith.addf %135, %174 : vector<8x32xf32>
    %c0_157 = arith.constant 0 : index
    %c0_158 = arith.constant 0 : index
    %176 = vector.load %arg8[%c0_157, %c0_158] : memref<1x32xf32, #tpu.memory_space<vmem>>, vector<1x32xf32>
    %177 = vector.broadcast %176 : vector<1x32xf32> to vector<8x32xf32>
    %178 = arith.addf %175, %177 : vector<8x32xf32>
    %179 = arith.addf %1, %178 : vector<8x32xf32>
    %c0_159 = arith.constant 0 : index
    %c0_160 = arith.constant 0 : index
    %c0_161 = arith.constant 0 : index
    %180 = vector.load %arg17[%c0_159, %c0_160, %c0_161] : memref<3x1x32xf32, #tpu.memory_space<vmem>>, vector<1x1x32xf32>
    %181 = vector.shape_cast %180 : vector<1x1x32xf32> to vector<1x32xf32>
    %c0_162 = arith.constant 0 : index
    %c0_163 = arith.constant 0 : index
    %c0_164 = arith.constant 0 : index
    %182 = vector.load %arg18[%c0_162, %c0_163, %c0_164] : memref<3x1x32xf32, #tpu.memory_space<vmem>>, vector<1x1x32xf32>
    %183 = vector.shape_cast %182 : vector<1x1x32xf32> to vector<1x32xf32>
    %cst_165 = arith.constant dense<0.000000e+00> : vector<8xf32>
    %184 = vector.multi_reduction <add>, %179, %cst_165 [1] : vector<8x32xf32> to vector<8xf32>
    %185 = vector.shape_cast %184 : vector<8xf32> to vector<8x1xf32>
    %cst_166 = arith.constant 3.200000e+01 : f32
    %186 = vector.broadcast %cst_166 : f32 to vector<8x1xf32>
    %187 = arith.divf %185, %186 : vector<8x1xf32>
    %188 = vector.broadcast %187 : vector<8x1xf32> to vector<8x32xf32>
    %189 = arith.subf %179, %188 : vector<8x32xf32>
    %190 = arith.mulf %189, %189 : vector<8x32xf32>
    %cst_167 = arith.constant dense<0.000000e+00> : vector<8xf32>
    %191 = vector.multi_reduction <add>, %190, %cst_167 [1] : vector<8x32xf32> to vector<8xf32>
    %192 = vector.shape_cast %191 : vector<8xf32> to vector<8x1xf32>
    %cst_168 = arith.constant 3.200000e+01 : f32
    %193 = vector.broadcast %cst_168 : f32 to vector<8x1xf32>
    %194 = arith.divf %192, %193 : vector<8x1xf32>
    %195 = vector.broadcast %187 : vector<8x1xf32> to vector<8x32xf32>
    %196 = arith.subf %179, %195 : vector<8x32xf32>
    %cst_169 = arith.constant 9.99999974E-6 : f32
    %197 = vector.broadcast %cst_169 : f32 to vector<8x1xf32>
    %198 = arith.addf %194, %197 : vector<8x1xf32>
    %199 = math.rsqrt %198 : vector<8x1xf32>
    %200 = vector.broadcast %199 : vector<8x1xf32> to vector<8x32xf32>
    %201 = arith.mulf %196, %200 : vector<8x32xf32>
    %202 = vector.broadcast %181 : vector<1x32xf32> to vector<8x32xf32>
    %203 = arith.mulf %201, %202 : vector<8x32xf32>
    %204 = vector.broadcast %183 : vector<1x32xf32> to vector<8x32xf32>
    %205 = arith.addf %203, %204 : vector<8x32xf32>
    %c0_170 = arith.constant 0 : index
    %c0_171 = arith.constant 0 : index
    %c0_172 = arith.constant 0 : index
    %c0_173 = arith.constant 0 : index
    %206 = vector.load %arg9[%c0_170, %c0_171, %c0_172, %c0_173] : memref<3x4x32x8xf32, #tpu.memory_space<vmem>>, vector<1x1x32x8xf32>
    %207 = vector.shape_cast %206 : vector<1x1x32x8xf32> to vector<32x8xf32>
    %cst_174 = arith.constant dense<0.000000e+00> : vector<8x8xf32>
    %208 = tpu.matmul %205, %207, %cst_174 {dimension_numbers = #tpu.dot_dimension_numbers<[1], [0], [0], [1], [0, 0, 1, 1], [], []>} : vector<8x32xf32>, vector<32x8xf32>, vector<8x8xf32> -> vector<8x8xf32>
    %c0_175 = arith.constant 0 : index
    %c0_176 = arith.constant 0 : index
    %c0_177 = arith.constant 0 : index
    %c0_178 = arith.constant 0 : index
    %209 = vector.load %arg10[%c0_175, %c0_176, %c0_177, %c0_178] : memref<3x4x1x8xf32, #tpu.memory_space<vmem>>, vector<1x1x1x8xf32>
    %210 = vector.shape_cast %209 : vector<1x1x1x8xf32> to vector<1x8xf32>
    %211 = vector.broadcast %210 : vector<1x8xf32> to vector<8x8xf32>
    %212 = arith.addf %208, %211 : vector<8x8xf32>
    %c1_179 = arith.constant 1 : index
    %c0_180 = arith.constant 0 : index
    %c0_181 = arith.constant 0 : index
    %c0_182 = arith.constant 0 : index
    %213 = vector.load %arg9[%c1_179, %c0_180, %c0_181, %c0_182] : memref<3x4x32x8xf32, #tpu.memory_space<vmem>>, vector<1x1x32x8xf32>
    %214 = vector.shape_cast %213 : vector<1x1x32x8xf32> to vector<32x8xf32>
    %cst_183 = arith.constant dense<0.000000e+00> : vector<8x8xf32>
    %215 = tpu.matmul %3, %214, %cst_183 {dimension_numbers = #tpu.dot_dimension_numbers<[1], [0], [0], [1], [0, 0, 1, 1], [], []>} : vector<8x32xf32>, vector<32x8xf32>, vector<8x8xf32> -> vector<8x8xf32>
    %c1_184 = arith.constant 1 : index
    %c0_185 = arith.constant 0 : index
    %c0_186 = arith.constant 0 : index
    %c0_187 = arith.constant 0 : index
    %216 = vector.load %arg10[%c1_184, %c0_185, %c0_186, %c0_187] : memref<3x4x1x8xf32, #tpu.memory_space<vmem>>, vector<1x1x1x8xf32>
    %217 = vector.shape_cast %216 : vector<1x1x1x8xf32> to vector<1x8xf32>
    %218 = vector.broadcast %217 : vector<1x8xf32> to vector<8x8xf32>
    %219 = arith.addf %215, %218 : vector<8x8xf32>
    %c2_188 = arith.constant 2 : index
    %c0_189 = arith.constant 0 : index
    %c0_190 = arith.constant 0 : index
    %c0_191 = arith.constant 0 : index
    %220 = vector.load %arg9[%c2_188, %c0_189, %c0_190, %c0_191] : memref<3x4x32x8xf32, #tpu.memory_space<vmem>>, vector<1x1x32x8xf32>
    %221 = vector.shape_cast %220 : vector<1x1x32x8xf32> to vector<32x8xf32>
    %cst_192 = arith.constant dense<0.000000e+00> : vector<8x8xf32>
    %222 = tpu.matmul %3, %221, %cst_192 {dimension_numbers = #tpu.dot_dimension_numbers<[1], [0], [0], [1], [0, 0, 1, 1], [], []>} : vector<8x32xf32>, vector<32x8xf32>, vector<8x8xf32> -> vector<8x8xf32>
    %c2_193 = arith.constant 2 : index
    %c0_194 = arith.constant 0 : index
    %c0_195 = arith.constant 0 : index
    %c0_196 = arith.constant 0 : index
    %223 = vector.load %arg10[%c2_193, %c0_194, %c0_195, %c0_196] : memref<3x4x1x8xf32, #tpu.memory_space<vmem>>, vector<1x1x1x8xf32>
    %224 = vector.shape_cast %223 : vector<1x1x1x8xf32> to vector<1x8xf32>
    %225 = vector.broadcast %224 : vector<1x8xf32> to vector<8x8xf32>
    %226 = arith.addf %222, %225 : vector<8x8xf32>
    %cst_197 = arith.constant dense<0.000000e+00> : vector<8x8xf32>
    %227 = tpu.matmul %212, %219, %cst_197 {dimension_numbers = #tpu.dot_dimension_numbers<[1], [1], [0], [0], [0, 0, 1, 0], [], []>} : vector<8x8xf32>, vector<8x8xf32>, vector<8x8xf32> -> vector<8x8xf32>
    %cst_198 = arith.constant 0.353553385 : f32
    %228 = vector.broadcast %cst_198 : f32 to vector<8x8xf32>
    %229 = arith.mulf %227, %228 : vector<8x8xf32>
    %cst_199 = arith.constant -1.000000e+09 : f32
    %230 = vector.shape_cast %11 : vector<1x8xi1> to vector<1x8xi1>
    %231 = vector.broadcast %230 : vector<1x8xi1> to vector<8x8xi1>
    %232 = vector.broadcast %cst_199 : f32 to vector<8x8xf32>
    %233 = arith.select %231, %229, %232 : vector<8x8xi1>, vector<8x8xf32>
    %cst_200 = arith.constant dense<0xFF800000> : vector<8xf32>
    %234 = vector.multi_reduction <maximumf>, %233, %cst_200 [1] : vector<8x8xf32> to vector<8xf32>
    %235 = vector.shape_cast %234 : vector<8xf32> to vector<8x1xf32>
    %236 = vector.broadcast %235 : vector<8x1xf32> to vector<8x8xf32>
    %237 = arith.subf %233, %236 : vector<8x8xf32>
    %238 = math.exp %237 : vector<8x8xf32>
    %cst_201 = arith.constant dense<0.000000e+00> : vector<8xf32>
    %239 = vector.multi_reduction <add>, %238, %cst_201 [1] : vector<8x8xf32> to vector<8xf32>
    %240 = vector.shape_cast %239 : vector<8xf32> to vector<8x1xf32>
    %241 = vector.broadcast %240 : vector<8x1xf32> to vector<8x8xf32>
    %242 = arith.divf %238, %241 : vector<8x8xf32>
    %cst_202 = arith.constant dense<0.000000e+00> : vector<8x8xf32>
    %243 = tpu.matmul %242, %226, %cst_202 {dimension_numbers = #tpu.dot_dimension_numbers<[1], [0], [0], [1], [0, 0, 1, 1], [], []>} : vector<8x8xf32>, vector<8x8xf32>, vector<8x8xf32> -> vector<8x8xf32>
    %c0_203 = arith.constant 0 : index
    %c0_204 = arith.constant 0 : index
    %c0_205 = arith.constant 0 : index
    %244 = vector.load %arg11[%c0_203, %c0_204, %c0_205] : memref<4x8x32xf32, #tpu.memory_space<vmem>>, vector<1x8x32xf32>
    %245 = vector.shape_cast %244 : vector<1x8x32xf32> to vector<8x32xf32>
    %cst_206 = arith.constant dense<0.000000e+00> : vector<8x32xf32>
    %246 = tpu.matmul %243, %245, %cst_206 {dimension_numbers = #tpu.dot_dimension_numbers<[1], [0], [0], [1], [0, 0, 1, 1], [], []>} : vector<8x8xf32>, vector<8x32xf32>, vector<8x32xf32> -> vector<8x32xf32>
    %c0_207 = arith.constant 0 : index
    %c1_208 = arith.constant 1 : index
    %c0_209 = arith.constant 0 : index
    %c0_210 = arith.constant 0 : index
    %247 = vector.load %arg9[%c0_207, %c1_208, %c0_209, %c0_210] : memref<3x4x32x8xf32, #tpu.memory_space<vmem>>, vector<1x1x32x8xf32>
    %248 = vector.shape_cast %247 : vector<1x1x32x8xf32> to vector<32x8xf32>
    %cst_211 = arith.constant dense<0.000000e+00> : vector<8x8xf32>
    %249 = tpu.matmul %205, %248, %cst_211 {dimension_numbers = #tpu.dot_dimension_numbers<[1], [0], [0], [1], [0, 0, 1, 1], [], []>} : vector<8x32xf32>, vector<32x8xf32>, vector<8x8xf32> -> vector<8x8xf32>
    %c0_212 = arith.constant 0 : index
    %c1_213 = arith.constant 1 : index
    %c0_214 = arith.constant 0 : index
    %c0_215 = arith.constant 0 : index
    %250 = vector.load %arg10[%c0_212, %c1_213, %c0_214, %c0_215] : memref<3x4x1x8xf32, #tpu.memory_space<vmem>>, vector<1x1x1x8xf32>
    %251 = vector.shape_cast %250 : vector<1x1x1x8xf32> to vector<1x8xf32>
    %252 = vector.broadcast %251 : vector<1x8xf32> to vector<8x8xf32>
    %253 = arith.addf %249, %252 : vector<8x8xf32>
    %c1_216 = arith.constant 1 : index
    %c1_217 = arith.constant 1 : index
    %c0_218 = arith.constant 0 : index
    %c0_219 = arith.constant 0 : index
    %254 = vector.load %arg9[%c1_216, %c1_217, %c0_218, %c0_219] : memref<3x4x32x8xf32, #tpu.memory_space<vmem>>, vector<1x1x32x8xf32>
    %255 = vector.shape_cast %254 : vector<1x1x32x8xf32> to vector<32x8xf32>
    %cst_220 = arith.constant dense<0.000000e+00> : vector<8x8xf32>
    %256 = tpu.matmul %3, %255, %cst_220 {dimension_numbers = #tpu.dot_dimension_numbers<[1], [0], [0], [1], [0, 0, 1, 1], [], []>} : vector<8x32xf32>, vector<32x8xf32>, vector<8x8xf32> -> vector<8x8xf32>
    %c1_221 = arith.constant 1 : index
    %c1_222 = arith.constant 1 : index
    %c0_223 = arith.constant 0 : index
    %c0_224 = arith.constant 0 : index
    %257 = vector.load %arg10[%c1_221, %c1_222, %c0_223, %c0_224] : memref<3x4x1x8xf32, #tpu.memory_space<vmem>>, vector<1x1x1x8xf32>
    %258 = vector.shape_cast %257 : vector<1x1x1x8xf32> to vector<1x8xf32>
    %259 = vector.broadcast %258 : vector<1x8xf32> to vector<8x8xf32>
    %260 = arith.addf %256, %259 : vector<8x8xf32>
    %c2_225 = arith.constant 2 : index
    %c1_226 = arith.constant 1 : index
    %c0_227 = arith.constant 0 : index
    %c0_228 = arith.constant 0 : index
    %261 = vector.load %arg9[%c2_225, %c1_226, %c0_227, %c0_228] : memref<3x4x32x8xf32, #tpu.memory_space<vmem>>, vector<1x1x32x8xf32>
    %262 = vector.shape_cast %261 : vector<1x1x32x8xf32> to vector<32x8xf32>
    %cst_229 = arith.constant dense<0.000000e+00> : vector<8x8xf32>
    %263 = tpu.matmul %3, %262, %cst_229 {dimension_numbers = #tpu.dot_dimension_numbers<[1], [0], [0], [1], [0, 0, 1, 1], [], []>} : vector<8x32xf32>, vector<32x8xf32>, vector<8x8xf32> -> vector<8x8xf32>
    %c2_230 = arith.constant 2 : index
    %c1_231 = arith.constant 1 : index
    %c0_232 = arith.constant 0 : index
    %c0_233 = arith.constant 0 : index
    %264 = vector.load %arg10[%c2_230, %c1_231, %c0_232, %c0_233] : memref<3x4x1x8xf32, #tpu.memory_space<vmem>>, vector<1x1x1x8xf32>
    %265 = vector.shape_cast %264 : vector<1x1x1x8xf32> to vector<1x8xf32>
    %266 = vector.broadcast %265 : vector<1x8xf32> to vector<8x8xf32>
    %267 = arith.addf %263, %266 : vector<8x8xf32>
    %cst_234 = arith.constant dense<0.000000e+00> : vector<8x8xf32>
    %268 = tpu.matmul %253, %260, %cst_234 {dimension_numbers = #tpu.dot_dimension_numbers<[1], [1], [0], [0], [0, 0, 1, 0], [], []>} : vector<8x8xf32>, vector<8x8xf32>, vector<8x8xf32> -> vector<8x8xf32>
    %cst_235 = arith.constant 0.353553385 : f32
    %269 = vector.broadcast %cst_235 : f32 to vector<8x8xf32>
    %270 = arith.mulf %268, %269 : vector<8x8xf32>
    %cst_236 = arith.constant -1.000000e+09 : f32
    %271 = vector.shape_cast %11 : vector<1x8xi1> to vector<1x8xi1>
    %272 = vector.broadcast %271 : vector<1x8xi1> to vector<8x8xi1>
    %273 = vector.broadcast %cst_236 : f32 to vector<8x8xf32>
    %274 = arith.select %272, %270, %273 : vector<8x8xi1>, vector<8x8xf32>
    %cst_237 = arith.constant dense<0xFF800000> : vector<8xf32>
    %275 = vector.multi_reduction <maximumf>, %274, %cst_237 [1] : vector<8x8xf32> to vector<8xf32>
    %276 = vector.shape_cast %275 : vector<8xf32> to vector<8x1xf32>
    %277 = vector.broadcast %276 : vector<8x1xf32> to vector<8x8xf32>
    %278 = arith.subf %274, %277 : vector<8x8xf32>
    %279 = math.exp %278 : vector<8x8xf32>
    %cst_238 = arith.constant dense<0.000000e+00> : vector<8xf32>
    %280 = vector.multi_reduction <add>, %279, %cst_238 [1] : vector<8x8xf32> to vector<8xf32>
    %281 = vector.shape_cast %280 : vector<8xf32> to vector<8x1xf32>
    %282 = vector.broadcast %281 : vector<8x1xf32> to vector<8x8xf32>
    %283 = arith.divf %279, %282 : vector<8x8xf32>
    %cst_239 = arith.constant dense<0.000000e+00> : vector<8x8xf32>
    %284 = tpu.matmul %283, %267, %cst_239 {dimension_numbers = #tpu.dot_dimension_numbers<[1], [0], [0], [1], [0, 0, 1, 1], [], []>} : vector<8x8xf32>, vector<8x8xf32>, vector<8x8xf32> -> vector<8x8xf32>
    %c1_240 = arith.constant 1 : index
    %c0_241 = arith.constant 0 : index
    %c0_242 = arith.constant 0 : index
    %285 = vector.load %arg11[%c1_240, %c0_241, %c0_242] : memref<4x8x32xf32, #tpu.memory_space<vmem>>, vector<1x8x32xf32>
    %286 = vector.shape_cast %285 : vector<1x8x32xf32> to vector<8x32xf32>
    %cst_243 = arith.constant dense<0.000000e+00> : vector<8x32xf32>
    %287 = tpu.matmul %284, %286, %cst_243 {dimension_numbers = #tpu.dot_dimension_numbers<[1], [0], [0], [1], [0, 0, 1, 1], [], []>} : vector<8x8xf32>, vector<8x32xf32>, vector<8x32xf32> -> vector<8x32xf32>
    %288 = arith.addf %246, %287 : vector<8x32xf32>
    %c0_244 = arith.constant 0 : index
    %c2_245 = arith.constant 2 : index
    %c0_246 = arith.constant 0 : index
    %c0_247 = arith.constant 0 : index
    %289 = vector.load %arg9[%c0_244, %c2_245, %c0_246, %c0_247] : memref<3x4x32x8xf32, #tpu.memory_space<vmem>>, vector<1x1x32x8xf32>
    %290 = vector.shape_cast %289 : vector<1x1x32x8xf32> to vector<32x8xf32>
    %cst_248 = arith.constant dense<0.000000e+00> : vector<8x8xf32>
    %291 = tpu.matmul %205, %290, %cst_248 {dimension_numbers = #tpu.dot_dimension_numbers<[1], [0], [0], [1], [0, 0, 1, 1], [], []>} : vector<8x32xf32>, vector<32x8xf32>, vector<8x8xf32> -> vector<8x8xf32>
    %c0_249 = arith.constant 0 : index
    %c2_250 = arith.constant 2 : index
    %c0_251 = arith.constant 0 : index
    %c0_252 = arith.constant 0 : index
    %292 = vector.load %arg10[%c0_249, %c2_250, %c0_251, %c0_252] : memref<3x4x1x8xf32, #tpu.memory_space<vmem>>, vector<1x1x1x8xf32>
    %293 = vector.shape_cast %292 : vector<1x1x1x8xf32> to vector<1x8xf32>
    %294 = vector.broadcast %293 : vector<1x8xf32> to vector<8x8xf32>
    %295 = arith.addf %291, %294 : vector<8x8xf32>
    %c1_253 = arith.constant 1 : index
    %c2_254 = arith.constant 2 : index
    %c0_255 = arith.constant 0 : index
    %c0_256 = arith.constant 0 : index
    %296 = vector.load %arg9[%c1_253, %c2_254, %c0_255, %c0_256] : memref<3x4x32x8xf32, #tpu.memory_space<vmem>>, vector<1x1x32x8xf32>
    %297 = vector.shape_cast %296 : vector<1x1x32x8xf32> to vector<32x8xf32>
    %cst_257 = arith.constant dense<0.000000e+00> : vector<8x8xf32>
    %298 = tpu.matmul %3, %297, %cst_257 {dimension_numbers = #tpu.dot_dimension_numbers<[1], [0], [0], [1], [0, 0, 1, 1], [], []>} : vector<8x32xf32>, vector<32x8xf32>, vector<8x8xf32> -> vector<8x8xf32>
    %c1_258 = arith.constant 1 : index
    %c2_259 = arith.constant 2 : index
    %c0_260 = arith.constant 0 : index
    %c0_261 = arith.constant 0 : index
    %299 = vector.load %arg10[%c1_258, %c2_259, %c0_260, %c0_261] : memref<3x4x1x8xf32, #tpu.memory_space<vmem>>, vector<1x1x1x8xf32>
    %300 = vector.shape_cast %299 : vector<1x1x1x8xf32> to vector<1x8xf32>
    %301 = vector.broadcast %300 : vector<1x8xf32> to vector<8x8xf32>
    %302 = arith.addf %298, %301 : vector<8x8xf32>
    %c2_262 = arith.constant 2 : index
    %c2_263 = arith.constant 2 : index
    %c0_264 = arith.constant 0 : index
    %c0_265 = arith.constant 0 : index
    %303 = vector.load %arg9[%c2_262, %c2_263, %c0_264, %c0_265] : memref<3x4x32x8xf32, #tpu.memory_space<vmem>>, vector<1x1x32x8xf32>
    %304 = vector.shape_cast %303 : vector<1x1x32x8xf32> to vector<32x8xf32>
    %cst_266 = arith.constant dense<0.000000e+00> : vector<8x8xf32>
    %305 = tpu.matmul %3, %304, %cst_266 {dimension_numbers = #tpu.dot_dimension_numbers<[1], [0], [0], [1], [0, 0, 1, 1], [], []>} : vector<8x32xf32>, vector<32x8xf32>, vector<8x8xf32> -> vector<8x8xf32>
    %c2_267 = arith.constant 2 : index
    %c2_268 = arith.constant 2 : index
    %c0_269 = arith.constant 0 : index
    %c0_270 = arith.constant 0 : index
    %306 = vector.load %arg10[%c2_267, %c2_268, %c0_269, %c0_270] : memref<3x4x1x8xf32, #tpu.memory_space<vmem>>, vector<1x1x1x8xf32>
    %307 = vector.shape_cast %306 : vector<1x1x1x8xf32> to vector<1x8xf32>
    %308 = vector.broadcast %307 : vector<1x8xf32> to vector<8x8xf32>
    %309 = arith.addf %305, %308 : vector<8x8xf32>
    %cst_271 = arith.constant dense<0.000000e+00> : vector<8x8xf32>
    %310 = tpu.matmul %295, %302, %cst_271 {dimension_numbers = #tpu.dot_dimension_numbers<[1], [1], [0], [0], [0, 0, 1, 0], [], []>} : vector<8x8xf32>, vector<8x8xf32>, vector<8x8xf32> -> vector<8x8xf32>
    %cst_272 = arith.constant 0.353553385 : f32
    %311 = vector.broadcast %cst_272 : f32 to vector<8x8xf32>
    %312 = arith.mulf %310, %311 : vector<8x8xf32>
    %cst_273 = arith.constant -1.000000e+09 : f32
    %313 = vector.shape_cast %11 : vector<1x8xi1> to vector<1x8xi1>
    %314 = vector.broadcast %313 : vector<1x8xi1> to vector<8x8xi1>
    %315 = vector.broadcast %cst_273 : f32 to vector<8x8xf32>
    %316 = arith.select %314, %312, %315 : vector<8x8xi1>, vector<8x8xf32>
    %cst_274 = arith.constant dense<0xFF800000> : vector<8xf32>
    %317 = vector.multi_reduction <maximumf>, %316, %cst_274 [1] : vector<8x8xf32> to vector<8xf32>
    %318 = vector.shape_cast %317 : vector<8xf32> to vector<8x1xf32>
    %319 = vector.broadcast %318 : vector<8x1xf32> to vector<8x8xf32>
    %320 = arith.subf %316, %319 : vector<8x8xf32>
    %321 = math.exp %320 : vector<8x8xf32>
    %cst_275 = arith.constant dense<0.000000e+00> : vector<8xf32>
    %322 = vector.multi_reduction <add>, %321, %cst_275 [1] : vector<8x8xf32> to vector<8xf32>
    %323 = vector.shape_cast %322 : vector<8xf32> to vector<8x1xf32>
    %324 = vector.broadcast %323 : vector<8x1xf32> to vector<8x8xf32>
    %325 = arith.divf %321, %324 : vector<8x8xf32>
    %cst_276 = arith.constant dense<0.000000e+00> : vector<8x8xf32>
    %326 = tpu.matmul %325, %309, %cst_276 {dimension_numbers = #tpu.dot_dimension_numbers<[1], [0], [0], [1], [0, 0, 1, 1], [], []>} : vector<8x8xf32>, vector<8x8xf32>, vector<8x8xf32> -> vector<8x8xf32>
    %c2_277 = arith.constant 2 : index
    %c0_278 = arith.constant 0 : index
    %c0_279 = arith.constant 0 : index
    %327 = vector.load %arg11[%c2_277, %c0_278, %c0_279] : memref<4x8x32xf32, #tpu.memory_space<vmem>>, vector<1x8x32xf32>
    %328 = vector.shape_cast %327 : vector<1x8x32xf32> to vector<8x32xf32>
    %cst_280 = arith.constant dense<0.000000e+00> : vector<8x32xf32>
    %329 = tpu.matmul %326, %328, %cst_280 {dimension_numbers = #tpu.dot_dimension_numbers<[1], [0], [0], [1], [0, 0, 1, 1], [], []>} : vector<8x8xf32>, vector<8x32xf32>, vector<8x32xf32> -> vector<8x32xf32>
    %330 = arith.addf %288, %329 : vector<8x32xf32>
    %c0_281 = arith.constant 0 : index
    %c3_282 = arith.constant 3 : index
    %c0_283 = arith.constant 0 : index
    %c0_284 = arith.constant 0 : index
    %331 = vector.load %arg9[%c0_281, %c3_282, %c0_283, %c0_284] : memref<3x4x32x8xf32, #tpu.memory_space<vmem>>, vector<1x1x32x8xf32>
    %332 = vector.shape_cast %331 : vector<1x1x32x8xf32> to vector<32x8xf32>
    %cst_285 = arith.constant dense<0.000000e+00> : vector<8x8xf32>
    %333 = tpu.matmul %205, %332, %cst_285 {dimension_numbers = #tpu.dot_dimension_numbers<[1], [0], [0], [1], [0, 0, 1, 1], [], []>} : vector<8x32xf32>, vector<32x8xf32>, vector<8x8xf32> -> vector<8x8xf32>
    %c0_286 = arith.constant 0 : index
    %c3_287 = arith.constant 3 : index
    %c0_288 = arith.constant 0 : index
    %c0_289 = arith.constant 0 : index
    %334 = vector.load %arg10[%c0_286, %c3_287, %c0_288, %c0_289] : memref<3x4x1x8xf32, #tpu.memory_space<vmem>>, vector<1x1x1x8xf32>
    %335 = vector.shape_cast %334 : vector<1x1x1x8xf32> to vector<1x8xf32>
    %336 = vector.broadcast %335 : vector<1x8xf32> to vector<8x8xf32>
    %337 = arith.addf %333, %336 : vector<8x8xf32>
    %c1_290 = arith.constant 1 : index
    %c3_291 = arith.constant 3 : index
    %c0_292 = arith.constant 0 : index
    %c0_293 = arith.constant 0 : index
    %338 = vector.load %arg9[%c1_290, %c3_291, %c0_292, %c0_293] : memref<3x4x32x8xf32, #tpu.memory_space<vmem>>, vector<1x1x32x8xf32>
    %339 = vector.shape_cast %338 : vector<1x1x32x8xf32> to vector<32x8xf32>
    %cst_294 = arith.constant dense<0.000000e+00> : vector<8x8xf32>
    %340 = tpu.matmul %3, %339, %cst_294 {dimension_numbers = #tpu.dot_dimension_numbers<[1], [0], [0], [1], [0, 0, 1, 1], [], []>} : vector<8x32xf32>, vector<32x8xf32>, vector<8x8xf32> -> vector<8x8xf32>
    %c1_295 = arith.constant 1 : index
    %c3_296 = arith.constant 3 : index
    %c0_297 = arith.constant 0 : index
    %c0_298 = arith.constant 0 : index
    %341 = vector.load %arg10[%c1_295, %c3_296, %c0_297, %c0_298] : memref<3x4x1x8xf32, #tpu.memory_space<vmem>>, vector<1x1x1x8xf32>
    %342 = vector.shape_cast %341 : vector<1x1x1x8xf32> to vector<1x8xf32>
    %343 = vector.broadcast %342 : vector<1x8xf32> to vector<8x8xf32>
    %344 = arith.addf %340, %343 : vector<8x8xf32>
    %c2_299 = arith.constant 2 : index
    %c3_300 = arith.constant 3 : index
    %c0_301 = arith.constant 0 : index
    %c0_302 = arith.constant 0 : index
    %345 = vector.load %arg9[%c2_299, %c3_300, %c0_301, %c0_302] : memref<3x4x32x8xf32, #tpu.memory_space<vmem>>, vector<1x1x32x8xf32>
    %346 = vector.shape_cast %345 : vector<1x1x32x8xf32> to vector<32x8xf32>
    %cst_303 = arith.constant dense<0.000000e+00> : vector<8x8xf32>
    %347 = tpu.matmul %3, %346, %cst_303 {dimension_numbers = #tpu.dot_dimension_numbers<[1], [0], [0], [1], [0, 0, 1, 1], [], []>} : vector<8x32xf32>, vector<32x8xf32>, vector<8x8xf32> -> vector<8x8xf32>
    %c2_304 = arith.constant 2 : index
    %c3_305 = arith.constant 3 : index
    %c0_306 = arith.constant 0 : index
    %c0_307 = arith.constant 0 : index
    %348 = vector.load %arg10[%c2_304, %c3_305, %c0_306, %c0_307] : memref<3x4x1x8xf32, #tpu.memory_space<vmem>>, vector<1x1x1x8xf32>
    %349 = vector.shape_cast %348 : vector<1x1x1x8xf32> to vector<1x8xf32>
    %350 = vector.broadcast %349 : vector<1x8xf32> to vector<8x8xf32>
    %351 = arith.addf %347, %350 : vector<8x8xf32>
    %cst_308 = arith.constant dense<0.000000e+00> : vector<8x8xf32>
    %352 = tpu.matmul %337, %344, %cst_308 {dimension_numbers = #tpu.dot_dimension_numbers<[1], [1], [0], [0], [0, 0, 1, 0], [], []>} : vector<8x8xf32>, vector<8x8xf32>, vector<8x8xf32> -> vector<8x8xf32>
    %cst_309 = arith.constant 0.353553385 : f32
    %353 = vector.broadcast %cst_309 : f32 to vector<8x8xf32>
    %354 = arith.mulf %352, %353 : vector<8x8xf32>
    %cst_310 = arith.constant -1.000000e+09 : f32
    %355 = vector.shape_cast %11 : vector<1x8xi1> to vector<1x8xi1>
    %356 = vector.broadcast %355 : vector<1x8xi1> to vector<8x8xi1>
    %357 = vector.broadcast %cst_310 : f32 to vector<8x8xf32>
    %358 = arith.select %356, %354, %357 : vector<8x8xi1>, vector<8x8xf32>
    %cst_311 = arith.constant dense<0xFF800000> : vector<8xf32>
    %359 = vector.multi_reduction <maximumf>, %358, %cst_311 [1] : vector<8x8xf32> to vector<8xf32>
    %360 = vector.shape_cast %359 : vector<8xf32> to vector<8x1xf32>
    %361 = vector.broadcast %360 : vector<8x1xf32> to vector<8x8xf32>
    %362 = arith.subf %358, %361 : vector<8x8xf32>
    %363 = math.exp %362 : vector<8x8xf32>
    %cst_312 = arith.constant dense<0.000000e+00> : vector<8xf32>
    %364 = vector.multi_reduction <add>, %363, %cst_312 [1] : vector<8x8xf32> to vector<8xf32>
    %365 = vector.shape_cast %364 : vector<8xf32> to vector<8x1xf32>
    %366 = vector.broadcast %365 : vector<8x1xf32> to vector<8x8xf32>
    %367 = arith.divf %363, %366 : vector<8x8xf32>
    %cst_313 = arith.constant dense<0.000000e+00> : vector<8x8xf32>
    %368 = tpu.matmul %367, %351, %cst_313 {dimension_numbers = #tpu.dot_dimension_numbers<[1], [0], [0], [1], [0, 0, 1, 1], [], []>} : vector<8x8xf32>, vector<8x8xf32>, vector<8x8xf32> -> vector<8x8xf32>
    %c3_314 = arith.constant 3 : index
    %c0_315 = arith.constant 0 : index
    %c0_316 = arith.constant 0 : index
    %369 = vector.load %arg11[%c3_314, %c0_315, %c0_316] : memref<4x8x32xf32, #tpu.memory_space<vmem>>, vector<1x8x32xf32>
    %370 = vector.shape_cast %369 : vector<1x8x32xf32> to vector<8x32xf32>
    %cst_317 = arith.constant dense<0.000000e+00> : vector<8x32xf32>
    %371 = tpu.matmul %368, %370, %cst_317 {dimension_numbers = #tpu.dot_dimension_numbers<[1], [0], [0], [1], [0, 0, 1, 1], [], []>} : vector<8x8xf32>, vector<8x32xf32>, vector<8x32xf32> -> vector<8x32xf32>
    %372 = arith.addf %330, %371 : vector<8x32xf32>
    %c0_318 = arith.constant 0 : index
    %c0_319 = arith.constant 0 : index
    %373 = vector.load %arg12[%c0_318, %c0_319] : memref<1x32xf32, #tpu.memory_space<vmem>>, vector<1x32xf32>
    %374 = vector.broadcast %373 : vector<1x32xf32> to vector<8x32xf32>
    %375 = arith.addf %372, %374 : vector<8x32xf32>
    %376 = arith.addf %205, %375 : vector<8x32xf32>
    %c1_320 = arith.constant 1 : index
    %c0_321 = arith.constant 0 : index
    %c0_322 = arith.constant 0 : index
    %377 = vector.load %arg17[%c1_320, %c0_321, %c0_322] : memref<3x1x32xf32, #tpu.memory_space<vmem>>, vector<1x1x32xf32>
    %378 = vector.shape_cast %377 : vector<1x1x32xf32> to vector<1x32xf32>
    %c1_323 = arith.constant 1 : index
    %c0_324 = arith.constant 0 : index
    %c0_325 = arith.constant 0 : index
    %379 = vector.load %arg18[%c1_323, %c0_324, %c0_325] : memref<3x1x32xf32, #tpu.memory_space<vmem>>, vector<1x1x32xf32>
    %380 = vector.shape_cast %379 : vector<1x1x32xf32> to vector<1x32xf32>
    %cst_326 = arith.constant dense<0.000000e+00> : vector<8xf32>
    %381 = vector.multi_reduction <add>, %376, %cst_326 [1] : vector<8x32xf32> to vector<8xf32>
    %382 = vector.shape_cast %381 : vector<8xf32> to vector<8x1xf32>
    %cst_327 = arith.constant 3.200000e+01 : f32
    %383 = vector.broadcast %cst_327 : f32 to vector<8x1xf32>
    %384 = arith.divf %382, %383 : vector<8x1xf32>
    %385 = vector.broadcast %384 : vector<8x1xf32> to vector<8x32xf32>
    %386 = arith.subf %376, %385 : vector<8x32xf32>
    %387 = arith.mulf %386, %386 : vector<8x32xf32>
    %cst_328 = arith.constant dense<0.000000e+00> : vector<8xf32>
    %388 = vector.multi_reduction <add>, %387, %cst_328 [1] : vector<8x32xf32> to vector<8xf32>
    %389 = vector.shape_cast %388 : vector<8xf32> to vector<8x1xf32>
    %cst_329 = arith.constant 3.200000e+01 : f32
    %390 = vector.broadcast %cst_329 : f32 to vector<8x1xf32>
    %391 = arith.divf %389, %390 : vector<8x1xf32>
    %392 = vector.broadcast %384 : vector<8x1xf32> to vector<8x32xf32>
    %393 = arith.subf %376, %392 : vector<8x32xf32>
    %cst_330 = arith.constant 9.99999974E-6 : f32
    %394 = vector.broadcast %cst_330 : f32 to vector<8x1xf32>
    %395 = arith.addf %391, %394 : vector<8x1xf32>
    %396 = math.rsqrt %395 : vector<8x1xf32>
    %397 = vector.broadcast %396 : vector<8x1xf32> to vector<8x32xf32>
    %398 = arith.mulf %393, %397 : vector<8x32xf32>
    %399 = vector.broadcast %378 : vector<1x32xf32> to vector<8x32xf32>
    %400 = arith.mulf %398, %399 : vector<8x32xf32>
    %401 = vector.broadcast %380 : vector<1x32xf32> to vector<8x32xf32>
    %402 = arith.addf %400, %401 : vector<8x32xf32>
    %c0_331 = arith.constant 0 : index
    %c0_332 = arith.constant 0 : index
    %403 = vector.load %arg13[%c0_331, %c0_332] : memref<32x64xf32, #tpu.memory_space<vmem>>, vector<32x64xf32>
    %cst_333 = arith.constant dense<0.000000e+00> : vector<8x64xf32>
    %404 = tpu.matmul %402, %403, %cst_333 {dimension_numbers = #tpu.dot_dimension_numbers<[1], [0], [0], [1], [0, 0, 1, 1], [], []>} : vector<8x32xf32>, vector<32x64xf32>, vector<8x64xf32> -> vector<8x64xf32>
    %c0_334 = arith.constant 0 : index
    %c0_335 = arith.constant 0 : index
    %405 = vector.load %arg14[%c0_334, %c0_335] : memref<1x64xf32, #tpu.memory_space<vmem>>, vector<1x64xf32>
    %406 = vector.broadcast %405 : vector<1x64xf32> to vector<8x64xf32>
    %407 = arith.addf %404, %406 : vector<8x64xf32>
    %cst_336 = arith.constant 0.000000e+00 : f32
    %408 = vector.broadcast %cst_336 : f32 to vector<8x64xf32>
    %409 = arith.maximumf %407, %408 : vector<8x64xf32>
    %c0_337 = arith.constant 0 : index
    %c0_338 = arith.constant 0 : index
    %410 = vector.load %arg15[%c0_337, %c0_338] : memref<64x32xf32, #tpu.memory_space<vmem>>, vector<64x32xf32>
    %cst_339 = arith.constant dense<0.000000e+00> : vector<8x32xf32>
    %411 = tpu.matmul %409, %410, %cst_339 {dimension_numbers = #tpu.dot_dimension_numbers<[1], [0], [0], [1], [0, 0, 1, 1], [], []>} : vector<8x64xf32>, vector<64x32xf32>, vector<8x32xf32> -> vector<8x32xf32>
    %c0_340 = arith.constant 0 : index
    %c0_341 = arith.constant 0 : index
    %412 = vector.load %arg16[%c0_340, %c0_341] : memref<1x32xf32, #tpu.memory_space<vmem>>, vector<1x32xf32>
    %413 = vector.broadcast %412 : vector<1x32xf32> to vector<8x32xf32>
    %414 = arith.addf %411, %413 : vector<8x32xf32>
    %415 = arith.addf %402, %414 : vector<8x32xf32>
    %c2_342 = arith.constant 2 : index
    %c0_343 = arith.constant 0 : index
    %c0_344 = arith.constant 0 : index
    %416 = vector.load %arg17[%c2_342, %c0_343, %c0_344] : memref<3x1x32xf32, #tpu.memory_space<vmem>>, vector<1x1x32xf32>
    %417 = vector.shape_cast %416 : vector<1x1x32xf32> to vector<1x32xf32>
    %c2_345 = arith.constant 2 : index
    %c0_346 = arith.constant 0 : index
    %c0_347 = arith.constant 0 : index
    %418 = vector.load %arg18[%c2_345, %c0_346, %c0_347] : memref<3x1x32xf32, #tpu.memory_space<vmem>>, vector<1x1x32xf32>
    %419 = vector.shape_cast %418 : vector<1x1x32xf32> to vector<1x32xf32>
    %cst_348 = arith.constant dense<0.000000e+00> : vector<8xf32>
    %420 = vector.multi_reduction <add>, %415, %cst_348 [1] : vector<8x32xf32> to vector<8xf32>
    %421 = vector.shape_cast %420 : vector<8xf32> to vector<8x1xf32>
    %cst_349 = arith.constant 3.200000e+01 : f32
    %422 = vector.broadcast %cst_349 : f32 to vector<8x1xf32>
    %423 = arith.divf %421, %422 : vector<8x1xf32>
    %424 = vector.broadcast %423 : vector<8x1xf32> to vector<8x32xf32>
    %425 = arith.subf %415, %424 : vector<8x32xf32>
    %426 = arith.mulf %425, %425 : vector<8x32xf32>
    %cst_350 = arith.constant dense<0.000000e+00> : vector<8xf32>
    %427 = vector.multi_reduction <add>, %426, %cst_350 [1] : vector<8x32xf32> to vector<8xf32>
    %428 = vector.shape_cast %427 : vector<8xf32> to vector<8x1xf32>
    %cst_351 = arith.constant 3.200000e+01 : f32
    %429 = vector.broadcast %cst_351 : f32 to vector<8x1xf32>
    %430 = arith.divf %428, %429 : vector<8x1xf32>
    %431 = vector.broadcast %423 : vector<8x1xf32> to vector<8x32xf32>
    %432 = arith.subf %415, %431 : vector<8x32xf32>
    %cst_352 = arith.constant 9.99999974E-6 : f32
    %433 = vector.broadcast %cst_352 : f32 to vector<8x1xf32>
    %434 = arith.addf %430, %433 : vector<8x1xf32>
    %435 = math.rsqrt %434 : vector<8x1xf32>
    %436 = vector.broadcast %435 : vector<8x1xf32> to vector<8x32xf32>
    %437 = arith.mulf %432, %436 : vector<8x32xf32>
    %438 = vector.broadcast %417 : vector<1x32xf32> to vector<8x32xf32>
    %439 = arith.mulf %437, %438 : vector<8x32xf32>
    %440 = vector.broadcast %419 : vector<1x32xf32> to vector<8x32xf32>
    %441 = arith.addf %439, %440 : vector<8x32xf32>
    %c0_353 = arith.constant 0 : index
    %c0_354 = arith.constant 0 : index
    %442 = vector.load %arg19[%c0_353, %c0_354] : memref<32x16xf32, #tpu.memory_space<vmem>>, vector<32x16xf32>
    %cst_355 = arith.constant dense<0.000000e+00> : vector<8x16xf32>
    %443 = tpu.matmul %441, %442, %cst_355 {dimension_numbers = #tpu.dot_dimension_numbers<[1], [0], [0], [1], [0, 0, 1, 1], [], []>} : vector<8x32xf32>, vector<32x16xf32>, vector<8x16xf32> -> vector<8x16xf32>
    %c0_356 = arith.constant 0 : index
    %c0_357 = arith.constant 0 : index
    %444 = vector.load %arg20[%c0_356, %c0_357] : memref<1x16xf32, #tpu.memory_space<vmem>>, vector<1x16xf32>
    %445 = vector.broadcast %444 : vector<1x16xf32> to vector<8x16xf32>
    %446 = arith.addf %443, %445 : vector<8x16xf32>
    %447 = vector.shape_cast %446 : vector<8x16xf32> to vector<1x8x16xf32>
    %c0_358 = arith.constant 0 : index
    %c0_359 = arith.constant 0 : index
    %c0_360 = arith.constant 0 : index
    %448 = vector.load %arg21[%c0_358, %c0_359, %c0_360] : memref<1x8x16xf32, #tpu.memory_space<vmem>>, vector<1x8x16xf32>
    tpu.vector_store %arg21[%c0_358, %c0_359, %c0_360], %447 {strides = array<i32>} : memref<1x8x16xf32, #tpu.memory_space<vmem>>, vector<1x8x16xf32>,
    return
  }
  func.func @transform_0(%arg0: i32) -> (i32, i32, i32) {
    %c0_i32 = arith.constant 0 : i32
    %c0_i32_0 = arith.constant 0 : i32
    %c0_i32_1 = arith.constant 0 : i32
    return %arg0, %c0_i32, %c0_i32_0 : i32, i32, i32
  }
  func.func @transform_1(%arg0: i32) -> (i32, i32, i32) {
    %c0_i32 = arith.constant 0 : i32
    %c0_i32_0 = arith.constant 0 : i32
    %c0_i32_1 = arith.constant 0 : i32
    return %arg0, %c0_i32, %c0_i32_0 : i32, i32, i32
  }
  func.func @transform_2(%arg0: i32) -> (i32, i32, i32) {
    %c0_i32 = arith.constant 0 : i32
    %c0_i32_0 = arith.constant 0 : i32
    %c0_i32_1 = arith.constant 0 : i32
    return %arg0, %c0_i32, %c0_i32_0 : i32, i32, i32
  }
  func.func @transform_3(%arg0: i32) -> (i32, i32, i32) {
    %c0_i32 = arith.constant 0 : i32
    %c0_i32_0 = arith.constant 0 : i32
    %c0_i32_1 = arith.constant 0 : i32
    return %arg0, %c0_i32, %c0_i32_0 : i32, i32, i32
  }
  func.func @transform_4(%arg0: i32) -> (i32, i32, i32, i32) {
    %c0_i32 = arith.constant 0 : i32
    %c0_i32_0 = arith.constant 0 : i32
    %c0_i32_1 = arith.constant 0 : i32
    %c0_i32_2 = arith.constant 0 : i32
    %c0_i32_3 = arith.constant 0 : i32
    return %c0_i32, %c0_i32_0, %c0_i32_1, %c0_i32_2 : i32, i32, i32, i32
  }
  func.func @transform_5(%arg0: i32) -> (i32, i32, i32, i32) {
    %c0_i32 = arith.constant 0 : i32
    %c0_i32_0 = arith.constant 0 : i32
    %c0_i32_1 = arith.constant 0 : i32
    %c0_i32_2 = arith.constant 0 : i32
    %c0_i32_3 = arith.constant 0 : i32
    return %c0_i32, %c0_i32_0, %c0_i32_1, %c0_i32_2 : i32, i32, i32, i32
  }
  func.func @transform_6(%arg0: i32) -> (i32, i32, i32) {
    %c0_i32 = arith.constant 0 : i32
    %c0_i32_0 = arith.constant 0 : i32
    %c0_i32_1 = arith.constant 0 : i32
    %c0_i32_2 = arith.constant 0 : i32
    return %c0_i32, %c0_i32_0, %c0_i32_1 : i32, i32, i32
  }
  func.func @transform_7(%arg0: i32) -> (i32, i32) {
    %c0_i32 = arith.constant 0 : i32
    %c0_i32_0 = arith.constant 0 : i32
    %c0_i32_1 = arith.constant 0 : i32
    return %c0_i32, %c0_i32_0 : i32, i32
  }
  func.func @transform_8(%arg0: i32) -> (i32, i32, i32, i32) {
    %c0_i32 = arith.constant 0 : i32
    %c0_i32_0 = arith.constant 0 : i32
    %c0_i32_1 = arith.constant 0 : i32
    %c0_i32_2 = arith.constant 0 : i32
    %c0_i32_3 = arith.constant 0 : i32
    return %c0_i32, %c0_i32_0, %c0_i32_1, %c0_i32_2 : i32, i32, i32, i32
  }
  func.func @transform_9(%arg0: i32) -> (i32, i32, i32, i32) {
    %c0_i32 = arith.constant 0 : i32
    %c0_i32_0 = arith.constant 0 : i32
    %c0_i32_1 = arith.constant 0 : i32
    %c0_i32_2 = arith.constant 0 : i32
    %c0_i32_3 = arith.constant 0 : i32
    return %c0_i32, %c0_i32_0, %c0_i32_1, %c0_i32_2 : i32, i32, i32, i32
  }
  func.func @transform_10(%arg0: i32) -> (i32, i32, i32) {
    %c0_i32 = arith.constant 0 : i32
    %c0_i32_0 = arith.constant 0 : i32
    %c0_i32_1 = arith.constant 0 : i32
    %c0_i32_2 = arith.constant 0 : i32
    return %c0_i32, %c0_i32_0, %c0_i32_1 : i32, i32, i32
  }
  func.func @transform_11(%arg0: i32) -> (i32, i32) {
    %c0_i32 = arith.constant 0 : i32
    %c0_i32_0 = arith.constant 0 : i32
    %c0_i32_1 = arith.constant 0 : i32
    return %c0_i32, %c0_i32_0 : i32, i32
  }
  func.func @transform_12(%arg0: i32) -> (i32, i32) {
    %c0_i32 = arith.constant 0 : i32
    %c0_i32_0 = arith.constant 0 : i32
    %c0_i32_1 = arith.constant 0 : i32
    return %c0_i32, %c0_i32_0 : i32, i32
  }
  func.func @transform_13(%arg0: i32) -> (i32, i32) {
    %c0_i32 = arith.constant 0 : i32
    %c0_i32_0 = arith.constant 0 : i32
    %c0_i32_1 = arith.constant 0 : i32
    return %c0_i32, %c0_i32_0 : i32, i32
  }
  func.func @transform_14(%arg0: i32) -> (i32, i32) {
    %c0_i32 = arith.constant 0 : i32
    %c0_i32_0 = arith.constant 0 : i32
    %c0_i32_1 = arith.constant 0 : i32
    return %c0_i32, %c0_i32_0 : i32, i32
  }
  func.func @transform_15(%arg0: i32) -> (i32, i32) {
    %c0_i32 = arith.constant 0 : i32
    %c0_i32_0 = arith.constant 0 : i32
    %c0_i32_1 = arith.constant 0 : i32
    return %c0_i32, %c0_i32_0 : i32, i32
  }
  func.func @transform_16(%arg0: i32) -> (i32, i32, i32) {
    %c0_i32 = arith.constant 0 : i32
    %c0_i32_0 = arith.constant 0 : i32
    %c0_i32_1 = arith.constant 0 : i32
    %c0_i32_2 = arith.constant 0 : i32
    return %c0_i32, %c0_i32_0, %c0_i32_1 : i32, i32, i32
  }
  func.func @transform_17(%arg0: i32) -> (i32, i32, i32) {
    %c0_i32 = arith.constant 0 : i32
    %c0_i32_0 = arith.constant 0 : i32
    %c0_i32_1 = arith.constant 0 : i32
    %c0_i32_2 = arith.constant 0 : i32
    return %c0_i32, %c0_i32_0, %c0_i32_1 : i32, i32, i32
  }
  func.func @transform_18(%arg0: i32) -> (i32, i32) {
    %c0_i32 = arith.constant 0 : i32
    %c0_i32_0 = arith.constant 0 : i32
    %c0_i32_1 = arith.constant 0 : i32
    return %c0_i32, %c0_i32_0 : i32, i32
  }
  func.func @transform_19(%arg0: i32) -> (i32, i32) {
    %c0_i32 = arith.constant 0 : i32
    %c0_i32_0 = arith.constant 0 : i32
    %c0_i32_1 = arith.constant 0 : i32
    return %c0_i32, %c0_i32_0 : i32, i32
  }
  func.func @transform_20(%arg0: i32) -> (i32, i32, i32) {
    %c0_i32 = arith.constant 0 : i32
    %c0_i32_0 = arith.constant 0 : i32
    %c0_i32_1 = arith.constant 0 : i32
    return %arg0, %c0_i32, %c0_i32_0 : i32, i32, i32
  }
}

</mosaic_0001>

<bundles_post_ra>
// kernel: encoder_decoder_forward.2
= control target key start
LH: loop header
LB: loop body
LE: loop exit
PB: predicated region body
PF: predicated region fallthrough
CT: control target
= control target key end

     0   :  { %s3325_s21 = smov 0   ;;  %s3767_s0 = inlined_call_operand.vmem [shape: f32[2,8,32], index: 0, kind: input, shape index: {}]   ;;  %s3768_s1 = inlined_call_operand.vmem [shape: f32[2,1,8], index: 1, kind: input, shape index: {}]   ;;  %s3769_s2 = inlined_call_operand.vmem [shape: f32[3,4,32,8], index: 2, kind: input, shape index: {}]   ;;  %s3770_s3 = inlined_call_operand.vmem [shape: f32[3,4,1,8], index: 3, kind: input, shape index: {}]   ;;  %s3771_s4 = inlined_call_operand.vmem [shape: f32[4,8,32], index: 4, kind: input, shape index: {}]   ;;  %s3772_s5 = inlined_call_operand.vmem [shape: f32[1,32], index: 5, kind: input, shape index: {}]   ;;  %s3773_s6 = inlined_call_operand.vmem [shape: f32[32,64], index: 6, kind: input, shape index: {}]   ;;  %s3774_s7 = inlined_call_operand.vmem [shape: f32[1,64], index: 7, kind: input, shape index: {}]   ;;  %s3775_s8 = inlined_call_operand.vmem [shape: f32[64,32], index: 8, kind: input, shape index: {}]   ;;  %s3776_s9 = inlined_call_operand.vmem [shape: f32[1,32], index: 9, kind: input, shape index: {}]   ;;  %s3777_s10 = inlined_call_operand.vmem [shape: f32[2,1,32], index: 10, kind: input, shape index: {}]   ;;  %s3778_s11 = inlined_call_operand.vmem [shape: f32[2,1,32], index: 11, kind: input, shape index: {}]   ;;  %s3779_s12 = inlined_call_operand.vmem [shape: f32[2,8,32], index: 12, kind: output, shape index: {}]  }
   0x1 LB: > { %s2688_s22 = sadd.s32 4294967295, %s3254_s21   ;;  %p2692_p0 = scmp.ge.s32.totalorder %s3254_s21, 1  ;;  %s3254_s21 = sphi %s3325_s21, %s22_s21  }
   0x2   : > { %p369_p1 = scmp.lt.s32.totalorder %s3254_s21, 3 }
   0x4   : > { %p370_p2 = pnand %p2692_p0, %p369_p1 }
   0x5   : > { %v2697_v0 = vld [vmem:[%s3769_s2 + $0x80] sm:$0xff] (!%p370_p2)  ;;  %v2698_v1 = vld [vmem:[%s3769_s2 + $0x88] sm:$0xff] (!%p370_p2)  ;;  %v3256_v3 = vmov (!%p370_p2), 0.0|0.0   ;;  %v2699_v6 = vld [vmem:[%s3769_s2 + $0x90] sm:$0xff] (!%p370_p2)  ;;  %p412_p3 = scmp.lt.s32.totalorder (!%p370_p2), %s2688_s22, 1  ;;  %vm3257_vm0 = vmmov (!%p370_p2), 0   ;;  %v756_v33 = vlaneseq (!%p370_p2) }
   0x6   : > { %373 = sbr.rel (%p370_p2) target bundleno = 4935 (0x1347), region = 68  ;;  %v426_v2 = vld [vmem:[%s3769_s2] sm:$0xff] (!%p370_p2)  ;;  %3132 = vmatprep.subr.bf16.mxu1 (!%p370_p2), %v3256_v3  ;;  %v3133_v4 = vpack.c.bf16 (!%p370_p2), %v2698_v1, %v2697_v0  ;;  %3126 = vmatprep.subr.bf16.mxu0 (!%p370_p2), %v3256_v3  ;;  %v427_v5 = vld [vmem:[%s3769_s2 + $0x8] sm:$0xff] (!%p370_p2)  ;;  %v2700_v7 = vld [vmem:[%s3769_s2 + $0x98] sm:$0xff] (!%p370_p2)  ;;  %v3258_v11 = vmov (!%p370_p2), 0.0   ;;  %vm437_vm1 = vcmask (!%p370_p2), 261120  }
   0x7   : > { %v3127_v8 = vpack.c.bf16 (!%p370_p2), %v427_v5, %v426_v2  ;;  %v428_v9 = vld [vmem:[%s3769_s2 + $0x10] sm:$0xff] (!%p370_p2)  ;;  %v429_v10 = vld [vmem:[%s3769_s2 + $0x18] sm:$0xff] (!%p370_p2)  ;;  %2923 = vmatprep.mubr.msk.f32.mxu1 (!%p370_p2), %vm3257_vm0, %v3258_v11  ;;  %2912 = vmatprep.mubr.msk.f32.mxu0 (!%p370_p2), %vm3257_vm0, %v3258_v11  ;;  %v3136_v12 = vpack.c.bf16 (!%p370_p2), %v2700_v7, %v2699_v6  ;;  %v2704_v14 = vld [vmem:[%s3769_s2 + $0x100] sm:$0xff] (!%p370_p2)  ;;  %vm677_vm2 = vcmask (!%p370_p2), 64512   ;;  %v757_v35 = vshrl.u32 (!%p370_p2), %v756_v33, 7 }
   0x8   : > { %3134 = vmatpush3.bf16.msra.mxu1 (!%p370_p2), %v3133_v4  ;;  %v3130_v13 = vpack.c.bf16 (!%p370_p2), %v429_v10, %v428_v9  ;;  %v2705_v15 = vld [vmem:[%s3769_s2 + $0x108] sm:$0xff] (!%p370_p2)  ;;  %v2706_v18 = vld [vmem:[%s3769_s2 + $0x110] sm:$0xff] (!%p370_p2)  ;;  %v2707_v19 = vld [vmem:[%s3769_s2 + $0x118] sm:$0xff] (!%p370_p2)  ;;  %v3259_v37 = vmov (!%p370_p2), 0   ;;  %vm2519_vm5 = vcmask (!%p370_p2), 523264  }
   0x9   : > { %3128 = vmatpush3.bf16.msra.mxu0 (!%p370_p2), %v3127_v8  ;;  %3135 = vmatprep.subr.bf16.mxu1 (!%p370_p2), %v3256_v3  ;;  %v3139_v17 = vpack.c.bf16 (!%p370_p2), %v2705_v15, %v2704_v14  ;;  %v3142_v20 = vpack.c.bf16 (!%p370_p2), %v2707_v19, %v2706_v18  ;;  %v2702_v21 = vld [vmem:[%s3770_s3 + $0x4] ss:$0 sm:$0xff] (!%p370_p2)  ;;  %v2695_v22 = vld [vmem:[%s3770_s3] ss:$0 sm:$0xff] (!%p370_p2)  ;;  %v2709_v29 = vld [vmem:[%s3770_s3 + $0x8] ss:$0 sm:$0xff] (!%p370_p2) }
   0xa   : > { %3129 = vmatprep.subr.bf16.mxu0 (!%p370_p2), %v3256_v3  ;;  %v758_v36 = vsub.s32 (!%p370_p2), 0, %v757_v35  ;;  %v2714_v50 = vld [vmem:[%s3769_s2 + $0x20] sm:$0xff] (!%p370_p2)  ;;  %v2715_v51 = vld [vmem:[%s3769_s2 + $0x28] sm:$0xff] (!%p370_p2)  ;;  %v2716_v53 = vld [vmem:[%s3769_s2 + $0x30] sm:$0xff] (!%p370_p2) }
   0xb   : > { %v3145_v52 = vpack.c.bf16 (!%p370_p2), %v2715_v51, %v2714_v50  ;;  %v2717_v54 = vld [vmem:[%s3769_s2 + $0x38] sm:$0xff] (!%p370_p2)  ;;  %v2721_v57 = vld [vmem:[%s3769_s2 + $0xa0] sm:$0xff] (!%p370_p2)  ;;  %v2722_v58 = vld [vmem:[%s3769_s2 + $0xa8] sm:$0xff] (!%p370_p2) }
   0xc   : > { %3137 = vmatpush3.bf16.msra.mxu1 (!%p370_p2), %v3136_v12  ;;  %v3148_v55 = vpack.c.bf16 (!%p370_p2), %v2717_v54, %v2716_v53  ;;  %v3151_v60 = vpack.c.bf16 (!%p370_p2), %v2722_v58, %v2721_v57  ;;  %v2723_v62 = vld [vmem:[%s3769_s2 + $0xb0] sm:$0xff] (!%p370_p2)  ;;  %v2724_v63 = vld [vmem:[%s3769_s2 + $0xb8] sm:$0xff] (!%p370_p2)  ;;  %v2726_v6 = vld [vmem:[%s3770_s3 + $0x5] ss:$0 sm:$0xff] (!%p370_p2) }
   0xd   : > { %s3781_s22 = smov (!%p412_p3, %s2688_s22), 1  ;;  %3131 = vmatpush3.bf16.msra.mxu0 %v3130_v13  ;;  %2942 = vmatprep.subr.mxu1 %v3258_v11  ;;  %v3154_v0 = vpack.c.bf16 %v2724_v63, %v2723_v62  ;;  %v2719_v7 = vld [vmem:[%s3770_s3 + $0x1] ss:$0 sm:$0xff]  ;;  %v2729_v14 = vld [vmem:[%s3769_s2 + $0x128] sm:$0xff]  ;;  %v2730_v15 = vld [vmem:[%s3769_s2 + $0x130] sm:$0xff] }
   0xe   : > { %s2693_s23 = sshll.u32 %s3781_s22, 3  ;;  %3138 = vmatprep.subr.bf16.mxu0 %v3256_v3  ;;  %s418_s28 = scalar_lea.vmem %s3768_s1, %s3781_s22  ;;  %v2728_v13 = vld [vmem:[%s3769_s2 + $0x120] sm:$0xff]  ;;  %v2731_v18 = vld [vmem:[%s3769_s2 + $0x138] sm:$0xff] }
   0xf   : > { %s415_s30 = scalar_lea.vmem %s3767_s0, %s2693_s23  ;;  %v424_v34 = vld [vmem:[%s418_s28] sm:$0x1]  ;;  %v3160_v19 = vpack.c.bf16 %v2731_v18, %v2730_v15  ;;  %v2744_v50 = vld [vmem:[%s3769_s2 + $0x58] sm:$0xff]  ;;  %v2746_v63 = vld [vmem:[%s3770_s3 + $0x2] ss:$0 sm:$0xff]  ;;  %s422_s14 = scalar_lea.vmem %s3779_s12, %s2693_s23 }
  0x10   : > { %v3379_v16 = vld [vmem:[%s415_s30] sm:$0xff]  ;;  %vm425_vm3 = vcmp.gt.f32.partialorder %v424_v34, 0.0  ;;  %v2738_v34 = vld [vmem:[%s3771_s4 + $0x8] sm:$0xff] }
  0x11   : > { %2924 = vmatmul.mubr.msk.f32.vlgmr.msra.gmra.mrb[0].mxu1 %vm437_vm1, %v3379_v16  ;;  %2913 = vmatmul.mubr.msk.f32.vlgmr.msra.gmra.mrb[0].mxu0 %vm437_vm1, %v3379_v16  ;;  %v755_v38 = vsel %vm425_vm3, 1, %v3259_v37 }
  0x12   : > { %2944 = vmatprep.mubr.msk.f32.mxu1 %vm3257_vm0, %v3258_v11  ;;  %3140 = vmatpush3.bf16.msra.mxu0 %v3139_v17  ;;  %v3422_v39 = vrot.slane %v755_v38, %v758_v36  ;;  %v3157_v17 = vpack.c.bf16 %v2729_v14, %v2728_v13  ;;  %v846_v38 = vld [vmem:[%s3771_s4] sm:$0xff] }
  0x13   : > { %2934 = vmatprep.mubr.msk.f32.mxu0 %vm3257_vm0, %v3258_v11  ;;  %3141 = vmatprep.subr.bf16.mxu0 %v3256_v3 }
  0x14   : > { %vm760_vm4 = vcmp.eq.s32.totalorder %v3422_v39, 1  ;;  %v2791_v39 = vld [vmem:[%s3771_s4 + $0x18] sm:$0xff] }
  0x16   : > { %3143 = vmatpush3.bf16.msra.mxu0 %v3142_v20 }
  0x17   : > { %2937 = vmatprep.subr.mxu0 %v3258_v11 }
  0x19   : > { %2935 = vmatmul.mubr.msk.f32.vlgmr.msra.gmra.mrb[2].mxu0 %vm437_vm1, %v3379_v16 }
  0x1a   : > { %2939 = vmatprep.mubr.msk.f32.mxu0 %vm3257_vm0, %v3258_v11 }
  0xe4   : > { %v590_v23 = vpop.f32.mrb[0].mxu1  ;;  %v507_v26 = vpop.f32.mrb[0].mxu0 }
  0xe5   : > { %v591_v24 = vadd.f32 %v2702_v21, %v590_v23  ;;  %v2925_v25 = vpop.f32.mrb[1].mxu1  ;;  %v508_v27 = vadd.f32 %v2695_v22, %v507_v26  ;;  %v2914_v28 = vpop.f32.mrb[1].mxu0 }
  0xe7   : > { %2938 = vmatpush3.xpose.msk.msra.mxu0 %vm677_vm2, %v591_v24 }
  0xe8   : > { %3144 = vmatprep.subr.bf16.mxu0 %v3256_v3 }
  0xea   : > { %2940 = vmatmul.mubr.msk.f32.vlgmr.msra.gmra.mrb[4].mxu0 %vm677_vm2, %v508_v27 }
  0xeb   : > { %2955 = vmatprep.mubr.msk.f32.mxu0 %vm3257_vm0, %v3258_v11  ;;  %3146 = vmatpush3.bf16.msra.mxu0 %v3145_v52 }
  0xec   : > { %v673_v30 = vpop.f32.mrb[2].mxu0  ;;  %3147 = vmatprep.subr.bf16.mxu0 %v3256_v3 }
  0xed   : > { %v674_v31 = vadd.f32 %v2709_v29, %v673_v30  ;;  %v2936_v32 = vpop.f32.mrb[3].mxu0 }
  0xef   : > { %2943 = vmatpush3.msra.mxu1 %v674_v31  ;;  %3149 = vmatpush3.bf16.msra.mxu0 %v3148_v55  ;;  %v2733_v31 = vld [vmem:[%s3770_s3 + $0x9] ss:$0 sm:$0xff] }
  0xf0   : > { %3150 = vmatprep.subr.bf16.mxu1 %v3256_v3  ;;  %3156 = vmatprep.subr.bf16.mxu0 %v3256_v3 }
  0xf2   : > { %2956 = vmatmul.mubr.msk.f32.vlgmr.msra.gmra.mrb[6].mxu0 %vm437_vm1, %v3379_v16 }
  0xf3   : > { %2977 = vmatprep.mubr.msk.f32.mxu0 %vm3257_vm0, %v3258_v11  ;;  %3158 = vmatpush3.bf16.msra.mxu0 %v3157_v17 }
  0xf4   : > { %3159 = vmatprep.subr.bf16.mxu0 %v3256_v3 }
  0xf7   : > { %3161 = vmatpush3.bf16.msra.mxu0 %v3160_v19 }
  0xf8   : > { %2990 = vmatprep.subr.mxu0 %v3258_v11 }
  0xfa   : > { %2978 = vmatmul.mubr.msk.f32.vlgmr.msra.gmra.mrb[8].mxu0 %vm437_vm1, %v3379_v16 }
  0xfb   : > { %2992 = vmatprep.mubr.msk.f32.mxu0 %vm3257_vm0, %v3258_v11  ;;  %2991 = vmatpush3.msra.mxu0 %v2738_v34  ;;  %v2770_v34 = vld [vmem:[%s3769_s2 + $0x78] sm:$0xff] }
  0xfc   : > { %3162 = vmatprep.subr.bf16.mxu0 %v3256_v3 }
 0x1bd   : > { %v750_v40 = vpop.f32.mrb[4].mxu0 }
 0x1be   : > { %v754_v41 = vmul.f32 0.35355338, %v750_v40  ;;  %v2941_v42 = vpop.f32.mrb[5].mxu0  ;;  %v2748_v40 = vld [vmem:[%s3769_s2 + $0xc0] sm:$0xff] }
 0x1c0   : > { %v761_v43 = vsel %vm760_vm4, %v754_v41, -1e+09  ;;  %v2749_v41 = vld [vmem:[%s3769_s2 + $0xc8] sm:$0xff] }
 0x1c1   : > { %v762_v44 = vsel %vm677_vm2, %v761_v43, -inf  ;;  %v3169_v42 = vpack.c.bf16 %v2749_v41, %v2748_v40  ;;  %v2776_v40 = vld [vmem:[%s3769_s2 + $0xf0] sm:$0xff]  ;;  %v2777_v41 = vld [vmem:[%s3769_s2 + $0xf8] sm:$0xff] }
 0x1c2   : > { %763 = vmax.xlane.f32.xlu0 %v762_v44  ;;  %v2751_v44 = vld [vmem:[%s3769_s2 + $0xd8] sm:$0xff] }
 0x1c5   : > { %v926_v1 = vpop.f32.mrb[6].mxu0 }
 0x1c6   : > { %v2957_v2 = vpop.f32.mrb[7].mxu0  ;;  %v927_v12 = vadd.f32 %v2719_v7, %v926_v1 }
 0x1cd   : > { %v1092_v30 = vpop.f32.mrb[8].mxu0 }
 0x1ce   : > { %v2979_v32 = vpop.f32.mrb[9].mxu0  ;;  %v1093_v33 = vadd.f32 %v2733_v31, %v1092_v30  ;;  %v2767_v30 = vld [vmem:[%s3769_s2 + $0x60] sm:$0xff]  ;;  %v2768_v31 = vld [vmem:[%s3769_s2 + $0x68] sm:$0xff] }
 0x1cf   : > { %v3181_v32 = vpack.c.bf16 %v2768_v31, %v2767_v30 }
 0x24f   : > { %v764_v45 = vpop.xlane.xlu0 %763 }
 0x250   : > { %v765_v46 = vsub.f32 %v761_v43, %v764_v45  ;;  %v2750_v43 = vld [vmem:[%s3769_s2 + $0xd0] sm:$0xff] }
 0x251   : > { %v3172_v45 = vpack.c.bf16 %v2751_v44, %v2750_v43  ;;  %v3190_v44 = vpack.c.bf16 %v2777_v41, %v2776_v40  ;;  %v2507_v41 = vld [vmem:[%s3775_s8 + $0x18] sm:$0xff] }
 0x252   : > { %v766_v47 = vmul.f32 1.442695, %v765_v46  ;;  %v2741_v46 = vld [vmem:[%s3769_s2 + $0x40] sm:$0xff] }
 0x254   : > { %3228 = vpow2.f32 %v766_v47  ;;  %v2742_v47 = vld [vmem:[%s3769_s2 + $0x48] sm:$0xff] }
 0x25e   : > { %v3229_v48 = vpop.eup %3228 }
 0x25f   : > { %v768_v49 = vsel %vm677_vm2, %v3229_v48, 0.0 }
 0x260   : > { %769 = vadd.xlane.f32.xlu0 %v768_v49  ;;  %v2743_v49 = vld [vmem:[%s3769_s2 + $0x50] sm:$0xff] }
 0x261   : > { %v3166_v53 = vpack.c.bf16 %v2744_v50, %v2743_v49  ;;  %v2779_v50 = vld [vmem:[%s3770_s3 + $0x7] ss:$0 sm:$0xff] }
 0x2ed   : > { %v770_v56 = vpop.xlane.xlu0 %769 }
 0x2ee   : > { %3230 = vrcp.f32 %v770_v56  ;;  %v2753_v56 = vld [vmem:[%s3770_s3 + $0x6] ss:$0 sm:$0xff] }
 0x2f8   : > { %v3231_v59 = vpop.eup %3230 }
 0x2f9   : > { %v772_v61 = vmul.f32 %v3231_v59, %v3229_v48  ;;  %v3163_v48 = vpack.c.bf16 %v2742_v47, %v2741_v46 }
 0x2fb   : > { %2945 = vmatmul.mubr.msk.f32.vlgmr.msra.gmra.mrb[2].mxu1 %vm677_vm2, %v772_v61 }
 0x2fc   : > { %3152 = vmatpush3.bf16.msra.mxu1 %v3151_v60  ;;  %2966 = vmatprep.mubr.msk.f32.mxu1 %vm3257_vm0, %v3258_v11 }
 0x2fd   : > { %3153 = vmatprep.subr.bf16.mxu1 %v3256_v3 }
 0x300   : > { %3155 = vmatpush3.bf16.msra.mxu1 %v3154_v0 }
 0x301   : > { %2980 = vmatprep.subr.mxu1 %v3258_v11 }
 0x303   : > { %2967 = vmatmul.mubr.msk.f32.vlgmr.msra.gmra.mrb[4].mxu1 %vm437_vm1, %v3379_v16 }
 0x304   : > { %2982 = vmatprep.mubr.msk.f32.mxu1 %vm3257_vm0, %v3258_v11 }
 0x3ce   : > { %v842_v4 = vpop.f32.mrb[2].mxu1 }
 0x3cf   : > { %v2946_v5 = vpop.f32.mrb[3].mxu1 }
 0x3d0   : > { %v2756_v5 = vld [vmem:[%s3769_s2 + $0x148] sm:$0xff] }
 0x3d6   : > { %v1009_v8 = vpop.f32.mrb[4].mxu1 }
 0x3d7   : > { %v1010_v9 = vadd.f32 %v2726_v6, %v1009_v8  ;;  %v2968_v10 = vpop.f32.mrb[5].mxu1  ;;  %v2757_v6 = vld [vmem:[%s3769_s2 + $0x150] sm:$0xff]  ;;  %v2758_v8 = vld [vmem:[%s3769_s2 + $0x158] sm:$0xff] }
 0x3d9   : > { %2981 = vmatpush3.xpose.msk.msra.mxu1 %vm677_vm2, %v1010_v9  ;;  %v3178_v9 = vpack.c.bf16 %v2758_v8, %v2757_v6 }
 0x3da   : > { %2985 = vmatprep.subr.mxu1 %v3258_v11 }
 0x3dc   : > { %2983 = vmatmul.mubr.msk.f32.vlgmr.msra.gmra.mrb[6].mxu1 %vm677_vm2, %v927_v12 }
 0x3dd   : > { %2987 = vmatprep.mubr.msk.f32.mxu1 %vm3257_vm0, %v3258_v11  ;;  %2986 = vmatpush3.msra.mxu1 %v1093_v33  ;;  %v2769_v33 = vld [vmem:[%s3769_s2 + $0x70] sm:$0xff] }
 0x3de   : > { %2995 = vmatprep.subr.mxu1 %v3258_v11 }
 0x4af   : > { %v1168_v20 = vpop.f32.mrb[6].mxu1 }
 0x4b0   : > { %v1172_v21 = vmul.f32 0.35355338, %v1168_v20  ;;  %v2984_v22 = vpop.f32.mrb[7].mxu1 }
 0x4b2   : > { %v1173_v23 = vsel %vm760_vm4, %v1172_v21, -1e+09 }
 0x4b3   : > { %v1174_v24 = vsel %vm677_vm2, %v1173_v23, -inf }
 0x4b4   : > { %1175 = vmax.xlane.f32.xlu1 %v1174_v24 }
 0x541   : > { %v1176_v25 = vpop.xlane.xlu1 %1175 }
 0x542   : > { %v1177_v26 = vsub.f32 %v1173_v23, %v1176_v25  ;;  %v2760_v23 = vld [vmem:[%s3770_s3 + $0xa] ss:$0 sm:$0xff] }
 0x544   : > { %v1178_v27 = vmul.f32 1.442695, %v1177_v26  ;;  %v2765_v26 = vld [vmem:[%s3771_s4 + $0x10] sm:$0xff] }
 0x546   : > { %3232 = vpow2.f32 %v1178_v27 }
 0x550   : > { %v3233_v28 = vpop.eup %3232 }
 0x551   : > { %v1180_v29 = vsel %vm677_vm2, %v3233_v28, 0.0 }
 0x552   : > { %1181 = vadd.xlane.f32.xlu1 %v1180_v29 }
 0x5df   : > { %v1182_v35 = vpop.xlane.xlu1 %1181 }
 0x5e0   : > { %3234 = vrcp.f32 %v1182_v35  ;;  %v3184_v35 = vpack.c.bf16 %v2770_v34, %v2769_v33  ;;  %v2422_v34 = vld [vmem:[%s3773_s6 + $0x18] sm:$0xff] }
 0x5ea   : > { %v3235_v36 = vpop.eup %3234 }
 0x5eb   : > { %v1184_v37 = vmul.f32 %v3235_v36, %v3233_v28  ;;  %v2774_v36 = vld [vmem:[%s3769_s2 + $0xe0] sm:$0xff] }
 0x5ed   : > { %2988 = vmatmul.mubr.msk.f32.vlgmr.msra.gmra.mrb[8].mxu1 %vm677_vm2, %v1184_v37  ;;  %v2775_v37 = vld [vmem:[%s3769_s2 + $0xe8] sm:$0xff] }
 0x5ee   : > { %2996 = vmatpush3.msra.mxu1 %v846_v38  ;;  %2997 = vmatprep.mubr.msk.f32.mxu1 %vm3257_vm0, %v3258_v11  ;;  %v3187_v38 = vpack.c.bf16 %v2775_v37, %v2774_v36  ;;  %v2504_v36 = vld [vmem:[%s3775_s8] sm:$0xff]  ;;  %v2505_v37 = vld [vmem:[%s3775_s8 + $0x8] sm:$0xff] }
 0x5ef   : > { %3168 = vmatprep.subr.bf16.mxu1 %v3256_v3  ;;  %v3205_v40 = vpack.c.bf16 %v2505_v37, %v2504_v36 }
 0x5f1   : > { %2998 = vmatmul.mubr.msk.f32.vlgmr.msra.gmra.mrb[10].mxu1 %vm677_vm2, %v842_v4  ;;  %v2755_v4 = vld [vmem:[%s3769_s2 + $0x140] sm:$0xff] }
 0x5f2   : > { %3170 = vmatpush3.bf16.msra.mxu1 %v3169_v42  ;;  %3019 = vmatprep.mubr.msk.f32.mxu1 %vm3257_vm0, %v3258_v11  ;;  %v3175_v7 = vpack.c.bf16 %v2756_v5, %v2755_v4 }
 0x5f3   : > { %3171 = vmatprep.subr.bf16.mxu1 %v3256_v3 }
 0x5f6   : > { %3173 = vmatpush3.bf16.msra.mxu1 %v3172_v45 }
 0x5f7   : > { %3033 = vmatprep.subr.mxu1 %v3258_v11 }
 0x5f9   : > { %3020 = vmatmul.mubr.msk.f32.vlgmr.msra.gmra.mrb[12].mxu1 %vm437_vm1, %v3379_v16 }
 0x5fa   : > { %3035 = vmatprep.mubr.msk.f32.mxu1 %vm3257_vm0, %v3258_v11 }
 0x6c0   : > { %v1254_v51 = vpop.f32.mrb[8].mxu1 }
 0x6c1   : > { %v2989_v52 = vpop.f32.mrb[9].mxu1  ;;  %2993 = vmatmul.mubr.msk.f32.vlgmr.msra.gmra.mrb[10].mxu0 %vm677_vm2, %v1254_v51  ;;  %v2772_v51 = vld [vmem:[%s3770_s3 + $0x3] ss:$0 sm:$0xff] }
 0x6c2   : > { %3164 = vmatpush3.bf16.msra.mxu0 %v3163_v48  ;;  %3008 = vmatprep.mubr.msk.f32.mxu0 %vm3257_vm0, %v3258_v11 }
 0x6c3   : > { %3165 = vmatprep.subr.bf16.mxu0 %v3256_v3 }
 0x6c4   : > { %v1402_v54 = vpop.f32.mrb[10].mxu1 }
 0x6c5   : > { %v2999_v55 = vpop.f32.mrb[11].mxu1 }
 0x6c6   : > { %3167 = vmatpush3.bf16.msra.mxu0 %v3166_v53 }
 0x6c7   : > { %3174 = vmatprep.subr.bf16.mxu0 %v3256_v3 }
 0x6c9   : > { %3009 = vmatmul.mubr.msk.f32.vlgmr.msra.gmra.mrb[12].mxu0 %vm437_vm1, %v3379_v16 }
 0x6ca   : > { %3030 = vmatprep.mubr.msk.f32.mxu0 %vm3257_vm0, %v3258_v11  ;;  %3176 = vmatpush3.bf16.msra.mxu0 %v3175_v7 }
 0x6cb   : > { %3177 = vmatprep.subr.bf16.mxu0 %v3256_v3 }
 0x6cc   : > { %v1568_v57 = vpop.f32.mrb[12].mxu1 }
 0x6cd   : > { %v1569_v58 = vadd.f32 %v2753_v56, %v1568_v57  ;;  %v3021_v59 = vpop.f32.mrb[13].mxu1  ;;  %v2781_v56 = vld [vmem:[%s3769_s2 + $0x160] sm:$0xff]  ;;  %v2782_v57 = vld [vmem:[%s3769_s2 + $0x168] sm:$0xff] }
 0x6ce   : > { %3179 = vmatpush3.bf16.msra.mxu0 %v3178_v9  ;;  %v3193_v59 = vpack.c.bf16 %v2782_v57, %v2781_v56  ;;  %v2796_v57 = vld [vmem:[%s3774_s7] ss:$0 sm:$0xff] }
 0x6cf   : > { %3034 = vmatpush3.xpose.msk.msra.mxu1 %vm677_vm2, %v1569_v58  ;;  %3043 = vmatprep.subr.mxu0 %v3258_v11  ;;  %v2783_v58 = vld [vmem:[%s3769_s2 + $0x170] sm:$0xff] }
 0x6d0   : > { %3038 = vmatprep.subr.mxu1 %v3258_v11 }
 0x6d1   : > { %3031 = vmatmul.mubr.msk.f32.vlgmr.msra.gmra.mrb[14].mxu0 %vm437_vm1, %v3379_v16 }
 0x6d2   : > { %3045 = vmatprep.mubr.msk.f32.mxu0 %vm3257_vm0, %v3258_v11  ;;  %3044 = vmatpush3.msra.mxu0 %v2765_v26 }
 0x6d3   : > { %3186 = vmatprep.subr.bf16.mxu0 %v3256_v3 }
 0x794   : > { %v1329_v60 = vpop.f32.mrb[10].mxu0 }
 0x795   : > { %v3563_v61 = vadd.f32 %v1402_v54, %v1329_v60  ;;  %v2994_v62 = vpop.f32.mrb[11].mxu0  ;;  %v2784_v60 = vld [vmem:[%s3769_s2 + $0x178] sm:$0xff] }
 0x79c   : > { %v1485_v0 = vpop.f32.mrb[12].mxu0 }
 0x79d   : > { %v1486_v1 = vadd.f32 %v2746_v63, %v1485_v0  ;;  %v3010_v2 = vpop.f32.mrb[13].mxu0 }
 0x79f   : > { %3036 = vmatmul.mubr.msk.f32.vlgmr.msra.gmra.mrb[14].mxu1 %vm677_vm2, %v1486_v1 }
 0x7a0   : > { %3040 = vmatprep.mubr.msk.f32.mxu1 %vm3257_vm0, %v3258_v11 }
 0x7a4   : > { %v1651_v22 = vpop.f32.mrb[14].mxu0 }
 0x7a5   : > { %v3032_v24 = vpop.f32.mrb[15].mxu0  ;;  %v1652_v25 = vadd.f32 %v2760_v23, %v1651_v22 }
 0x7a7   : > { %3039 = vmatpush3.msra.mxu1 %v1652_v25 }
 0x7a8   : > { %3180 = vmatprep.subr.bf16.mxu1 %v3256_v3 }
 0x872   : > { %v1727_v10 = vpop.f32.mrb[14].mxu1 }
 0x873   : > { %v1731_v12 = vmul.f32 0.35355338, %v1727_v10  ;;  %v3037_v13 = vpop.f32.mrb[15].mxu1  ;;  %v2786_v10 = vld [vmem:[%s3770_s3 + $0xb] ss:$0 sm:$0xff] }
 0x875   : > { %v1732_v14 = vsel %vm760_vm4, %v1731_v12, -1e+09 }
 0x876   : > { %v1733_v15 = vsel %vm677_vm2, %v1732_v14, -inf }
 0x877   : > { %1734 = vmax.xlane.f32.xlu0 %v1733_v15 }
 0x904   : > { %v1735_v17 = vpop.xlane.xlu0 %1734 }
 0x905   : > { %v1736_v18 = vsub.f32 %v1732_v14, %v1735_v17 }
 0x907   : > { %v1737_v19 = vmul.f32 1.442695, %v1736_v18 }
 0x909   : > { %3236 = vpow2.f32 %v1737_v19 }
 0x913   : > { %v3237_v20 = vpop.eup %3236 }
 0x914   : > { %v1739_v21 = vsel %vm677_vm2, %v3237_v20, 0.0 }
 0x915   : > { %1740 = vadd.xlane.f32.xlu1 %v1739_v21  ;;  %v2793_v21 = vld [vmem:[%s3772_s5] ss:$0 sm:$0xff] }
 0x9a2   : > { %v1741_v27 = vpop.xlane.xlu1 %1740 }
 0x9a3   : > { %3238 = vrcp.f32 %v1741_v27 }
 0x9ad   : > { %v3239_v28 = vpop.eup %3238 }
 0x9ae   : > { %v1743_v29 = vmul.f32 %v3239_v28, %v3237_v20 }
 0x9b0   : > { %3041 = vmatmul.mubr.msk.f32.vlgmr.msra.gmra.mrb[16].mxu1 %vm677_vm2, %v1743_v29 }
 0x9b1   : > { %3056 = vmatprep.mubr.msk.f32.mxu1 %vm3257_vm0, %v3258_v11  ;;  %3182 = vmatpush3.bf16.msra.mxu1 %v3181_v32  ;;  %v2420_v32 = vld [vmem:[%s3773_s6 + $0x8] sm:$0xff] }
 0x9b2   : > { %3183 = vmatprep.subr.bf16.mxu1 %v3256_v3 }
 0x9b5   : > { %3185 = vmatpush3.bf16.msra.mxu1 %v3184_v35 }
 0x9b6   : > { %3192 = vmatprep.subr.bf16.mxu1 %v3256_v3 }
 0x9b8   : > { %3057 = vmatmul.mubr.msk.f32.vlgmr.msra.gmra.mrb[18].mxu1 %vm437_vm1, %v3379_v16 }
 0x9b9   : > { %3078 = vmatprep.mubr.msk.f32.mxu1 %vm3257_vm0, %v3258_v11  ;;  %3194 = vmatpush3.bf16.msra.mxu1 %v3193_v59 }
 0x9ba   : > { %3195 = vmatprep.subr.bf16.mxu1 %v3256_v3 }
 0xa83   : > { %v1813_v42 = vpop.f32.mrb[16].mxu1 }
 0xa84   : > { %v3042_v43 = vpop.f32.mrb[17].mxu1  ;;  %3046 = vmatmul.mubr.msk.f32.vlgmr.msra.gmra.mrb[16].mxu0 %vm677_vm2, %v1813_v42 }
 0xa85   : > { %3188 = vmatpush3.bf16.msra.mxu0 %v3187_v38  ;;  %3067 = vmatprep.mubr.msk.f32.mxu0 %vm3257_vm0, %v3258_v11  ;;  %v2506_v38 = vld [vmem:[%s3775_s8 + $0x10] sm:$0xff]  ;;  %v2508_v43 = vld [vmem:[%s3775_s8 + $0x20] sm:$0xff] }
 0xa86   : > { %3189 = vmatprep.subr.bf16.mxu0 %v3256_v3  ;;  %v3208_v42 = vpack.c.bf16 %v2507_v41, %v2506_v38 }
 0xa89   : > { %3191 = vmatpush3.bf16.msra.mxu0 %v3190_v44  ;;  %v2509_v44 = vld [vmem:[%s3775_s8 + $0x28] sm:$0xff] }
 0xa8a   : > { %3081 = vmatprep.subr.mxu0 %v3258_v11 }
 0xa8b   : > { %v1972_v45 = vpop.f32.mrb[18].mxu1 }
 0xa8c   : > { %3068 = vmatmul.mubr.msk.f32.vlgmr.msra.gmra.mrb[18].mxu0 %vm437_vm1, %v3379_v16  ;;  %v3058_v46 = vpop.f32.mrb[19].mxu1  ;;  %v1973_v55 = vadd.f32 %v2772_v51, %v1972_v45  ;;  %v3211_v45 = vpack.c.bf16 %v2509_v44, %v2508_v43 }
 0xa8d   : > { %3083 = vmatprep.mubr.msk.f32.mxu0 %vm3257_vm0, %v3258_v11 }
 0xb57   : > { %v1888_v47 = vpop.f32.mrb[16].mxu0 }
 0xb58   : > { %v1892_v48 = vadd.f32 %v1888_v47, %v3563_v61  ;;  %v3047_v49 = vpop.f32.mrb[17].mxu0  ;;  %v3196_v61 = vpack.c.bf16 %v2784_v60, %v2783_v58 }
 0xb5a   : > { %3197 = vmatpush3.bf16.msra.mxu1 %v3196_v61 }
 0xb5b   : > { %3091 = vmatprep.subr.mxu1 %v3258_v11 }
 0xb5d   : > { %3079 = vmatmul.mubr.msk.f32.vlgmr.msra.gmra.mrb[20].mxu1 %vm437_vm1, %v3379_v16 }
 0xb5e   : > { %3093 = vmatprep.mubr.msk.f32.mxu1 %vm3257_vm0, %v3258_v11  ;;  %3092 = vmatpush3.msra.mxu1 %v2791_v39 }
 0xb5f   : > { %v2055_v52 = vpop.f32.mrb[18].mxu0  ;;  %3204 = vmatprep.subr.bf16.mxu1 %v3256_v3 }
 0xb60   : > { %v2056_v53 = vadd.f32 %v2779_v50, %v2055_v52  ;;  %v3069_v54 = vpop.f32.mrb[19].mxu0  ;;  %v2794_v50 = vld [vmem:[%s3777_s10] ss:$0 sm:$0xff] }
 0xb61   : > { %v2795_v52 = vld [vmem:[%s3778_s11] ss:$0 sm:$0xff] }
 0xb62   : > { %3082 = vmatpush3.xpose.msk.msra.mxu0 %vm677_vm2, %v2056_v53 }
 0xb63   : > { %3086 = vmatprep.subr.mxu0 %v3258_v11 }
 0xb65   : > { %3084 = vmatmul.mubr.msk.f32.vlgmr.msra.gmra.mrb[20].mxu0 %vm677_vm2, %v1973_v55  ;;  %v2511_v55 = vld [vmem:[%s3775_s8 + $0x38] sm:$0xff] }
 0xb66   : > { %3088 = vmatprep.mubr.msk.f32.mxu0 %vm3257_vm0, %v3258_v11 }
 0xc30   : > { %v2138_v9 = vpop.f32.mrb[20].mxu1 }
 0xc31   : > { %v3080_v12 = vpop.f32.mrb[21].mxu1  ;;  %v2139_v13 = vadd.f32 %v2786_v10, %v2138_v9 }
 0xc33   : > { %3087 = vmatpush3.msra.mxu0 %v2139_v13 }
 0xc34   : > { %3198 = vmatprep.subr.bf16.mxu0 %v3256_v3 }
 0xc38   : > { %v2214_v62 = vpop.f32.mrb[20].mxu0 }
 0xc39   : > { %v2218_v63 = vmul.f32 0.35355338, %v2214_v62  ;;  %v3085_v0 = vpop.f32.mrb[21].mxu0  ;;  %v2798_v62 = vld [vmem:[%s3776_s9] ss:$0 sm:$0xff] }
 0xc3b   : > { %v2219_v1 = vsel %vm760_vm4, %v2218_v63, -1e+09 }
 0xc3c   : > { %v2220_v2 = vsel %vm677_vm2, %v2219_v1, -inf }
 0xc3d   : > { %2221 = vmax.xlane.f32.xlu0 %v2220_v2 }
 0xcca   : > { %v2222_v4 = vpop.xlane.xlu0 %2221 }
 0xccb   : > { %v2223_v5 = vsub.f32 %v2219_v1, %v2222_v4 }
 0xccd   : > { %v2224_v6 = vmul.f32 1.442695, %v2223_v5 }
 0xccf   : > { %3240 = vpow2.f32 %v2224_v6 }
 0xcd9   : > { %v3241_v7 = vpop.eup %3240 }
 0xcda   : > { %v2226_v8 = vsel %vm677_vm2, %v3241_v7, 0.0 }
 0xcdb   : > { %2227 = vadd.xlane.f32.xlu1 %v2226_v8 }
 0xd68   : > { %v2228_v14 = vpop.xlane.xlu1 %2227 }
 0xd69   : > { %3242 = vrcp.f32 %v2228_v14  ;;  %v2802_v14 = vld [vmem:[%s3777_s10 + $0x1] ss:$0 sm:$0xff] }
 0xd73   : > { %v3243_v15 = vpop.eup %3242 }
 0xd74   : > { %v2230_v17 = vmul.f32 %v3243_v15, %v3241_v7 }
 0xd76   : > { %3089 = vmatmul.mubr.msk.f32.vlgmr.msra.gmra.mrb[22].mxu0 %vm677_vm2, %v2230_v17  ;;  %v2803_v17 = vld [vmem:[%s3778_s11 + $0x1] ss:$0 sm:$0xff] }
 0xd77   : > { %3104 = vmatprep.mubr.msk.f32.mxu0 %vm3257_vm0, %v3258_v11 }
 0xe49   : > { %v2300_v18 = vpop.f32.mrb[22].mxu0 }
 0xe4a   : > { %v3090_v19 = vpop.f32.mrb[23].mxu0  ;;  %3094 = vmatmul.mubr.msk.f32.vlgmr.msra.gmra.mrb[22].mxu1 %vm677_vm2, %v2300_v18 }
 0xe4b   : > { %3123 = vmatprep.mubr.msk.f32.mxu1 %vm3257_vm0, %v3258_v11  ;;  %v2419_v11 = vld [vmem:[%s3773_s6] sm:$0xff]  ;;  %3206 = vmatpush3.bf16.msra.mxu1 %v3205_v40 }
 0xe4c   : > { %v3199_v33 = vpack.c.bf16 %v2420_v32, %v2419_v11  ;;  %3207 = vmatprep.subr.bf16.mxu1 %v3256_v3 }
 0xe4e   : > { %3200 = vmatpush3.bf16.msra.mxu0 %v3199_v33 }
 0xe4f   : > { %3201 = vmatprep.subr.bf16.mxu0 %v3256_v3  ;;  %3209 = vmatpush3.bf16.msra.mxu1 %v3208_v42 }
 0xe50   : > { %3210 = vmatprep.subr.bf16.mxu1 %v3256_v3 }
 0xe53   : > { %3212 = vmatpush3.bf16.msra.mxu1 %v3211_v45 }
 0xe54   : > { %3213 = vmatprep.subr.bf16.mxu1 %v3256_v3  ;;  %v2510_v3 = vld [vmem:[%s3775_s8 + $0x30] sm:$0xff] }
 0xe55   : > { %v3214_v56 = vpack.c.bf16 %v2511_v55, %v2510_v3 }
 0xe57   : > { %3215 = vmatpush3.bf16.msra.mxu1 %v3214_v56 }
 0xf1d   : > { %v2375_v20 = vpop.f32.mrb[22].mxu1 }
 0xf1e   : > { %v2379_v22 = vadd.f32 %v2375_v20, %v1892_v48  ;;  %v3095_v23 = vpop.f32.mrb[23].mxu1 }
 0xf20   : > { %v2387_v24 = vadd.f32 %v2793_v21, %v2379_v22 }
 0xf22   : > { %v2388_v25 = vadd.f32 %v2387_v24, %v3379_v16  ;;  %v2421_v16 = vld [vmem:[%s3773_s6 + $0x10] sm:$0xff] }
 0xf23   : > { %v3202_v35 = vpack.c.bf16 %v2422_v34, %v2421_v16 }
 0xf24   : > { %v2391_v26 = vsel %vm437_vm1, %v2388_v25, 0.0 }
 0xf25   : > { %2392 = vadd.xlane.f32.xlu0 %v2391_v26  ;;  %3203 = vmatpush3.bf16.msra.mxu0 %v3202_v35 }
 0xfb2   : > { %v2393_v27 = vpop.xlane.xlu0 %2392 }
 0xfb3   : > { %v2395_v28 = vmul.f32 0.03125, %v2393_v27 }
 0xfb5   : > { %v2396_v29 = vsub.f32 %v2388_v25, %v2395_v28 }
 0xfb7   : > { %v2397_v30 = vmul.f32 %v2396_v29, %v2396_v29 }
 0xfb9   : > { %v2398_v31 = vsel %vm437_vm1, %v2397_v30, 0.0 }
 0xfba   : > { %2399 = vadd.xlane.f32.xlu1 %v2398_v31 }
0x1047   : > { %v2400_v46 = vpop.xlane.xlu1 %2399 }
0x1048   : > { %v2401_v47 = vmul.f32 0.03125, %v2400_v46 }
0x104a   : > { %v2402_v48 = vadd.f32 1e-05, %v2401_v47 }
0x104c   : > { %3244 = vrsqrt.f32 %v2402_v48 }
0x1056   : > { %v3245_v49 = vpop.eup %3244 }
0x1057   : > { %v2404_v51 = vmul.f32 %v3245_v49, %v2396_v29 }
0x1059   : > { %v2411_v53 = vmul.f32 %v2794_v50, %v2404_v51 }
0x105b   : > { %v2418_v54 = vadd.f32 %v2795_v52, %v2411_v53 }
0x105d   : > { %3105 = vmatmul.mubr.msk.f32.vlgmr.msra.gmra.mrb[24].mxu0 %vm437_vm1, %v2418_v54 }
0x1130   : > { %v2499_v58 = vpop.f32.mrb[24].mxu0 }
0x1131   : > { %v2500_v59 = vadd.f32 %v2796_v57, %v2499_v58  ;;  %v3106_v60 = vpop.f32.mrb[25].mxu0 }
0x1133   : > { %v2503_v61 = vmax.f32 %v2500_v59, 0.0 }
0x1135   : > { %3124 = vmatmul.mubr.msk.f32.vlgmr.msra.gmra.mrb[24].mxu1 %vm2519_vm5, %v2503_v61 }
0x1208   : > { %v2589_v63 = vpop.f32.mrb[24].mxu1 }
0x1209   : > { %v2590_v0 = vadd.f32 %v2798_v62, %v2589_v63  ;;  %v3125_v1 = vpop.f32.mrb[25].mxu1 }
0x120b   : > { %v2593_v2 = vadd.f32 %v2590_v0, %v2418_v54 }
0x120d   : > { %v2598_v4 = vsel %vm437_vm1, %v2593_v2, 0.0 }
0x120e   : > { %2599 = vadd.xlane.f32.xlu0 %v2598_v4 }
0x129b   : > { %v2600_v5 = vpop.xlane.xlu0 %2599 }
0x129c   : > { %v2601_v6 = vmul.f32 0.03125, %v2600_v5 }
0x129e   : > { %v2602_v7 = vsub.f32 %v2593_v2, %v2601_v6 }
0x12a0   : > { %v2603_v8 = vmul.f32 %v2602_v7, %v2602_v7 }
0x12a2   : > { %v2604_v9 = vsel %vm437_vm1, %v2603_v8, 0.0 }
0x12a3   : > { %2605 = vadd.xlane.f32.xlu1 %v2604_v9 }
0x1330   : > { %v2606_v10 = vpop.xlane.xlu1 %2605 }
0x1331   : > { %v2607_v12 = vmul.f32 0.03125, %v2606_v10 }
0x1333   : > { %v2608_v13 = vadd.f32 1e-05, %v2607_v12 }
0x1335   : > { %3246 = vrsqrt.f32 %v2608_v13 }
0x133f   : > { %v3247_v39 = vpop.eup %3246 }
0x1340   : > { %v2610_v15 = vmul.f32 %v3247_v39, %v2602_v7 }
0x1342   : > { %v2617_v18 = vmul.f32 %v2802_v14, %v2610_v15 }
0x1344   : > { %v2624_v19 = vadd.f32 %v2803_v17, %v2617_v18 }
0x1346   : > { %2625 = vst.msk [vmem:[%s422_s14] sm:$0xff] %vm437_vm1, %v2624_v19 }
0x1347 PF: > { %s22_s21 = sadd.s32 1, %s3254_s21  }
0x1348   : > { %p19_p4 = scmp.ge.s32.totalorder %s22_s21, 4  }
0x134a   :  { %21 = sbr.rel (!%p19_p4) target bundleno = 1 (0x1), region = 128 }

// kernel: encoder_decoder_forward.3
= control target key start
LH: loop header
LB: loop body
LE: loop exit
PB: predicated region body
PF: predicated region fallthrough
CT: control target
= control target key end

     0   :  { %s7241_s0 = inlined_call_operand.vmem [shape: f32[2,8,32], index: 0, kind: input, shape index: {}]   ;;  %s7242_s1 = inlined_call_operand.vmem [shape: f32[2,8,32], index: 1, kind: input, shape index: {}]   ;;  %s7243_s2 = inlined_call_operand.vmem [shape: f32[2,1,8], index: 2, kind: input, shape index: {}]   ;;  %s7244_s3 = inlined_call_operand.vmem [shape: f32[2,1,8], index: 3, kind: input, shape index: {}]   ;;  %s7245_s4 = inlined_call_operand.vmem [shape: f32[3,4,32,8], index: 4, kind: input, shape index: {}]   ;;  %s7246_s5 = inlined_call_operand.vmem [shape: f32[3,4,1,8], index: 5, kind: input, shape index: {}]   ;;  %s7247_s6 = inlined_call_operand.vmem [shape: f32[4,8,32], index: 6, kind: input, shape index: {}]   ;;  %s7248_s7 = inlined_call_operand.vmem [shape: f32[1,32], index: 7, kind: input, shape index: {}]   ;;  %s7249_s8 = inlined_call_operand.vmem [shape: f32[3,4,32,8], index: 8, kind: input, shape index: {}]   ;;  %s7250_s9 = inlined_call_operand.vmem [shape: f32[3,4,1,8], index: 9, kind: input, shape index: {}]   ;;  %s7251_s10 = inlined_call_operand.vmem [shape: f32[4,8,32], index: 10, kind: input, shape index: {}]   ;;  %s7252_s11 = inlined_call_operand.vmem [shape: f32[1,32], index: 11, kind: input, shape index: {}]   ;;  %s7253_s12 = inlined_call_operand.vmem [shape: f32[32,64], index: 12, kind: input, shape index: {}]   ;;  %s7254_s13 = inlined_call_operand.vmem [shape: f32[1,64], index: 13, kind: input, shape index: {}]   ;;  %s7255_s14 = inlined_call_operand.vmem [shape: f32[64,32], index: 14, kind: input, shape index: {}]   ;;  %s7256_s15 = inlined_call_operand.vmem [shape: f32[1,32], index: 15, kind: input, shape index: {}]   ;;  %s7257_s16 = inlined_call_operand.vmem [shape: f32[3,1,32], index: 16, kind: input, shape index: {}]   ;;  %s7258_s17 = inlined_call_operand.vmem [shape: f32[3,1,32], index: 17, kind: input, shape index: {}]   ;;  %s7259_s18 = inlined_call_operand.vmem [shape: f32[32,16], index: 18, kind: input, shape index: {}]   ;;  %s7260_s19 = inlined_call_operand.vmem [shape: f32[1,16], index: 19, kind: input, shape index: {}]   ;;  %s7261_s20 = inlined_call_operand.hbm [shape: f32[2,8,16], index: 20, kind: output, shape index: {}]  }
   0x1   :  { %7268 = sst [smem:[#allocation10_spill]] %s7241_s0 }
   0x2   :  { %7269 = sst [smem:[#allocation11_spill]] %s7242_s1 }
   0x3   :  { %7270 = sst [smem:[#allocation12_spill]] %s7243_s2 }
   0x4   :  { %7271 = sst [smem:[#allocation13_spill]] %s7244_s3 }
   0x5   :  { %7272 = sst [smem:[#allocation14_spill]] %s7245_s4 }
   0x6   :  { %7273 = sst [smem:[#allocation15_spill]] %s7246_s5 }
   0x7   :  { %25 = vsyncpa [#allocation3], 0 }
   0x8   :  { %27 = vsyncpa [#allocation3 + $0x1], 0  ;;  %s6325_s1 = smov 0   ;;  %s6327_s22 = smov 0  }
   0x9   :  { %s6329_s23 = smov 0   ;;  %s6331_s24 = smov 0  }
   0xa LB: > { %7274 = sst [smem:[#allocation5_spill]] %s6201_s1  ;;  %s6346_s2 = sadd.s32 4294967295, %s6213_s24   ;;  %s6213_s24 = sphi %s6331_s24, %s7291_s24   ;;  %s6209_s23 = sphi %s6329_s23, %s7293_s23   ;;  %s6205_s22 = sphi %s6327_s22, %s7295_s22   ;;  %s6201_s1 = sphi %s6325_s1, %s7294_s1  }
   0xb   : > { %7275 = sst [smem:[#allocation6_spill]] %s6209_s23  ;;  %s5065_s25 = sadd.s32 4294967294, %s6213_s24  }
   0xc   : > { %s6350_s3 = sadd.s32 1, %s6213_s24   ;;  %s480_s26 = sadd.s32 1, %s6209_s23 }
   0xd   : > { %7276 = sst [smem:[#allocation7_spill]] %s6350_s3  ;;  %s477_s27 = ssub.s32 %s6213_s24, %s6350_s3 }
   0xe   : > { %p490_p0 = scmp.ne.s32.totalorder %s6209_s23, %s6205_s22  ;;  %p478_p1 = scmp.eq.s32.totalorder %s477_s27, 0 }
   0xf   : > { %p491_p2 = scmp.eq.s32.totalorder %s6346_s2, 1  ;;  %p496_p3 = scmp.ne.s32.totalorder %s6205_s22, %s6201_s1 }
  0x10   : > { %p497_p4 = scmp.eq.s32.totalorder %s5065_s25, 1  ;;  %p5068_p7 = scmp.ge.s32.totalorder %s6213_s24, 1 }
  0x11   : > { %s6361_s28 = scalar_select %p478_p1, %s6209_s23, %s480_s26  }
  0x12   : > { %p6363_p5 = por %p491_p2, %p490_p0  ;;  %p6367_p6 = por %p497_p4, %p496_p3 }
  0x13   : > { %7277 = sst [smem:[#allocation8_spill]] %s6361_s28  ;;  %p589_p8 = scmp.lt.s32.totalorder %s6213_s24, 3 }
  0x14   : > { %s7279_s29 = scalar_select %p6367_p6, 1, 0 }
  0x15   : > { %p590_p9 = pnand %p5068_p7, %p589_p8 }
  0x16   : > { %7280 = sst [smem:[#allocation9_spill]] %s7279_s29  ;;  %s7281_s21 = sld [smem:[#allocation14_spill]] (!%p590_p9)  ;;  %v6215_v3 = vmov (!%p590_p9), 0.0|0.0   ;;  %vm6216_vm0 = vmmov (!%p590_p9), 0   ;;  %v6217_v11 = vmov (!%p590_p9), 0.0   ;;  %vm699_vm1 = vcmask (!%p590_p9), 261120  }
  0x17   : > { %593 = sbr.rel (%p590_p9) target bundleno = 9352 (0x2488), region = 100  ;;  %5908 = vmatprep.subr.bf16.mxu1 (!%p590_p9), %v6215_v3  ;;  %5902 = vmatprep.subr.bf16.mxu0 (!%p590_p9), %v6215_v3  ;;  %p656_p10 = scmp.lt.s32.totalorder (!%p590_p9), %s6346_s2, 1  ;;  %vm939_vm2 = vcmask (!%p590_p9), 64512   ;;  %v676_v29 = vlaneseq (!%p590_p9)  ;;  %v6218_v33 = vmov (!%p590_p9), 0   ;;  %v5168_v38 = vld [vmem:[%s7247_s6 + $0x18] sm:$0xff] (!%p590_p9)  ;;  %vm4770_vm9 = vcmask (!%p590_p9), 523264  }
  0x18   : > { %5496 = vmatprep.mubr.msk.f32.mxu1 (!%p590_p9), %vm6216_vm0, %v6217_v11  ;;  %5485 = vmatprep.mubr.msk.f32.mxu0 (!%p590_p9), %vm6216_vm0, %v6217_v11  ;;  %s7282_s30 = sld [smem:[#allocation10_spill]] (!%p590_p9)  ;;  %s7283_s5 = sld [smem:[#allocation15_spill]] (!%p590_p9)  ;;  %vm4960_vm10 = vcmask (!%p590_p9), 130048  }
  0x19   : > { %v6460_v31 = vshrl.u32 (!%p590_p9), %v676_v29, 7  ;;  %v679_v35 = vand.u32 (!%p590_p9), 127, %v676_v29  ;;  %s653_s28 = sand.u32 (!%p590_p9), 1, %s6205_s22  }
  0x1a   : > { %s5069_s27 = sshll.u32 (!%p590_p9), %s653_s28, 3 }
  0x1b   : > { %v684_v32 = vsub.s32 (!%p590_p9), 0, %v6460_v31  ;;  %vm680_vm4 = vcmp.ge.s32.totalorder (!%p590_p9), %v6460_v31, %v679_v35 }
  0x1c   : > { %v5074_v0 = vld [vmem:[%s7281_s21 + $0x80] sm:$0xff] (!%p590_p9)  ;;  %v5075_v1 = vld [vmem:[%s7281_s21 + $0x88] sm:$0xff] (!%p590_p9)  ;;  %v5076_v6 = vld [vmem:[%s7281_s21 + $0x90] sm:$0xff] (!%p590_p9) }
  0x1d   : > { %v688_v2 = vld [vmem:[%s7281_s21] sm:$0xff] (!%p590_p9)  ;;  %v5909_v4 = vpack.c.bf16 (!%p590_p9), %v5075_v1, %v5074_v0  ;;  %v689_v5 = vld [vmem:[%s7281_s21 + $0x8] sm:$0xff] (!%p590_p9)  ;;  %v5077_v7 = vld [vmem:[%s7281_s21 + $0x98] sm:$0xff] (!%p590_p9) }
  0x1e   : > { %v5903_v8 = vpack.c.bf16 %v689_v5, %v688_v2  ;;  %v690_v9 = vld [vmem:[%s7281_s21 + $0x10] sm:$0xff]  ;;  %v691_v10 = vld [vmem:[%s7281_s21 + $0x18] sm:$0xff]  ;;  %v5912_v12 = vpack.c.bf16 %v5077_v7, %v5076_v6  ;;  %s6405_s23 = scalar_select %p656_p10, %s6346_s2, 1  ;;  %v5079_v15 = vld [vmem:[%s7283_s5 + $0x4] ss:$0 sm:$0xff] }
  0x1f   : > { %5910 = vmatpush3.bf16.msra.mxu1 %v5909_v4  ;;  %v5906_v13 = vpack.c.bf16 %v691_v10, %v690_v9  ;;  %v5072_v16 = vld [vmem:[%s7283_s5] ss:$0 sm:$0xff]  ;;  %v5082_v24 = vld [vmem:[%s7281_s21 + $0x108] sm:$0xff]  ;;  %v5083_v25 = vld [vmem:[%s7281_s21 + $0x110] sm:$0xff] }
  0x20   : > { %5904 = vmatpush3.bf16.msra.mxu0 %v5903_v8  ;;  %5911 = vmatprep.subr.bf16.mxu1 %v6215_v3  ;;  %s5070_s1 = sshll.u32 %s6405_s23, 3  ;;  %v5081_v23 = vld [vmem:[%s7281_s21 + $0x100] sm:$0xff]  ;;  %v5084_v27 = vld [vmem:[%s7281_s21 + $0x118] sm:$0xff]  ;;  %v5086_v49 = vld [vmem:[%s7283_s5 + $0x8] ss:$0 sm:$0xff] }
  0x21   : > { %5905 = vmatprep.subr.bf16.mxu0 %v6215_v3  ;;  %s659_s0 = scalar_lea.vmem %s7282_s30, %s5070_s1  ;;  %v5915_v26 = vpack.c.bf16 %v5082_v24, %v5081_v23  ;;  %v5918_v28 = vpack.c.bf16 %v5084_v27, %v5083_v25  ;;  %s7284_s30 = sld [smem:[#allocation12_spill]]  ;;  %v5091_v52 = vld [vmem:[%s7281_s21 + $0x20] sm:$0xff]  ;;  %v5092_v53 = vld [vmem:[%s7281_s21 + $0x28] sm:$0xff]  ;;  %v5093_v55 = vld [vmem:[%s7281_s21 + $0x30] sm:$0xff] }
  0x22   : > { %v6415_v14 = vld [vmem:[%s659_s0] sm:$0xff]  ;;  %v5921_v54 = vpack.c.bf16 %v5092_v53, %v5091_v52  ;;  %v5094_v56 = vld [vmem:[%s7281_s21 + $0x38] sm:$0xff]  ;;  %v5099_v60 = vld [vmem:[%s7281_s21 + $0xa8] sm:$0xff] }
  0x23   : > { %5913 = vmatpush3.bf16.msra.mxu1 %v5912_v12  ;;  %v5924_v57 = vpack.c.bf16 %v5094_v56, %v5093_v55  ;;  %v5098_v59 = vld [vmem:[%s7281_s21 + $0xa0] sm:$0xff]  ;;  %v5100_v0 = vld [vmem:[%s7281_s21 + $0xb0] sm:$0xff]  ;;  %v5101_v1 = vld [vmem:[%s7281_s21 + $0xb8] sm:$0xff] }
  0x24   : > { %5907 = vmatpush3.bf16.msra.mxu0 %v5906_v13  ;;  %5510 = vmatprep.subr.mxu1 %v6217_v11  ;;  %v5927_v62 = vpack.c.bf16 %v5099_v60, %v5098_v59  ;;  %v5930_v2 = vpack.c.bf16 %v5101_v1, %v5100_v0  ;;  %v5103_v8 = vld [vmem:[%s7283_s5 + $0x5] ss:$0 sm:$0xff]  ;;  %v5096_v9 = vld [vmem:[%s7283_s5 + $0x1] ss:$0 sm:$0xff]  ;;  %v5119_v52 = vld [vmem:[%s7281_s21 + $0x48] sm:$0xff] }
  0x25   : > { %5914 = vmatprep.subr.bf16.mxu0 %v6215_v3  ;;  %v5121_v55 = vld [vmem:[%s7281_s21 + $0x58] sm:$0xff] }
  0x26   : > { %5497 = vmatmul.mubr.msk.f32.vlgmr.msra.gmra.mrb[0].mxu1 %vm699_vm1, %v6415_v14 }
  0x27   : > { %5486 = vmatmul.mubr.msk.f32.vlgmr.msra.gmra.mrb[0].mxu0 %vm699_vm1, %v6415_v14  ;;  %5512 = vmatprep.mubr.msk.f32.mxu1 %vm6216_vm0, %v6217_v11  ;;  %s666_s0 = scalar_lea.vmem %s7284_s30, %s6405_s23  ;;  %s5287_s30 = sshll.u32 %s6346_s2, 7 }
  0x28   : > { %5507 = vmatprep.mubr.msk.f32.mxu0 %vm6216_vm0, %v6217_v11  ;;  %5916 = vmatpush3.bf16.msra.mxu0 %v5915_v26  ;;  %v672_v30 = vld [vmem:[%s666_s0] sm:$0x1]  ;;  %s7288_s0 = sld [smem:[#allocation13_spill]]  ;;  %s6219_s2 = smov [#allocation2]  }
  0x29   : > { %5917 = vmatprep.subr.bf16.mxu0 %v6215_v3  ;;  %vm673_vm3 = vcmp.gt.f32.partialorder %v672_v30, 0.0 }
  0x2a   : > { %v681_v34 = vsel %vm673_vm3, 1, %v6218_v33 }
  0x2b   : > { %v685_v36 = vrot.slane %v681_v34, %v684_v32 }
  0x2c   : > { %5919 = vmatpush3.bf16.msra.mxu0 %v5918_v28 }
  0x2d   : > { %5920 = vmatprep.subr.bf16.mxu0 %v6215_v3  ;;  %vm686_vm5 = vcmp.eq.s32.totalorder %v685_v36, 1  ;;  %v5110_v36 = vld [vmem:[%s7283_s5 + $0x9] ss:$0 sm:$0xff] }
  0x2e   : > { %vm6467_vm6 = vmand %vm680_vm4, %vm686_vm5 }
  0x2f   : > { %5508 = vmatmul.mubr.msk.f32.vlgmr.msra.gmra.mrb[2].mxu0 %vm699_vm1, %v6415_v14 }
  0x30   : > { %5528 = vmatprep.mubr.msk.f32.mxu0 %vm6216_vm0, %v6217_v11  ;;  %5922 = vmatpush3.bf16.msra.mxu0 %v5921_v54  ;;  %v5120_v54 = vld [vmem:[%s7281_s21 + $0x50] sm:$0xff] }
  0x31   : > { %5923 = vmatprep.subr.bf16.mxu0 %v6215_v3 }
  0x34   : > { %5925 = vmatpush3.bf16.msra.mxu0 %v5924_v57 }
  0x35   : > { %5932 = vmatprep.subr.bf16.mxu0 %v6215_v3 }
  0x37   : > { %5529 = vmatmul.mubr.msk.f32.vlgmr.msra.gmra.mrb[4].mxu0 %vm699_vm1, %v6415_v14 }
  0x38   : > { %5550 = vmatprep.mubr.msk.f32.mxu0 %vm6216_vm0, %v6217_v11 }
  0xf9   : > { %v852_v17 = vpop.f32.mrb[0].mxu1 }
  0xfa   : > { %v853_v18 = vadd.f32 %v5079_v15, %v852_v17  ;;  %v5498_v19 = vpop.f32.mrb[1].mxu1  ;;  %v769_v20 = vpop.f32.mrb[0].mxu0  ;;  %v5106_v17 = vld [vmem:[%s7281_s21 + $0x128] sm:$0xff] }
  0xfb   : > { %v770_v21 = vadd.f32 %v5072_v16, %v769_v20  ;;  %v5487_v22 = vpop.f32.mrb[1].mxu0  ;;  %v5105_v16 = vld [vmem:[%s7281_s21 + $0x120] sm:$0xff]  ;;  %v5108_v20 = vld [vmem:[%s7281_s21 + $0x138] sm:$0xff] }
  0xfc   : > { %5511 = vmatpush3.xpose.msk.msra.mxu1 %vm939_vm2, %v853_v18  ;;  %v5107_v18 = vld [vmem:[%s7281_s21 + $0x130] sm:$0xff]  ;;  %v5933_v19 = vpack.c.bf16 %v5106_v17, %v5105_v16 }
  0xfd   : > { %5515 = vmatprep.subr.mxu1 %v6217_v11 }
  0xfe   : > { %5934 = vmatpush3.bf16.msra.mxu0 %v5933_v19 }
  0xff   : > { %5513 = vmatmul.mubr.msk.f32.vlgmr.msra.gmra.mrb[2].mxu1 %vm939_vm2, %v770_v21  ;;  %v5936_v21 = vpack.c.bf16 %v5108_v20, %v5107_v18  ;;  %5935 = vmatprep.subr.bf16.mxu0 %v6215_v3 }
 0x100   : > { %5517 = vmatprep.mubr.msk.f32.mxu1 %vm6216_vm0, %v6217_v11 }
 0x102   : > { %v935_v48 = vpop.f32.mrb[2].mxu0  ;;  %5937 = vmatpush3.bf16.msra.mxu0 %v5936_v21 }
 0x103   : > { %v5509_v50 = vpop.f32.mrb[3].mxu0  ;;  %v936_v51 = vadd.f32 %v5086_v49, %v935_v48  ;;  %5563 = vmatprep.subr.mxu0 %v6217_v11  ;;  %v5127_v48 = vld [vmem:[%s7281_s21 + $0xd0] sm:$0xff]  ;;  %v5128_v49 = vld [vmem:[%s7281_s21 + $0xd8] sm:$0xff] }
 0x104   : > { %v5948_v50 = vpack.c.bf16 %v5128_v49, %v5127_v48  ;;  %v5153_v48 = vld [vmem:[%s7281_s21 + $0xf0] sm:$0xff]  ;;  %v5154_v49 = vld [vmem:[%s7281_s21 + $0xf8] sm:$0xff] }
 0x105   : > { %5516 = vmatpush3.msra.mxu1 %v936_v51  ;;  %5551 = vmatmul.mubr.msk.f32.vlgmr.msra.gmra.mrb[6].mxu0 %vm699_vm1, %v6415_v14  ;;  %v5118_v51 = vld [vmem:[%s7281_s21 + $0x40] sm:$0xff] }
 0x106   : > { %5926 = vmatprep.subr.bf16.mxu1 %v6215_v3  ;;  %5565 = vmatprep.mubr.msk.f32.mxu0 %vm6216_vm0, %v6217_v11  ;;  %v5939_v53 = vpack.c.bf16 %v5119_v52, %v5118_v51  ;;  %v5966_v52 = vpack.c.bf16 %v5154_v49, %v5153_v48  ;;  %v5177_v49 = vld [vmem:[%s7249_s8 + $0x90] sm:$0xff] }
 0x10a   : > { %v1182_v4 = vpop.f32.mrb[4].mxu0 }
 0x10b   : > { %v5530_v5 = vpop.f32.mrb[5].mxu0  ;;  %v1183_v15 = vadd.f32 %v5096_v9, %v1182_v4  ;;  %v5132_v9 = vld [vmem:[%s7281_s21 + $0x140] sm:$0xff] }
 0x10c   : > { %v5123_v5 = vld [vmem:[%s7283_s5 + $0x2] ss:$0 sm:$0xff] }
 0x1d2   : > { %v1012_v37 = vpop.f32.mrb[2].mxu1 }
 0x1d3   : > { %v1016_v39 = vmul.f32 0.35355338, %v1012_v37  ;;  %v5514_v40 = vpop.f32.mrb[3].mxu1 }
 0x1d4   : > { %v5115_v40 = vld [vmem:[%s7247_s6 + $0x8] sm:$0xff] }
 0x1d5   : > { %v1017_v41 = vsel %vm6467_vm6, %v1016_v39, -1e+09  ;;  %5564 = vmatpush3.msra.mxu0 %v5115_v40  ;;  %v5145_v40 = vld [vmem:[%s7281_s21 + $0x68] sm:$0xff] }
 0x1d6   : > { %v1018_v42 = vsel %vm939_vm2, %v1017_v41, -inf  ;;  %5938 = vmatprep.subr.bf16.mxu0 %v6215_v3 }
 0x1d7   : > { %1019 = vmax.xlane.f32.xlu0 %v1018_v42 }
 0x1d8   : > { %v1348_v35 = vpop.f32.mrb[6].mxu0 }
 0x1d9   : > { %v5552_v37 = vpop.f32.mrb[7].mxu0  ;;  %v1349_v39 = vadd.f32 %v5110_v36, %v1348_v35 }
 0x264   : > { %v1020_v43 = vpop.xlane.xlu0 %1019 }
 0x265   : > { %v1021_v44 = vsub.f32 %v1017_v41, %v1020_v43 }
 0x267   : > { %v1022_v45 = vmul.f32 1.442695, %v1021_v44  ;;  %v1102_v44 = vld [vmem:[%s7247_s6] sm:$0xff] }
 0x269   : > { %6113 = vpow2.f32 %v1022_v45  ;;  %v5125_v45 = vld [vmem:[%s7281_s21 + $0xc0] sm:$0xff] }
 0x273   : > { %v6114_v46 = vpop.eup %6113 }
 0x274   : > { %v1024_v47 = vsel %vm939_vm2, %v6114_v46, 0.0 }
 0x275   : > { %1025 = vadd.xlane.f32.xlu0 %v1024_v47 }
 0x302   : > { %v1026_v58 = vpop.xlane.xlu0 %1025 }
 0x303   : > { %6115 = vrcp.f32 %v1026_v58  ;;  %v5942_v58 = vpack.c.bf16 %v5121_v55, %v5120_v54 }
 0x30d   : > { %v6116_v61 = vpop.eup %6115 }
 0x30e   : > { %v1028_v63 = vmul.f32 %v6116_v61, %v6114_v46  ;;  %v5126_v46 = vld [vmem:[%s7281_s21 + $0xc8] sm:$0xff]  ;;  %v5130_v61 = vld [vmem:[%s7283_s5 + $0x6] ss:$0 sm:$0xff] }
 0x30f   : > { %v5945_v47 = vpack.c.bf16 %v5126_v46, %v5125_v45  ;;  %v5151_v45 = vld [vmem:[%s7281_s21 + $0xe0] sm:$0xff]  ;;  %v5152_v46 = vld [vmem:[%s7281_s21 + $0xe8] sm:$0xff] }
 0x310   : > { %5518 = vmatmul.mubr.msk.f32.vlgmr.msra.gmra.mrb[4].mxu1 %vm939_vm2, %v1028_v63 }
 0x311   : > { %5928 = vmatpush3.bf16.msra.mxu1 %v5927_v62  ;;  %5539 = vmatprep.mubr.msk.f32.mxu1 %vm6216_vm0, %v6217_v11 }
 0x312   : > { %5929 = vmatprep.subr.bf16.mxu1 %v6215_v3 }
 0x315   : > { %5931 = vmatpush3.bf16.msra.mxu1 %v5930_v2 }
 0x316   : > { %5553 = vmatprep.subr.mxu1 %v6217_v11 }
 0x318   : > { %5540 = vmatmul.mubr.msk.f32.vlgmr.msra.gmra.mrb[6].mxu1 %vm699_vm1, %v6415_v14 }
 0x319   : > { %5555 = vmatprep.mubr.msk.f32.mxu1 %vm6216_vm0, %v6217_v11 }
 0x3e3   : > { %v1098_v6 = vpop.f32.mrb[4].mxu1 }
 0x3e4   : > { %v5519_v7 = vpop.f32.mrb[5].mxu1 }
 0x3eb   : > { %v1265_v10 = vpop.f32.mrb[6].mxu1 }
 0x3ec   : > { %v1266_v12 = vadd.f32 %v5103_v8, %v1265_v10  ;;  %v5541_v13 = vpop.f32.mrb[7].mxu1  ;;  %v5133_v10 = vld [vmem:[%s7281_s21 + $0x148] sm:$0xff] }
 0x3ed   : > { %v5951_v13 = vpack.c.bf16 %v5133_v10, %v5132_v9 }
 0x3ee   : > { %5554 = vmatpush3.xpose.msk.msra.mxu1 %vm939_vm2, %v1266_v12  ;;  %v5134_v12 = vld [vmem:[%s7281_s21 + $0x150] sm:$0xff] }
 0x3ef   : > { %5558 = vmatprep.subr.mxu1 %v6217_v11 }
 0x3f1   : > { %5556 = vmatmul.mubr.msk.f32.vlgmr.msra.gmra.mrb[8].mxu1 %vm939_vm2, %v1183_v15  ;;  %v5135_v15 = vld [vmem:[%s7281_s21 + $0x158] sm:$0xff] }
 0x3f2   : > { %5560 = vmatprep.mubr.msk.f32.mxu1 %vm6216_vm0, %v6217_v11  ;;  %5559 = vmatpush3.msra.mxu1 %v1349_v39  ;;  %v5954_v16 = vpack.c.bf16 %v5135_v15, %v5134_v12  ;;  %v5144_v39 = vld [vmem:[%s7281_s21 + $0x60] sm:$0xff] }
 0x3f3   : > { %5568 = vmatprep.subr.mxu1 %v6217_v11 }
 0x4c4   : > { %v1424_v22 = vpop.f32.mrb[8].mxu1 }
 0x4c5   : > { %v1428_v23 = vmul.f32 0.35355338, %v1424_v22  ;;  %v5557_v24 = vpop.f32.mrb[9].mxu1 }
 0x4c7   : > { %v1429_v25 = vsel %vm6467_vm6, %v1428_v23, -1e+09 }
 0x4c8   : > { %v1430_v26 = vsel %vm939_vm2, %v1429_v25, -inf }
 0x4c9   : > { %1431 = vmax.xlane.f32.xlu1 %v1430_v26 }
 0x556   : > { %v1432_v27 = vpop.xlane.xlu1 %1431 }
 0x557   : > { %v1433_v28 = vsub.f32 %v1429_v25, %v1432_v27 }
 0x559   : > { %v1434_v29 = vmul.f32 1.442695, %v1433_v28  ;;  %v5137_v28 = vld [vmem:[%s7283_s5 + $0xa] ss:$0 sm:$0xff] }
 0x55b   : > { %6117 = vpow2.f32 %v1434_v29 }
 0x565   : > { %v6118_v30 = vpop.eup %6117 }
 0x566   : > { %v1436_v34 = vsel %vm939_vm2, %v6118_v30, 0.0 }
 0x567   : > { %1437 = vadd.xlane.f32.xlu1 %v1436_v34  ;;  %v5142_v34 = vld [vmem:[%s7247_s6 + $0x10] sm:$0xff] }
 0x5f4   : > { %v1438_v41 = vpop.xlane.xlu1 %1437 }
 0x5f5   : > { %6119 = vrcp.f32 %v1438_v41  ;;  %v5957_v41 = vpack.c.bf16 %v5145_v40, %v5144_v39 }
 0x5ff   : > { %v6120_v42 = vpop.eup %6119 }
 0x600   : > { %v1440_v43 = vmul.f32 %v6120_v42, %v6118_v30  ;;  %v5146_v42 = vld [vmem:[%s7281_s21 + $0x70] sm:$0xff] }
 0x602   : > { %5561 = vmatmul.mubr.msk.f32.vlgmr.msra.gmra.mrb[10].mxu1 %vm939_vm2, %v1440_v43  ;;  %v5147_v43 = vld [vmem:[%s7281_s21 + $0x78] sm:$0xff] }
 0x603   : > { %5569 = vmatpush3.msra.mxu1 %v1102_v44  ;;  %5570 = vmatprep.mubr.msk.f32.mxu1 %vm6216_vm0, %v6217_v11  ;;  %v5960_v44 = vpack.c.bf16 %v5147_v43, %v5146_v42 }
 0x604   : > { %5944 = vmatprep.subr.bf16.mxu1 %v6215_v3 }
 0x606   : > { %5571 = vmatmul.mubr.msk.f32.vlgmr.msra.gmra.mrb[12].mxu1 %vm939_vm2, %v1098_v6 }
 0x607   : > { %5946 = vmatpush3.bf16.msra.mxu1 %v5945_v47  ;;  %5592 = vmatprep.mubr.msk.f32.mxu1 %vm6216_vm0, %v6217_v11  ;;  %v5963_v47 = vpack.c.bf16 %v5152_v46, %v5151_v45  ;;  %v5176_v45 = vld [vmem:[%s7249_s8 + $0x88] sm:$0xff]  ;;  %v2675_v46 = vld [vmem:[%s7249_s8] sm:$0xff] }
 0x608   : > { %5947 = vmatprep.subr.bf16.mxu1 %v6215_v3 }
 0x60b   : > { %5949 = vmatpush3.bf16.msra.mxu1 %v5948_v50 }
 0x60c   : > { %5606 = vmatprep.subr.mxu1 %v6217_v11 }
 0x60e   : > { %5593 = vmatmul.mubr.msk.f32.vlgmr.msra.gmra.mrb[14].mxu1 %vm699_vm1, %v6415_v14 }
 0x60f   : > { %5608 = vmatprep.mubr.msk.f32.mxu1 %vm6216_vm0, %v6217_v11 }
 0x6d5   : > { %v1510_v56 = vpop.f32.mrb[10].mxu1 }
 0x6d6   : > { %v5562_v57 = vpop.f32.mrb[11].mxu1  ;;  %5566 = vmatmul.mubr.msk.f32.vlgmr.msra.gmra.mrb[8].mxu0 %vm939_vm2, %v1510_v56 }
 0x6d7   : > { %5940 = vmatpush3.bf16.msra.mxu0 %v5939_v53  ;;  %5581 = vmatprep.mubr.msk.f32.mxu0 %vm6216_vm0, %v6217_v11 }
 0x6d8   : > { %5941 = vmatprep.subr.bf16.mxu0 %v6215_v3 }
 0x6d9   : > { %v1658_v59 = vpop.f32.mrb[12].mxu1 }
 0x6da   : > { %v5572_v60 = vpop.f32.mrb[13].mxu1 }
 0x6db   : > { %5943 = vmatpush3.bf16.msra.mxu0 %v5942_v58  ;;  %v5156_v58 = vld [vmem:[%s7283_s5 + $0x7] ss:$0 sm:$0xff] }
 0x6dc   : > { %5950 = vmatprep.subr.bf16.mxu0 %v6215_v3 }
 0x6de   : > { %5582 = vmatmul.mubr.msk.f32.vlgmr.msra.gmra.mrb[10].mxu0 %vm699_vm1, %v6415_v14 }
 0x6df   : > { %5603 = vmatprep.mubr.msk.f32.mxu0 %vm6216_vm0, %v6217_v11  ;;  %5952 = vmatpush3.bf16.msra.mxu0 %v5951_v13 }
 0x6e0   : > { %5953 = vmatprep.subr.bf16.mxu0 %v6215_v3 }
 0x6e1   : > { %v1824_v62 = vpop.f32.mrb[14].mxu1 }
 0x6e2   : > { %v1825_v63 = vadd.f32 %v5130_v61, %v1824_v62  ;;  %v5594_v0 = vpop.f32.mrb[15].mxu1 }
 0x6e3   : > { %5955 = vmatpush3.bf16.msra.mxu0 %v5954_v16  ;;  %v5158_v0 = vld [vmem:[%s7281_s21 + $0x160] sm:$0xff] }
 0x6e4   : > { %5607 = vmatpush3.xpose.msk.msra.mxu1 %vm939_vm2, %v1825_v63  ;;  %5616 = vmatprep.subr.mxu0 %v6217_v11 }
 0x6e5   : > { %5611 = vmatprep.subr.mxu1 %v6217_v11 }
 0x6e6   : > { %5604 = vmatmul.mubr.msk.f32.vlgmr.msra.gmra.mrb[12].mxu0 %vm699_vm1, %v6415_v14 }
 0x6e7   : > { %5618 = vmatprep.mubr.msk.f32.mxu0 %vm6216_vm0, %v6217_v11  ;;  %5617 = vmatpush3.msra.mxu0 %v5142_v34 }
 0x6e8   : > { %5962 = vmatprep.subr.bf16.mxu0 %v6215_v3 }
 0x7a9   : > { %v1585_v1 = vpop.f32.mrb[8].mxu0 }
 0x7aa   : > { %v6613_v2 = vadd.f32 %v1658_v59, %v1585_v1  ;;  %v5567_v4 = vpop.f32.mrb[9].mxu0  ;;  %v5149_v59 = vld [vmem:[%s7283_s5 + $0x3] ss:$0 sm:$0xff]  ;;  %v5159_v1 = vld [vmem:[%s7281_s21 + $0x168] sm:$0xff] }
 0x7ab   : > { %v5969_v4 = vpack.c.bf16 %v5159_v1, %v5158_v0  ;;  %v5172_v0 = vld [vmem:[%s7258_s17] ss:$0 sm:$0xff] }
 0x7b1   : > { %v1741_v6 = vpop.f32.mrb[10].mxu0 }
 0x7b2   : > { %v1742_v7 = vadd.f32 %v5123_v5, %v1741_v6  ;;  %v5583_v8 = vpop.f32.mrb[11].mxu0  ;;  %v5161_v5 = vld [vmem:[%s7281_s21 + $0x178] sm:$0xff] }
 0x7b4   : > { %5609 = vmatmul.mubr.msk.f32.vlgmr.msra.gmra.mrb[16].mxu1 %vm939_vm2, %v1742_v7 }
 0x7b5   : > { %5613 = vmatprep.mubr.msk.f32.mxu1 %vm6216_vm0, %v6217_v11 }
 0x7b9   : > { %v1907_v27 = vpop.f32.mrb[12].mxu0 }
 0x7ba   : > { %v5605_v29 = vpop.f32.mrb[13].mxu0  ;;  %v1908_v30 = vadd.f32 %v5137_v28, %v1907_v27 }
 0x7bb   : > { %v5170_v29 = vld [vmem:[%s7248_s7] ss:$0 sm:$0xff] }
 0x7bc   : > { %5612 = vmatpush3.msra.mxu1 %v1908_v30 }
 0x7bd   : > { %5956 = vmatprep.subr.bf16.mxu1 %v6215_v3 }
 0x887   : > { %v1983_v17 = vpop.f32.mrb[16].mxu1 }
 0x888   : > { %v1987_v18 = vmul.f32 0.35355338, %v1983_v17  ;;  %v5610_v19 = vpop.f32.mrb[17].mxu1 }
 0x88a   : > { %v1988_v20 = vsel %vm6467_vm6, %v1987_v18, -1e+09 }
 0x88b   : > { %v1989_v21 = vsel %vm939_vm2, %v1988_v20, -inf }
 0x88c   : > { %1990 = vmax.xlane.f32.xlu0 %v1989_v21 }
 0x919   : > { %v1991_v22 = vpop.xlane.xlu0 %1990 }
 0x91a   : > { %v1992_v23 = vsub.f32 %v1988_v20, %v1991_v22  ;;  %v5163_v20 = vld [vmem:[%s7283_s5 + $0xb] ss:$0 sm:$0xff]  ;;  %s7287_s5 = sld [smem:[#allocation11_spill]] }
 0x91c   : > { %v1993_v24 = vmul.f32 1.442695, %v1992_v23 }
 0x91e   : > { %6121 = vpow2.f32 %v1993_v24 }
 0x920   : > { %s663_s25 = scalar_lea.vmem %s7287_s5, %s5070_s1  ;;  %s7199_s5 = scalar_lea.hbm %s7261_s20, %s5287_s30 }
 0x921   : > { %s4963_s1 = scalar_lea.sflag [#allocation3], %s653_s28 }
 0x928   : > { %v6122_v25 = vpop.eup %6121 }
 0x929   : > { %v1995_v26 = vsel %vm939_vm2, %v6122_v25, 0.0 }
 0x92a   : > { %1996 = vadd.xlane.f32.xlu1 %v1995_v26 }
 0x9b7   : > { %v1997_v35 = vpop.xlane.xlu1 %1996 }
 0x9b8   : > { %6123 = vrcp.f32 %v1997_v35 }
 0x9c2   : > { %v6124_v36 = vpop.eup %6123 }
 0x9c3   : > { %v1999_v37 = vmul.f32 %v6124_v36, %v6122_v25 }
 0x9c5   : > { %5614 = vmatmul.mubr.msk.f32.vlgmr.msra.gmra.mrb[18].mxu1 %vm939_vm2, %v1999_v37 }
 0x9c6   : > { %5629 = vmatprep.mubr.msk.f32.mxu1 %vm6216_vm0, %v6217_v11  ;;  %5958 = vmatpush3.bf16.msra.mxu1 %v5957_v41 }
 0x9c7   : > { %5959 = vmatprep.subr.bf16.mxu1 %v6215_v3 }
 0x9ca   : > { %5961 = vmatpush3.bf16.msra.mxu1 %v5960_v44  ;;  %v5175_v44 = vld [vmem:[%s7249_s8 + $0x80] sm:$0xff] }
 0x9cb   : > { %5968 = vmatprep.subr.bf16.mxu1 %v6215_v3 }
 0x9cd   : > { %5630 = vmatmul.mubr.msk.f32.vlgmr.msra.gmra.mrb[20].mxu1 %vm699_vm1, %v6415_v14 }
 0x9ce   : > { %5651 = vmatprep.mubr.msk.f32.mxu1 %vm6216_vm0, %v6217_v11  ;;  %5970 = vmatpush3.bf16.msra.mxu1 %v5969_v4 }
 0x9cf   : > { %5971 = vmatprep.subr.bf16.mxu1 %v6215_v3 }
 0xa98   : > { %v2069_v50 = vpop.f32.mrb[18].mxu1 }
 0xa99   : > { %v5615_v51 = vpop.f32.mrb[19].mxu1  ;;  %5619 = vmatmul.mubr.msk.f32.vlgmr.msra.gmra.mrb[14].mxu0 %vm939_vm2, %v2069_v50  ;;  %v5178_v50 = vld [vmem:[%s7249_s8 + $0x98] sm:$0xff] }
 0xa9a   : > { %5964 = vmatpush3.bf16.msra.mxu0 %v5963_v47  ;;  %5640 = vmatprep.mubr.msk.f32.mxu0 %vm6216_vm0, %v6217_v11  ;;  %v2676_v47 = vld [vmem:[%s7249_s8 + $0x8] sm:$0xff]  ;;  %v5984_v51 = vpack.c.bf16 %v5178_v50, %v5177_v49  ;;  %v5202_v49 = vld [vmem:[%s7249_s8 + $0xb8] sm:$0xff] }
 0xa9b   : > { %5965 = vmatprep.subr.bf16.mxu0 %v6215_v3  ;;  %v5975_v48 = vpack.c.bf16 %v2676_v47, %v2675_v46 }
 0xa9e   : > { %5967 = vmatpush3.bf16.msra.mxu0 %v5966_v52  ;;  %v2677_v52 = vld [vmem:[%s7249_s8 + $0x10] sm:$0xff] }
 0xa9f   : > { %5654 = vmatprep.subr.mxu0 %v6217_v11 }
 0xaa0   : > { %v2228_v53 = vpop.f32.mrb[20].mxu1 }
 0xaa1   : > { %5641 = vmatmul.mubr.msk.f32.vlgmr.msra.gmra.mrb[16].mxu0 %vm699_vm1, %v6415_v14  ;;  %v5631_v54 = vpop.f32.mrb[21].mxu1  ;;  %v2229_v63 = vadd.f32 %v5149_v59, %v2228_v53  ;;  %v2678_v53 = vld [vmem:[%s7249_s8 + $0x18] sm:$0xff] }
 0xaa2   : > { %5656 = vmatprep.mubr.msk.f32.mxu0 %vm6216_vm0, %v6217_v11  ;;  %v5978_v54 = vpack.c.bf16 %v2678_v53, %v2677_v52  ;;  %v5204_v53 = vld [vmem:[%s7250_s9 + $0x5] ss:$0 sm:$0xff] }
 0xb6c   : > { %v2144_v55 = vpop.f32.mrb[14].mxu0 }
 0xb6d   : > { %v2148_v56 = vadd.f32 %v2144_v55, %v6613_v2  ;;  %v5620_v57 = vpop.f32.mrb[15].mxu0  ;;  %v5160_v2 = vld [vmem:[%s7281_s21 + $0x170] sm:$0xff]  ;;  %v6779_v55 = vld [vmem:[%s663_s25] sm:$0xff]  ;;  %s669_s25 = scalar_lea.vmem %s7288_s0, %s6405_s23  ;;  %s655_s0 = scalar_lea.vmem [#allocation2], %s5069_s27 }
 0xb6e   : > { %v5972_v6 = vpack.c.bf16 %v5161_v5, %v5160_v2  ;;  %v5184_v5 = vld [vmem:[%s7249_s8 + $0x110] sm:$0xff]  ;;  %s6155_s27 = sshll.u32 %s6219_s2, 4  ;;  %s6156_s27 = int_to_ptr.vmem [resolvable:$false] %s6155_s27 }
 0xb6f   : > { %s6157_s29 = scalar_lea.vmem %s6156_s27, 256 }
 0xb70   : > { %5973 = vmatpush3.bf16.msra.mxu1 %v5972_v6  ;;  %v5185_v6 = vld [vmem:[%s7249_s8 + $0x118] sm:$0xff] }
 0xb71   : > { %5664 = vmatprep.subr.mxu1 %v6217_v11 }
 0xb73   : > { %5652 = vmatmul.mubr.msk.f32.vlgmr.msra.gmra.mrb[22].mxu1 %vm699_vm1, %v6415_v14 }
 0xb74   : > { %v2311_v60 = vpop.f32.mrb[16].mxu0  ;;  %5666 = vmatprep.mubr.msk.f32.mxu1 %vm6216_vm0, %v6217_v11  ;;  %5665 = vmatpush3.msra.mxu1 %v5168_v38 }
 0xb75   : > { %v2312_v61 = vadd.f32 %v5156_v58, %v2311_v60  ;;  %v5642_v62 = vpop.f32.mrb[17].mxu0  ;;  %5980 = vmatprep.subr.bf16.mxu1 %v6215_v3  ;;  %v5171_v60 = vld [vmem:[%s7257_s16] ss:$0 sm:$0xff] }
 0xb76   : > { %v5182_v62 = vld [vmem:[%s7249_s8 + $0x100] sm:$0xff] }
 0xb77   : > { %5655 = vmatpush3.xpose.msk.msra.mxu0 %vm939_vm2, %v2312_v61 }
 0xb78   : > { %5659 = vmatprep.subr.mxu0 %v6217_v11 }
 0xb7a   : > { %5657 = vmatmul.mubr.msk.f32.vlgmr.msra.gmra.mrb[18].mxu0 %vm939_vm2, %v2229_v63  ;;  %v5183_v63 = vld [vmem:[%s7249_s8 + $0x108] sm:$0xff] }
 0xb7b   : > { %5661 = vmatprep.mubr.msk.f32.mxu0 %vm6216_vm0, %v6217_v11  ;;  %v5987_v2 = vpack.c.bf16 %v5183_v63, %v5182_v62  ;;  %v5208_v62 = vld [vmem:[%s7249_s8 + $0x130] sm:$0xff] }
 0xc46   : > { %v2394_v19 = vpop.f32.mrb[22].mxu1 }
 0xc47   : > { %v5653_v21 = vpop.f32.mrb[23].mxu1  ;;  %v2395_v22 = vadd.f32 %v5163_v20, %v2394_v19  ;;  %v5173_v20 = vld [vmem:[%s7250_s9] ss:$0 sm:$0xff] }
 0xc49   : > { %5660 = vmatpush3.msra.mxu0 %v2395_v22 }
 0xc4a   : > { %5974 = vmatprep.subr.bf16.mxu0 %v6215_v3 }
 0xc4d   : > { %v2470_v7 = vpop.f32.mrb[18].mxu0 }
 0xc4e   : > { %v2474_v8 = vmul.f32 0.35355338, %v2470_v7  ;;  %v5658_v9 = vpop.f32.mrb[19].mxu0  ;;  %v5990_v7 = vpack.c.bf16 %v5185_v6, %v5184_v5 }
 0xc4f   : > { %v5193_v9 = vld [vmem:[%s7249_s8 + $0x28] sm:$0xff] }
 0xc50   : > { %v2475_v10 = vsel %vm6467_vm6, %v2474_v8, -1e+09  ;;  %v5192_v8 = vld [vmem:[%s7249_s8 + $0x20] sm:$0xff] }
 0xc51   : > { %v2476_v12 = vsel %vm939_vm2, %v2475_v10, -inf }
 0xc52   : > { %2477 = vmax.xlane.f32.xlu0 %v2476_v12  ;;  %v5194_v12 = vld [vmem:[%s7249_s8 + $0x30] sm:$0xff] }
 0xcdf   : > { %v2478_v13 = vpop.xlane.xlu0 %2477 }
 0xce0   : > { %v2479_v15 = vsub.f32 %v2475_v10, %v2478_v13  ;;  %v5993_v10 = vpack.c.bf16 %v5193_v9, %v5192_v8  ;;  %v5195_v13 = vld [vmem:[%s7249_s8 + $0x38] sm:$0xff] }
 0xce2   : > { %v2480_v16 = vmul.f32 1.442695, %v2479_v15  ;;  %v5996_v15 = vpack.c.bf16 %v5195_v13, %v5194_v12 }
 0xce4   : > { %6125 = vpow2.f32 %v2480_v16  ;;  %v5180_v16 = vld [vmem:[%s7250_s9 + $0x4] ss:$0 sm:$0xff] }
 0xcee   : > { %v6126_v17 = vpop.eup %6125 }
 0xcef   : > { %v2482_v18 = vsel %vm939_vm2, %v6126_v17, 0.0 }
 0xcf0   : > { %2483 = vadd.xlane.f32.xlu1 %v2482_v18 }
 0xd7d   : > { %v2484_v23 = vpop.xlane.xlu1 %2483 }
 0xd7e   : > { %6127 = vrcp.f32 %v2484_v23  ;;  %v5187_v23 = vld [vmem:[%s7250_s9 + $0x8] ss:$0 sm:$0xff] }
 0xd88   : > { %v6128_v24 = vpop.eup %6127 }
 0xd89   : > { %v2486_v25 = vmul.f32 %v6128_v24, %v6126_v17 }
 0xd8b   : > { %5662 = vmatmul.mubr.msk.f32.vlgmr.msra.gmra.mrb[20].mxu0 %vm939_vm2, %v2486_v25 }
 0xd8c   : > { %5677 = vmatprep.mubr.msk.f32.mxu0 %vm6216_vm0, %v6217_v11  ;;  %5976 = vmatpush3.bf16.msra.mxu0 %v5975_v48  ;;  %v5201_v48 = vld [vmem:[%s7249_s8 + $0xb0] sm:$0xff] }
 0xd8d   : > { %5977 = vmatprep.subr.bf16.mxu0 %v6215_v3  ;;  %v6002_v50 = vpack.c.bf16 %v5202_v49, %v5201_v48  ;;  %v5224_v48 = vld [vmem:[%s7250_s9 + $0x2] ss:$0 sm:$0xff] }
 0xd90   : > { %5979 = vmatpush3.bf16.msra.mxu0 %v5978_v54 }
 0xd91   : > { %5986 = vmatprep.subr.bf16.mxu0 %v6215_v3 }
 0xe5e   : > { %v2556_v26 = vpop.f32.mrb[20].mxu0 }
 0xe5f   : > { %v5663_v27 = vpop.f32.mrb[21].mxu0  ;;  %5667 = vmatmul.mubr.msk.f32.vlgmr.msra.gmra.mrb[24].mxu1 %vm939_vm2, %v2556_v26 }
 0xe60   : > { %5688 = vmatprep.mubr.msk.f32.mxu1 %vm6216_vm0, %v6217_v11 }
 0xf32   : > { %v2631_v28 = vpop.f32.mrb[24].mxu1 }
 0xf33   : > { %v2635_v30 = vadd.f32 %v2631_v28, %v2148_v56  ;;  %v5668_v34 = vpop.f32.mrb[25].mxu1 }
 0xf35   : > { %v2643_v35 = vadd.f32 %v5170_v29, %v2635_v30  ;;  %v674_v29 = vld [vmem:[%s669_s25] sm:$0x1]  ;;  %s4976_s25 = sshll.u32 %s655_s0, 4  ;;  %s7201_s25 = int_to_ptr.vmem [resolvable:$true] %s4976_s25 }
 0xf36   : > { %vm675_vm7 = vcmp.gt.f32.partialorder %v674_v29, 0.0  ;;  %s6151_s3 = scalar_lea.vmem %s7201_s25, 128  ;;  %p6158_p0 = scmp.lt.s32.totalorder %s7201_s25, %s6156_s27 }
 0xf37   : > { %v2644_v36 = vadd.f32 %v2643_v35, %v6415_v14  ;;  %v5981_v14 = vpack.c.bf16 %v5176_v45, %v5175_v44  ;;  %v3005_v30 = vsel %vm675_vm7, 1, %v6218_v33  ;;  %v5199_v44 = vld [vmem:[%s7249_s8 + $0xa0] sm:$0xff]  ;;  %v5200_v45 = vld [vmem:[%s7249_s8 + $0xa8] sm:$0xff]  ;;  %p6152_p11 = scmp.ne.s32.totalorder %s7201_s25, %s6151_s3  ;;  %p6159_p1 = scmp.lt.s32.totalorder %s6157_s29, %s6151_s3 }
 0xf38   : > { %v6856_v34 = vrot.slane %v3005_v30, %v684_v32  ;;  %v5999_v46 = vpack.c.bf16 %v5200_v45, %v5199_v44  ;;  %v5219_v30 = vld [vmem:[%s7249_s8 + $0x40] sm:$0xff] }
 0xf39   : > { %v2647_v37 = vsel %vm699_vm1, %v2644_v36, 0.0  ;;  %5982 = vmatpush3.bf16.msra.mxu1 %v5981_v14  ;;  %p6153_p12 = pnand %p6152_p11, %p6363_p5  ;;  %p6160_p2 = por %p6159_p1, %p6158_p0 }
 0xf3a   : > { %2648 = vadd.xlane.f32.xlu0 %v2647_v37  ;;  %5983 = vmatprep.subr.bf16.mxu1 %v6215_v3  ;;  %vm3010_vm8 = vcmp.eq.s32.totalorder %v6856_v34, 1  ;;  %v5269_v34 = vld [vmem:[%s7251_s10 + $0x18] sm:$0xff] }
 0xf3b   : > { %p6154_p13 = pneg %p6153_p12 }
 0xf3d   : > { %5985 = vmatpush3.bf16.msra.mxu1 %v5984_v51  ;;  %p6161_p3 = pnand %p6160_p2, %p6154_p13 }
 0xf3e   : > { %5702 = vmatprep.subr.mxu1 %v6217_v11 }
 0xf40   : > { %5689 = vmatmul.mubr.msk.f32.vlgmr.msra.gmra.mrb[26].mxu1 %vm699_vm1, %v6779_v55 }
 0xf41   : > { %5704 = vmatprep.mubr.msk.f32.mxu1 %vm6216_vm0, %v6217_v11 }
 0xfc7   : > { %v2649_v39 = vpop.xlane.xlu0 %2648 }
 0xfc8   : > { %v2651_v40 = vmul.f32 0.03125, %v2649_v39 }
 0xfca   : > { %v2652_v41 = vsub.f32 %v2644_v36, %v2651_v40 }
 0xfcc   : > { %v2653_v42 = vmul.f32 %v2652_v41, %v2652_v41 }
 0xfce   : > { %v2654_v43 = vsel %vm699_vm1, %v2653_v42, 0.0 }
 0xfcf   : > { %2655 = vadd.xlane.f32.xlu1 %v2654_v43 }
0x1013   : > { %v2841_v17 = vpop.f32.mrb[26].mxu1 }
0x1014   : > { %v2842_v18 = vadd.f32 %v5180_v16, %v2841_v17  ;;  %v5690_v19 = vpop.f32.mrb[27].mxu1  ;;  %v5211_v17 = vld [vmem:[%s7250_s9 + $0x9] ss:$0 sm:$0xff] }
0x1016   : > { %5703 = vmatpush3.xpose.msk.msra.mxu1 %vm939_vm2, %v2842_v18 }
0x1017   : > { %5707 = vmatprep.subr.mxu1 %v6217_v11 }
0x105c   : > { %v2656_v56 = vpop.xlane.xlu1 %2655 }
0x105d   : > { %v2657_v57 = vmul.f32 0.03125, %v2656_v56  ;;  %v5197_v56 = vld [vmem:[%s7250_s9 + $0x1] ss:$0 sm:$0xff] }
0x105f   : > { %v2658_v58 = vadd.f32 1e-05, %v2657_v57 }
0x1061   : > { %6129 = vrsqrt.f32 %v2658_v58 }
0x106b   : > { %v6130_v59 = vpop.eup %6129 }
0x106c   : > { %v2660_v61 = vmul.f32 %v6130_v59, %v2652_v41 }
0x106e   : > { %v2667_v1 = vmul.f32 %v5171_v60, %v2660_v61  ;;  %v5206_v60 = vld [vmem:[%s7249_s8 + $0x120] sm:$0xff]  ;;  %v5207_v61 = vld [vmem:[%s7249_s8 + $0x128] sm:$0xff] }
0x106f   : > { %v6005_v63 = vpack.c.bf16 %v5207_v61, %v5206_v60 }
0x1070   : > { %v6798_v4 = vadd.f32 %v5172_v0, %v2667_v1  ;;  %v5209_v0 = vld [vmem:[%s7249_s8 + $0x138] sm:$0xff] }
0x1071   : > { %v6008_v1 = vpack.c.bf16 %v5209_v0, %v5208_v62 }
0x1072   : > { %5678 = vmatmul.mubr.msk.f32.vlgmr.msra.gmra.mrb[22].mxu0 %vm699_vm1, %v6798_v4 }
0x1073   : > { %5988 = vmatpush3.bf16.msra.mxu0 %v5987_v2  ;;  %5699 = vmatprep.mubr.msk.f32.mxu0 %vm6216_vm0, %v6217_v11 }
0x1074   : > { %5989 = vmatprep.subr.bf16.mxu0 %v6215_v3 }
0x1077   : > { %5991 = vmatpush3.bf16.msra.mxu0 %v5990_v7 }
0x1078   : > { %5992 = vmatprep.subr.bf16.mxu0 %v6215_v3 }
0x107a   : > { %5700 = vmatmul.mubr.msk.f32.vlgmr.msra.gmra.mrb[24].mxu0 %vm699_vm1, %v6779_v55 }
0x107b   : > { %5994 = vmatpush3.bf16.msra.mxu0 %v5993_v10  ;;  %5720 = vmatprep.mubr.msk.f32.mxu0 %vm6216_vm0, %v6217_v11 }
0x107c   : > { %5995 = vmatprep.subr.bf16.mxu0 %v6215_v3 }
0x107f   : > { %5997 = vmatpush3.bf16.msra.mxu0 %v5996_v15 }
0x1080   : > { %6004 = vmatprep.subr.bf16.mxu0 %v6215_v3 }
0x1082   : > { %5721 = vmatmul.mubr.msk.f32.vlgmr.msra.gmra.mrb[26].mxu0 %vm699_vm1, %v6798_v4 }
0x1083   : > { %5742 = vmatprep.mubr.msk.f32.mxu0 %vm6216_vm0, %v6217_v11  ;;  %6006 = vmatpush3.bf16.msra.mxu0 %v6005_v63 }
0x1084   : > { %6007 = vmatprep.subr.bf16.mxu0 %v6215_v3 }
0x1087   : > { %6009 = vmatpush3.bf16.msra.mxu0 %v6008_v1 }
0x1088   : > { %5755 = vmatprep.subr.mxu0 %v6217_v11 }
0x108a   : > { %5743 = vmatmul.mubr.msk.f32.vlgmr.msra.gmra.mrb[28].mxu0 %vm699_vm1, %v6779_v55 }
0x108b   : > { %5757 = vmatprep.mubr.msk.f32.mxu0 %vm6216_vm0, %v6217_v11 }
0x1145   : > { %v2755_v21 = vpop.f32.mrb[22].mxu0 }
0x1146   : > { %v2756_v22 = vadd.f32 %v5173_v20, %v2755_v21  ;;  %v5679_v38 = vpop.f32.mrb[23].mxu0  ;;  %v5216_v20 = vld [vmem:[%s7251_s10 + $0x8] sm:$0xff] }
0x1147   : > { %5756 = vmatpush3.msra.mxu0 %v5216_v20  ;;  %v5247_v20 = vld [vmem:[%s7249_s8 + $0x70] sm:$0xff] }
0x1148   : > { %5705 = vmatmul.mubr.msk.f32.vlgmr.msra.gmra.mrb[28].mxu1 %vm939_vm2, %v2756_v22  ;;  %6010 = vmatprep.subr.bf16.mxu0 %v6215_v3 }
0x1149   : > { %5709 = vmatprep.mubr.msk.f32.mxu1 %vm6216_vm0, %v6217_v11 }
0x114d   : > { %v2924_v24 = vpop.f32.mrb[24].mxu0 }
0x114e   : > { %v2925_v25 = vadd.f32 %v5187_v23, %v2924_v24  ;;  %v5701_v26 = vpop.f32.mrb[25].mxu0  ;;  %v3096_v23 = vld [vmem:[%s7251_s10] sm:$0xff] }
0x114f   : > { %v5226_v24 = vld [vmem:[%s7249_s8 + $0xc0] sm:$0xff] }
0x1150   : > { %5708 = vmatpush3.msra.mxu1 %v2925_v25  ;;  %v5227_v25 = vld [vmem:[%s7249_s8 + $0xc8] sm:$0xff] }
0x1151   : > { %5998 = vmatprep.subr.bf16.mxu1 %v6215_v3  ;;  %v6017_v26 = vpack.c.bf16 %v5227_v25, %v5226_v24  ;;  %v5254_v25 = vld [vmem:[%s7249_s8 + $0xf0] sm:$0xff] }
0x1155   : > { %v3176_v27 = vpop.f32.mrb[26].mxu0 }
0x1156   : > { %v5722_v28 = vpop.f32.mrb[27].mxu0  ;;  %v3177_v59 = vadd.f32 %v5197_v56, %v3176_v27  ;;  %v5228_v27 = vld [vmem:[%s7249_s8 + $0xd0] sm:$0xff] }
0x1157   : > { %v5229_v28 = vld [vmem:[%s7249_s8 + $0xd8] sm:$0xff] }
0x1158   : > { %v6020_v29 = vpack.c.bf16 %v5229_v28, %v5228_v27 }
0x115d   : > { %v3342_v16 = vpop.f32.mrb[28].mxu0 }
0x115e   : > { %v5744_v18 = vpop.f32.mrb[29].mxu0  ;;  %v3343_v19 = vadd.f32 %v5211_v17, %v3342_v16  ;;  %v5246_v16 = vld [vmem:[%s7249_s8 + $0x68] sm:$0xff] }
0x121b   : > { %v3000_v35 = vpop.f32.mrb[28].mxu1 }
0x121c   : > { %v3004_v36 = vmul.f32 0.35355338, %v3000_v35  ;;  %v5706_v37 = vpop.f32.mrb[29].mxu1  ;;  %v5220_v35 = vld [vmem:[%s7249_s8 + $0x48] sm:$0xff] }
0x121d   : > { %v5221_v37 = vld [vmem:[%s7249_s8 + $0x50] sm:$0xff] }
0x121e   : > { %v3011_v39 = vsel %vm3010_vm8, %v3004_v36, -1e+09  ;;  %v6011_v36 = vpack.c.bf16 %v5220_v35, %v5219_v30 }
0x121f   : > { %v3012_v40 = vsel %vm939_vm2, %v3011_v39, -inf }
0x1220   : > { %3013 = vmax.xlane.f32.xlu0 %v3012_v40 }
0x12ad   : > { %v3014_v41 = vpop.xlane.xlu0 %3013 }
0x12ae   : > { %v3015_v42 = vsub.f32 %v3011_v39, %v3014_v41  ;;  %v5222_v39 = vld [vmem:[%s7249_s8 + $0x58] sm:$0xff] }
0x12b0   : > { %v3016_v43 = vmul.f32 1.442695, %v3015_v42  ;;  %v6014_v42 = vpack.c.bf16 %v5222_v39, %v5221_v37 }
0x12b2   : > { %6131 = vpow2.f32 %v3016_v43 }
0x12bc   : > { %v6132_v33 = vpop.eup %6131 }
0x12bd   : > { %v3018_v31 = vsel %vm939_vm2, %v6132_v33, 0.0 }
0x12be   : > { %3019 = vadd.xlane.f32.xlu1 %v3018_v31  ;;  %v5231_v31 = vld [vmem:[%s7250_s9 + $0x6] ss:$0 sm:$0xff] }
0x134b   : > { %v3020_v32 = vpop.xlane.xlu1 %3019 }
0x134c   : > { %6133 = vrcp.f32 %v3020_v32 }
0x1356   : > { %v6134_v14 = vpop.eup %6133 }
0x1357   : > { %v3022_v47 = vmul.f32 %v6134_v14, %v6132_v33 }
0x1359   : > { %5710 = vmatmul.mubr.msk.f32.vlgmr.msra.gmra.mrb[30].mxu1 %vm939_vm2, %v3022_v47 }
0x135a   : > { %6000 = vmatpush3.bf16.msra.mxu1 %v5999_v46  ;;  %5731 = vmatprep.mubr.msk.f32.mxu1 %vm6216_vm0, %v6217_v11 }
0x135b   : > { %6001 = vmatprep.subr.bf16.mxu1 %v6215_v3 }
0x135e   : > { %6003 = vmatpush3.bf16.msra.mxu1 %v6002_v50 }
0x135f   : > { %5745 = vmatprep.subr.mxu1 %v6217_v11 }
0x1361   : > { %5732 = vmatmul.mubr.msk.f32.vlgmr.msra.gmra.mrb[32].mxu1 %vm699_vm1, %v6779_v55 }
0x1362   : > { %5747 = vmatprep.mubr.msk.f32.mxu1 %vm6216_vm0, %v6217_v11 }
0x142c   : > { %v3092_v51 = vpop.f32.mrb[30].mxu1 }
0x142d   : > { %v5711_v52 = vpop.f32.mrb[31].mxu1 }
0x142e   : > { %v5233_v52 = vld [vmem:[%s7249_s8 + $0x140] sm:$0xff] }
0x1434   : > { %v3259_v54 = vpop.f32.mrb[32].mxu1 }
0x1435   : > { %v3260_v57 = vadd.f32 %v5204_v53, %v3259_v54  ;;  %v5733_v58 = vpop.f32.mrb[33].mxu1  ;;  %v5234_v53 = vld [vmem:[%s7249_s8 + $0x148] sm:$0xff]  ;;  %v5235_v54 = vld [vmem:[%s7249_s8 + $0x150] sm:$0xff] }
0x1436   : > { %v6023_v56 = vpack.c.bf16 %v5234_v53, %v5233_v52 }
0x1437   : > { %5746 = vmatpush3.xpose.msk.msra.mxu1 %vm939_vm2, %v3260_v57  ;;  %v5236_v57 = vld [vmem:[%s7249_s8 + $0x158] sm:$0xff] }
0x1438   : > { %5750 = vmatprep.subr.mxu1 %v6217_v11  ;;  %v6026_v58 = vpack.c.bf16 %v5236_v57, %v5235_v54 }
0x143a   : > { %5748 = vmatmul.mubr.msk.f32.vlgmr.msra.gmra.mrb[34].mxu1 %vm939_vm2, %v3177_v59 }
0x143b   : > { %5752 = vmatprep.mubr.msk.f32.mxu1 %vm6216_vm0, %v6217_v11  ;;  %5751 = vmatpush3.msra.mxu1 %v3343_v19 }
0x143c   : > { %5760 = vmatprep.subr.mxu1 %v6217_v11 }
0x150d   : > { %v3418_v2 = vpop.f32.mrb[34].mxu1 }
0x150e   : > { %v3422_v5 = vmul.f32 0.35355338, %v3418_v2  ;;  %v5749_v6 = vpop.f32.mrb[35].mxu1 }
0x1510   : > { %v3423_v7 = vsel %vm3010_vm8, %v3422_v5, -1e+09 }
0x1511   : > { %v3424_v8 = vsel %vm939_vm2, %v3423_v7, -inf }
0x1512   : > { %3425 = vmax.xlane.f32.xlu0 %v3424_v8 }
0x159f   : > { %v3426_v9 = vpop.xlane.xlu0 %3425 }
0x15a0   : > { %v3427_v10 = vsub.f32 %v3423_v7, %v3426_v9  ;;  %v5238_v7 = vld [vmem:[%s7250_s9 + $0xa] ss:$0 sm:$0xff] }
0x15a2   : > { %v3428_v12 = vmul.f32 1.442695, %v3427_v10 }
0x15a4   : > { %6135 = vpow2.f32 %v3428_v12  ;;  %v5243_v12 = vld [vmem:[%s7251_s10 + $0x10] sm:$0xff] }
0x15ae   : > { %v6136_v13 = vpop.eup %6135 }
0x15af   : > { %v3430_v15 = vsel %vm939_vm2, %v6136_v13, 0.0 }
0x15b0   : > { %3431 = vadd.xlane.f32.xlu1 %v3430_v15  ;;  %v5245_v15 = vld [vmem:[%s7249_s8 + $0x60] sm:$0xff] }
0x15b1   : > { %v6029_v18 = vpack.c.bf16 %v5246_v16, %v5245_v15 }
0x163d   : > { %v3432_v21 = vpop.xlane.xlu1 %3431 }
0x163e   : > { %6137 = vrcp.f32 %v3432_v21  ;;  %v5248_v21 = vld [vmem:[%s7249_s8 + $0x78] sm:$0xff] }
0x1648   : > { %v6138_v22 = vpop.eup %6137 }
0x1649   : > { %v3434_v38 = vmul.f32 %v6138_v22, %v6136_v13  ;;  %v6032_v22 = vpack.c.bf16 %v5248_v21, %v5247_v20  ;;  %v4671_v20 = vld [vmem:[%s7253_s12 + $0x8] sm:$0xff] }
0x164b   : > { %5753 = vmatmul.mubr.msk.f32.vlgmr.msra.gmra.mrb[36].mxu1 %vm939_vm2, %v3434_v38  ;;  %v5252_v38 = vld [vmem:[%s7249_s8 + $0xe0] sm:$0xff] }
0x164c   : > { %5761 = vmatpush3.msra.mxu1 %v3096_v23  ;;  %5762 = vmatprep.mubr.msk.f32.mxu1 %vm6216_vm0, %v6217_v11  ;;  %v5253_v23 = vld [vmem:[%s7249_s8 + $0xe8] sm:$0xff] }
0x164d   : > { %6016 = vmatprep.subr.bf16.mxu1 %v6215_v3  ;;  %v6035_v24 = vpack.c.bf16 %v5253_v23, %v5252_v38  ;;  %v4755_v23 = vld [vmem:[%s7255_s14] sm:$0xff] }
0x164f   : > { %5763 = vmatmul.mubr.msk.f32.vlgmr.msra.gmra.mrb[38].mxu1 %vm939_vm2, %v3092_v51 }
0x1650   : > { %6018 = vmatpush3.bf16.msra.mxu1 %v6017_v26  ;;  %5784 = vmatprep.mubr.msk.f32.mxu1 %vm6216_vm0, %v6217_v11  ;;  %v5255_v26 = vld [vmem:[%s7249_s8 + $0xf8] sm:$0xff] }
0x1651   : > { %6019 = vmatprep.subr.bf16.mxu1 %v6215_v3 }
0x1654   : > { %6021 = vmatpush3.bf16.msra.mxu1 %v6020_v29  ;;  %v6038_v29 = vpack.c.bf16 %v5255_v26, %v5254_v25  ;;  %v4757_v25 = vld [vmem:[%s7255_s14 + $0x10] sm:$0xff] }
0x1655   : > { %5798 = vmatprep.subr.mxu1 %v6217_v11 }
0x1657   : > { %5785 = vmatmul.mubr.msk.f32.vlgmr.msra.gmra.mrb[40].mxu1 %vm699_vm1, %v6779_v55 }
0x1658   : > { %5800 = vmatprep.mubr.msk.f32.mxu1 %vm6216_vm0, %v6217_v11 }
0x171e   : > { %v3504_v40 = vpop.f32.mrb[36].mxu1 }
0x171f   : > { %v5754_v41 = vpop.f32.mrb[37].mxu1  ;;  %5758 = vmatmul.mubr.msk.f32.vlgmr.msra.gmra.mrb[30].mxu0 %vm939_vm2, %v3504_v40  ;;  %v5257_v40 = vld [vmem:[%s7250_s9 + $0x7] ss:$0 sm:$0xff] }
0x1720   : > { %6012 = vmatpush3.bf16.msra.mxu0 %v6011_v36  ;;  %5773 = vmatprep.mubr.msk.f32.mxu0 %vm6216_vm0, %v6217_v11 }
0x1721   : > { %6013 = vmatprep.subr.bf16.mxu0 %v6215_v3 }
0x1722   : > { %v3652_v43 = vpop.f32.mrb[38].mxu1 }
0x1723   : > { %v5764_v33 = vpop.f32.mrb[39].mxu1 }
0x1724   : > { %6015 = vmatpush3.bf16.msra.mxu0 %v6014_v42  ;;  %v5250_v42 = vld [vmem:[%s7250_s9 + $0x3] ss:$0 sm:$0xff] }
0x1725   : > { %6022 = vmatprep.subr.bf16.mxu0 %v6215_v3 }
0x1727   : > { %5774 = vmatmul.mubr.msk.f32.vlgmr.msra.gmra.mrb[32].mxu0 %vm699_vm1, %v6798_v4 }
0x1728   : > { %5795 = vmatprep.mubr.msk.f32.mxu0 %vm6216_vm0, %v6217_v11  ;;  %6024 = vmatpush3.bf16.msra.mxu0 %v6023_v56 }
0x1729   : > { %6025 = vmatprep.subr.bf16.mxu0 %v6215_v3 }
0x172a   : > { %v3818_v32 = vpop.f32.mrb[40].mxu1 }
0x172b   : > { %v3819_v44 = vadd.f32 %v5231_v31, %v3818_v32  ;;  %v5786_v45 = vpop.f32.mrb[41].mxu1  ;;  %v5259_v32 = vld [vmem:[%s7249_s8 + $0x160] sm:$0xff] }
0x172c   : > { %6027 = vmatpush3.bf16.msra.mxu0 %v6026_v58  ;;  %v5261_v45 = vld [vmem:[%s7249_s8 + $0x170] sm:$0xff] }
0x172d   : > { %5799 = vmatpush3.xpose.msk.msra.mxu1 %vm939_vm2, %v3819_v44  ;;  %5808 = vmatprep.subr.mxu0 %v6217_v11  ;;  %v5260_v44 = vld [vmem:[%s7249_s8 + $0x168] sm:$0xff] }
0x172e   : > { %5803 = vmatprep.subr.mxu1 %v6217_v11 }
0x172f   : > { %5796 = vmatmul.mubr.msk.f32.vlgmr.msra.gmra.mrb[34].mxu0 %vm699_vm1, %v6779_v55 }
0x1730   : > { %5810 = vmatprep.mubr.msk.f32.mxu0 %vm6216_vm0, %v6217_v11  ;;  %5809 = vmatpush3.msra.mxu0 %v5243_v12 }
0x1731   : > { %6034 = vmatprep.subr.bf16.mxu0 %v6215_v3 }
0x17f2   : > { %v3579_v14 = vpop.f32.mrb[30].mxu0 }
0x17f3   : > { %v6979_v46 = vadd.f32 %v3652_v43, %v3579_v14  ;;  %v5759_v47 = vpop.f32.mrb[31].mxu0  ;;  %v6041_v14 = vpack.c.bf16 %v5260_v44, %v5259_v32  ;;  %v4761_v32 = vld [vmem:[%s7255_s14 + $0x30] sm:$0xff]  ;;  %v4762_v44 = vld [vmem:[%s7255_s14 + $0x38] sm:$0xff] }
0x17fa   : > { %v3735_v49 = vpop.f32.mrb[32].mxu0 }
0x17fb   : > { %v3736_v50 = vadd.f32 %v5224_v48, %v3735_v49  ;;  %v5775_v51 = vpop.f32.mrb[33].mxu0 }
0x17fd   : > { %5801 = vmatmul.mubr.msk.f32.vlgmr.msra.gmra.mrb[42].mxu1 %vm939_vm2, %v3736_v50 }
0x17fe   : > { %5805 = vmatprep.mubr.msk.f32.mxu1 %vm6216_vm0, %v6217_v11 }
0x1802   : > { %v3901_v8 = vpop.f32.mrb[34].mxu0 }
0x1803   : > { %v3902_v9 = vadd.f32 %v5238_v7, %v3901_v8  ;;  %v5797_v10 = vpop.f32.mrb[35].mxu0 }
0x1805   : > { %5804 = vmatpush3.msra.mxu1 %v3902_v9 }
0x1806   : > { %6028 = vmatprep.subr.bf16.mxu1 %v6215_v3 }
0x18d0   : > { %v3977_v59 = vpop.f32.mrb[42].mxu1 }
0x18d1   : > { %v3981_v60 = vmul.f32 0.35355338, %v3977_v59  ;;  %v5802_v61 = vpop.f32.mrb[43].mxu1  ;;  %v5264_v59 = vld [vmem:[%s7250_s9 + $0xb] ss:$0 sm:$0xff] }
0x18d3   : > { %v3982_v62 = vsel %vm3010_vm8, %v3981_v60, -1e+09 }
0x18d4   : > { %v3983_v63 = vsel %vm939_vm2, %v3982_v62, -inf }
0x18d5   : > { %3984 = vmax.xlane.f32.xlu0 %v3983_v63 }
0x1962   : > { %v3985_v0 = vpop.xlane.xlu0 %3984 }
0x1963   : > { %v3986_v1 = vsub.f32 %v3982_v62, %v3985_v0 }
0x1965   : > { %v3987_v2 = vmul.f32 1.442695, %v3986_v1 }
0x1967   : > { %6139 = vpow2.f32 %v3987_v2 }
0x1971   : > { %v6140_v5 = vpop.eup %6139 }
0x1972   : > { %v3989_v6 = vsel %vm939_vm2, %v6140_v5, 0.0 }
0x1973   : > { %3990 = vadd.xlane.f32.xlu1 %v3989_v6  ;;  %v5271_v6 = vld [vmem:[%s7252_s11] ss:$0 sm:$0xff] }
0x1a00   : > { %v3991_v13 = vpop.xlane.xlu1 %3990 }
0x1a01   : > { %6141 = vrcp.f32 %v3991_v13 }
0x1a0b   : > { %v6142_v17 = vpop.eup %6141 }
0x1a0c   : > { %v3993_v19 = vmul.f32 %v6142_v17, %v6140_v5 }
0x1a0e   : > { %5806 = vmatmul.mubr.msk.f32.vlgmr.msra.gmra.mrb[44].mxu1 %vm939_vm2, %v3993_v19  ;;  %v4670_v19 = vld [vmem:[%s7253_s12] sm:$0xff] }
0x1a0f   : > { %6030 = vmatpush3.bf16.msra.mxu1 %v6029_v18  ;;  %5821 = vmatprep.mubr.msk.f32.mxu1 %vm6216_vm0, %v6217_v11  ;;  %v6047_v21 = vpack.c.bf16 %v4671_v20, %v4670_v19 }
0x1a10   : > { %6031 = vmatprep.subr.bf16.mxu1 %v6215_v3 }
0x1a13   : > { %6033 = vmatpush3.bf16.msra.mxu1 %v6032_v22  ;;  %v4673_v22 = vld [vmem:[%s7253_s12 + $0x18] sm:$0xff] }
0x1a14   : > { %6040 = vmatprep.subr.bf16.mxu1 %v6215_v3 }
0x1a16   : > { %5822 = vmatmul.mubr.msk.f32.vlgmr.msra.gmra.mrb[46].mxu1 %vm699_vm1, %v6798_v4 }
0x1a17   : > { %5843 = vmatprep.mubr.msk.f32.mxu1 %vm6216_vm0, %v6217_v11  ;;  %6042 = vmatpush3.bf16.msra.mxu1 %v6041_v14  ;;  %v5276_v14 = vld [vmem:[%s7254_s13] ss:$0 sm:$0xff] }
0x1a18   : > { %6043 = vmatprep.subr.bf16.mxu1 %v6215_v3 }
0x1ae1   : > { %v4063_v27 = vpop.f32.mrb[44].mxu1 }
0x1ae2   : > { %v5807_v28 = vpop.f32.mrb[45].mxu1  ;;  %5811 = vmatmul.mubr.msk.f32.vlgmr.msra.gmra.mrb[36].mxu0 %vm939_vm2, %v4063_v27  ;;  %v4758_v27 = vld [vmem:[%s7255_s14 + $0x18] sm:$0xff] }
0x1ae3   : > { %6036 = vmatpush3.bf16.msra.mxu0 %v6035_v24  ;;  %5832 = vmatprep.mubr.msk.f32.mxu0 %vm6216_vm0, %v6217_v11  ;;  %v4756_v24 = vld [vmem:[%s7255_s14 + $0x8] sm:$0xff]  ;;  %v6056_v28 = vpack.c.bf16 %v4758_v27, %v4757_v25 }
0x1ae4   : > { %6037 = vmatprep.subr.bf16.mxu0 %v6215_v3  ;;  %v6053_v26 = vpack.c.bf16 %v4756_v24, %v4755_v23 }
0x1ae7   : > { %6039 = vmatpush3.bf16.msra.mxu0 %v6038_v29  ;;  %v4759_v29 = vld [vmem:[%s7255_s14 + $0x20] sm:$0xff] }
0x1ae8   : > { %5846 = vmatprep.subr.mxu0 %v6217_v11 }
0x1ae9   : > { %v4222_v30 = vpop.f32.mrb[46].mxu1 }
0x1aea   : > { %v5823_v35 = vpop.f32.mrb[47].mxu1  ;;  %5833 = vmatmul.mubr.msk.f32.vlgmr.msra.gmra.mrb[38].mxu0 %vm699_vm1, %v6779_v55  ;;  %v4223_v31 = vadd.f32 %v5250_v42, %v4222_v30  ;;  %v4760_v30 = vld [vmem:[%s7255_s14 + $0x28] sm:$0xff] }
0x1aeb   : > { %5848 = vmatprep.mubr.msk.f32.mxu0 %vm6216_vm0, %v6217_v11  ;;  %v6059_v35 = vpack.c.bf16 %v4760_v30, %v4759_v29 }
0x1bb5   : > { %v4138_v36 = vpop.f32.mrb[36].mxu0 }
0x1bb6   : > { %v4142_v37 = vadd.f32 %v4138_v36, %v6979_v46  ;;  %v5812_v39 = vpop.f32.mrb[37].mxu0  ;;  %v5262_v46 = vld [vmem:[%s7249_s8 + $0x178] sm:$0xff] }
0x1bb7   : > { %v6044_v47 = vpack.c.bf16 %v5262_v46, %v5261_v45  ;;  %v6062_v45 = vpack.c.bf16 %v4762_v44, %v4761_v32 }
0x1bb9   : > { %6045 = vmatpush3.bf16.msra.mxu1 %v6044_v47 }
0x1bba   : > { %5856 = vmatprep.subr.mxu1 %v6217_v11 }
0x1bbc   : > { %5844 = vmatmul.mubr.msk.f32.vlgmr.msra.gmra.mrb[48].mxu1 %vm699_vm1, %v6779_v55 }
0x1bbd   : > { %v4305_v41 = vpop.f32.mrb[38].mxu0  ;;  %5858 = vmatprep.mubr.msk.f32.mxu1 %vm6216_vm0, %v6217_v11  ;;  %5857 = vmatpush3.msra.mxu1 %v5269_v34 }
0x1bbe   : > { %v4306_v43 = vadd.f32 %v5257_v40, %v4305_v41  ;;  %v5834_v33 = vpop.f32.mrb[39].mxu0  ;;  %6052 = vmatprep.subr.bf16.mxu1 %v6215_v3  ;;  %v5274_v41 = vld [vmem:[%s7257_s16 + $0x1] ss:$0 sm:$0xff] }
0x1bc0   : > { %5847 = vmatpush3.xpose.msk.msra.mxu0 %vm939_vm2, %v4306_v43  ;;  %v5275_v43 = vld [vmem:[%s7258_s17 + $0x1] ss:$0 sm:$0xff] }
0x1bc1   : > { %5851 = vmatprep.subr.mxu0 %v6217_v11 }
0x1bc3   : > { %5849 = vmatmul.mubr.msk.f32.vlgmr.msra.gmra.mrb[40].mxu0 %vm939_vm2, %v4223_v31 }
0x1bc4   : > { %5853 = vmatprep.mubr.msk.f32.mxu0 %vm6216_vm0, %v6217_v11 }
0x1c8f   : > { %v4388_v55 = vpop.f32.mrb[48].mxu1 }
0x1c90   : > { %v5845_v60 = vpop.f32.mrb[49].mxu1  ;;  %v4389_v61 = vadd.f32 %v5264_v59, %v4388_v55 }
0x1c91   : > { %v4876_v60 = vld [vmem:[%s7259_s18] sm:$0xff] }
0x1c92   : > { %5852 = vmatpush3.msra.mxu0 %v4389_v61  ;;  %v4877_v61 = vld [vmem:[%s7259_s18 + $0x8] sm:$0xff] }
0x1c93   : > { %6046 = vmatprep.subr.bf16.mxu0 %v6215_v3  ;;  %v6065_v34 = vpack.c.bf16 %v4877_v61, %v4876_v60 }
0x1c96   : > { %v4464_v48 = vpop.f32.mrb[40].mxu0 }
0x1c97   : > { %v4468_v49 = vmul.f32 0.35355338, %v4464_v48  ;;  %v5850_v50 = vpop.f32.mrb[41].mxu0 }
0x1c99   : > { %v4469_v51 = vsel %vm3010_vm8, %v4468_v49, -1e+09 }
0x1c9a   : > { %v4470_v52 = vsel %vm939_vm2, %v4469_v51, -inf }
0x1c9b   : > { %4471 = vmax.xlane.f32.xlu0 %v4470_v52 }
0x1d28   : > { %v4472_v53 = vpop.xlane.xlu0 %4471 }
0x1d29   : > { %v4473_v54 = vsub.f32 %v4469_v51, %v4472_v53 }
0x1d2b   : > { %v4474_v56 = vmul.f32 1.442695, %v4473_v54 }
0x1d2d   : > { %6143 = vpow2.f32 %v4474_v56 }
0x1d37   : > { %v6144_v57 = vpop.eup %6143 }
0x1d38   : > { %v4476_v58 = vsel %vm939_vm2, %v6144_v57, 0.0 }
0x1d39   : > { %4477 = vadd.xlane.f32.xlu1 %v4476_v58 }
0x1dc6   : > { %v4478_v62 = vpop.xlane.xlu1 %4477 }
0x1dc7   : > { %6145 = vrcp.f32 %v4478_v62  ;;  %v4878_v62 = vld [vmem:[%s7259_s18 + $0x10] sm:$0xff] }
0x1dd1   : > { %v6146_v63 = vpop.eup %6145 }
0x1dd2   : > { %v4480_v0 = vmul.f32 %v6146_v63, %v6144_v57  ;;  %v4879_v63 = vld [vmem:[%s7259_s18 + $0x18] sm:$0xff] }
0x1dd4   : > { %5854 = vmatmul.mubr.msk.f32.vlgmr.msra.gmra.mrb[42].mxu0 %vm939_vm2, %v4480_v0  ;;  %v6068_v0 = vpack.c.bf16 %v4879_v63, %v4878_v62 }
0x1dd5   : > { %5869 = vmatprep.mubr.msk.f32.mxu0 %vm6216_vm0, %v6217_v11  ;;  %6048 = vmatpush3.bf16.msra.mxu0 %v6047_v21 }
0x1dd6   : > { %6049 = vmatprep.subr.bf16.mxu0 %v6215_v3 }
0x1ea7   : > { %v4550_v1 = vpop.f32.mrb[42].mxu0 }
0x1ea8   : > { %v5855_v2 = vpop.f32.mrb[43].mxu0  ;;  %5859 = vmatmul.mubr.msk.f32.vlgmr.msra.gmra.mrb[50].mxu1 %vm939_vm2, %v4550_v1 }
0x1ea9   : > { %5888 = vmatprep.mubr.msk.f32.mxu1 %vm6216_vm0, %v6217_v11  ;;  %6054 = vmatpush3.bf16.msra.mxu1 %v6053_v26 }
0x1eaa   : > { %6055 = vmatprep.subr.bf16.mxu1 %v6215_v3 }
0x1ead   : > { %6057 = vmatpush3.bf16.msra.mxu1 %v6056_v28 }
0x1eae   : > { %6058 = vmatprep.subr.bf16.mxu1 %v6215_v3 }
0x1eb1   : > { %6060 = vmatpush3.bf16.msra.mxu1 %v6059_v35 }
0x1eb2   : > { %6061 = vmatprep.subr.bf16.mxu1 %v6215_v3 }
0x1eb5   : > { %6063 = vmatpush3.bf16.msra.mxu1 %v6062_v45 }
0x1f7b   : > { %v4625_v5 = vpop.f32.mrb[50].mxu1 }
0x1f7c   : > { %v4629_v7 = vadd.f32 %v4625_v5, %v4142_v37  ;;  %v5860_v8 = vpop.f32.mrb[51].mxu1 }
0x1f7d   : > { %v5283_v8 = vld [vmem:[%s7258_s17 + $0x2] ss:$0 sm:$0xff] }
0x1f7e   : > { %v4637_v9 = vadd.f32 %v5271_v6, %v4629_v7 }
0x1f80   : > { %v4638_v10 = vadd.f32 %v4637_v9, %v6798_v4  ;;  %v4672_v4 = vld [vmem:[%s7253_s12 + $0x10] sm:$0xff] }
0x1f81   : > { %v6050_v38 = vpack.c.bf16 %v4673_v22, %v4672_v4 }
0x1f82   : > { %v4643_v12 = vsel %vm699_vm1, %v4638_v10, 0.0 }
0x1f83   : > { %4644 = vadd.xlane.f32.xlu0 %v4643_v12  ;;  %6051 = vmatpush3.bf16.msra.mxu0 %v6050_v38  ;;  %v5284_v12 = vld [vmem:[%s7260_s19] ss:$0 sm:$0xff] }
0x1f84   : > { %6064 = vmatprep.subr.bf16.mxu0 %v6215_v3 }
0x2010   : > { %v4645_v13 = vpop.xlane.xlu0 %4644 }
0x2011   : > { %v4646_v15 = vmul.f32 0.03125, %v4645_v13 }
0x2013   : > { %v4647_v16 = vsub.f32 %v4638_v10, %v4646_v15 }
0x2015   : > { %v4648_v17 = vmul.f32 %v4647_v16, %v4647_v16 }
0x2017   : > { %v4649_v18 = vsel %vm699_vm1, %v4648_v17, 0.0 }
0x2018   : > { %4650 = vadd.xlane.f32.xlu1 %v4649_v18 }
0x20a5   : > { %v4651_v36 = vpop.xlane.xlu1 %4650 }
0x20a6   : > { %v4652_v37 = vmul.f32 0.03125, %v4651_v36 }
0x20a8   : > { %v4653_v39 = vadd.f32 1e-05, %v4652_v37 }
0x20aa   : > { %6147 = vrsqrt.f32 %v4653_v39 }
0x20b4   : > { %v6148_v40 = vpop.eup %6147 }
0x20b5   : > { %v4655_v42 = vmul.f32 %v6148_v40, %v4647_v16 }
0x20b7   : > { %v4662_v33 = vmul.f32 %v5274_v41, %v4655_v42 }
0x20b9   : > { %v4669_v31 = vadd.f32 %v5275_v43, %v4662_v33 }
0x20bb   : > { %5870 = vmatmul.mubr.msk.f32.vlgmr.msra.gmra.mrb[44].mxu0 %vm699_vm1, %v4669_v31 }
0x20bc   : > { %5899 = vmatprep.mubr.msk.f32.mxu0 %vm6216_vm0, %v6217_v11  ;;  %v5278_v11 = vld [vmem:[%s7256_s15] ss:$0 sm:$0xff]  ;;  %6066 = vmatpush3.bf16.msra.mxu0 %v6065_v34 }
0x20bd   : > { %6067 = vmatprep.subr.bf16.mxu0 %v6215_v3  ;;  %v5282_v3 = vld [vmem:[%s7257_s16 + $0x2] ss:$0 sm:$0xff] }
0x20c0   : > { %6069 = vmatpush3.bf16.msra.mxu0 %v6068_v0 }
0x218e   : > { %v4750_v46 = vpop.f32.mrb[44].mxu0 }
0x218f   : > { %v4751_v47 = vadd.f32 %v5276_v14, %v4750_v46  ;;  %v5871_v48 = vpop.f32.mrb[45].mxu0 }
0x2191   : > { %v4754_v49 = vmax.f32 %v4751_v47, 0.0 }
0x2193   : > { %5889 = vmatmul.mubr.msk.f32.vlgmr.msra.gmra.mrb[52].mxu1 %vm4770_vm9, %v4754_v49 }
0x2266   : > { %v4840_v50 = vpop.f32.mrb[52].mxu1 }
0x2267   : > { %v4841_v51 = vadd.f32 %v5278_v11, %v4840_v50  ;;  %v5890_v52 = vpop.f32.mrb[53].mxu1 }
0x2269   : > { %v4844_v53 = vadd.f32 %v4841_v51, %v4669_v31 }
0x226b   : > { %v4849_v54 = vsel %vm699_vm1, %v4844_v53, 0.0 }
0x226c   : > { %4850 = vadd.xlane.f32.xlu0 %v4849_v54 }
0x22f9   : > { %v4851_v56 = vpop.xlane.xlu0 %4850 }
0x22fa   : > { %v4852_v57 = vmul.f32 0.03125, %v4851_v56 }
0x22fc   : > { %v4853_v58 = vsub.f32 %v4844_v53, %v4852_v57 }
0x22fe   : > { %v4854_v55 = vmul.f32 %v4853_v58, %v4853_v58 }
0x2300   : > { %v4855_v59 = vsel %vm699_vm1, %v4854_v55, 0.0 }
0x2301   : > { %4856 = vadd.xlane.f32.xlu1 %v4855_v59 }
0x238e   : > { %v4857_v1 = vpop.xlane.xlu1 %4856 }
0x238f   : > { %v4858_v2 = vmul.f32 0.03125, %v4857_v1 }
0x2391   : > { %v4859_v5 = vadd.f32 1e-05, %v4858_v2 }
0x2393   : > { %6149 = vrsqrt.f32 %v4859_v5 }
0x239d   : > { %v6150_v6 = vpop.eup %6149 }
0x239e   : > { %v4861_v7 = vmul.f32 %v6150_v6, %v4853_v58 }
0x23a0   : > { %v4868_v9 = vmul.f32 %v5282_v3, %v4861_v7 }
0x23a2   : > { %v4875_v10 = vadd.f32 %v5283_v8, %v4868_v9 }
0x23a4   : > { %5900 = vmatmul.mubr.msk.f32.vlgmr.msra.gmra.mrb[46].mxu0 %vm699_vm1, %v4875_v10 }
0x2477   : > { %v4956_v13 = vpop.f32.mrb[46].mxu0 }
0x2478   : > { %v4957_v15 = vadd.f32 %v5284_v12, %v4956_v13  ;;  %v5901_v16 = vpop.f32.mrb[47].mxu0 }
0x247a   : > { %4961 = vst.msk [vmem:[%s655_s0] sm:$0xff] %vm4960_vm10, %v4957_v15 }
0x247b   : > { %6164 = shalt.err (!%p6161_p3)
}
0x247c   : > { %s6165_s28 = scalar_lea.hbm %s7199_s5, 128  ;;  %s6169_s23 = scalar_lea.hbm %s7261_s20, 256 }
0x247d   : > { %p6166_p4 = scmp.ne.s32.totalorder %s7199_s5, %s6165_s28  ;;  %p6170_p9 = scmp.lt.u32.totalorder %s7199_s5, %s7261_s20 }
0x247e   : > { %p6171_p10 = scmp.lt.u32.totalorder %s6169_s23, %s6165_s28  ;;  %p6173_p12 = scmp.lt.u32.totalorder %s6165_s28, %s7199_s5 }
0x247f   : > { %p6167_p7 = pnand %p6166_p4, %p6363_p5 }
0x2480   : > { %p6172_p11 = por %p6171_p10, %p6170_p9 }
0x2481   : > { %p6168_p8 = pneg %p6167_p7 }
0x2482   : > { %p6174_p13 = por %p6173_p12, %p6172_p11 }
0x2484   : > { %p6175_p0 = pnand %p6174_p13, %p6168_p8 }
0x2486   : > { %6178 = shalt.err (!%p6175_p0)
}
0x2487   : > { %6070 = dma.vmem_to_hbm [thread:$0]  (%p6363_p5), %s7201_s25, 128, %s7199_s5, %s4963_s1  }
0x2488 PF: > { %s7289_s3 = sld [smem:[#allocation5_spill]]  ;;  %p6076_p1 = scmp.ge.s32.totalorder %s6213_s24, 2 }
0x248a   : > { %p6073_p2 = pnand %p6076_p1, %p6367_p6 }
0x248e   : > { %s4988_s29 = sand.u32 1, %s7289_s3  }
0x248f   : > { %s4989_s30 = scalar_lea.sflag [#allocation3], %s4988_s29 }
0x2490   : > { %6196 = dma.done.wait (!%p6073_p2), %s4989_s30, 128  }
0x2491   : > { %6198 = vsyncadd (!%p6073_p2), %s4989_s30, 4294967168  ;;  %s7291_s24 = sld [smem:[#allocation7_spill]]  ;;  %s7292_s28 = sld [smem:[#allocation6_spill]] }
0x2492   : > { %s7293_s23 = sld [smem:[#allocation8_spill]]  ;;  %s7294_s1 = smov %s6205_s22 }
0x2497   : > { %p30_p3 = scmp.ge.s32.totalorder %s7291_s24, 4   ;;  %s7295_s22 = smov %s7292_s28 }
0x2499   :  { %32 = sbr.rel (!%p30_p3) target bundleno = 10 (0xa), region = 198 }
0x24a0   :  { %4994 = vsyncpa [#allocation3], 1 }
0x24a1   :  { %4996 = vsyncpa [#allocation3 + $0x1], 1 }

</bundles_post_ra>
